<compile_context>
chip_gen: v7x
topology: tpu7x:2x2x1
jax: 0.10.0
libtpu: 0.0.40
codegen_flags: <defaults>
</compile_context>

<pallas_src>
import functools

import jax
import jax.numpy as jnp
import numpy as np
from jax.experimental import pallas as pl
from jax.experimental.pallas import tpu as pltpu

# ---- config.MODEL.PARAMETERS.* (small, deterministic) ----
NUM_UNROLLS = 2          # NUM_UNROLLS
NUM_FEATURES = 8         # NUM_FEATURES
KERNEL_SIZE = 3          # CONV_BLOCK.KERNEL_SIZE[0]
NUM_EMAPS = 1            # NUM_EMAPS
USE_COMPLEX_LAYERS = False
IN_CHANS = NUM_EMAPS if USE_COMPLEX_LAYERS else 2 * NUM_EMAPS   # = 2
EMB_DIM = NUM_FEATURES   # conditioning embedding width


# ------------------------------------------------------------------
# Fused Pallas kernel: all unrolls of (conv resblock + data consistency), one image per grid step
# ------------------------------------------------------------------
def _fused_unrolled_dc_kernel(
        x0_ref, ix0_ref, cm_ref,
        fhf_ref, fhb_ref, fwf_ref, fwb_ref,
        m1_ref, m2_ref,
        mult1_ref, add1_ref, gmul_ref, gadd_ref,
        out_ref, *, H, W, U):
    """Activation layout: (C*H, W) f32, channel-planar row stack, W on lanes.
    Convs = banded bf16 MXU matmuls (dy, ci folded in); dx = lane roll.
    DC = block-complex bf16 MXU matmuls with f32 accumulation."""
    dot = functools.partial(jnp.dot, preferred_element_type=jnp.float32)
    bf = lambda a: a.astype(jnp.bfloat16)

    # lane (dx) validity masks, built once from a 2-D iota (no extra inputs / VMEM traffic)
    wi = jax.lax.broadcasted_iota(jnp.int32, (1, W), 1)
    wm_l = (wi != 0).astype(jnp.float32)        # valid lanes when reading column w-1
    wm_r = (wi != W - 1).astype(jnp.float32)    # valid lanes when reading column w+1

    ix0 = ix0_ref[0]                            # (2H, W) hoisted IDFT(mask*F(x0)), f32
    cm = cm_ref[...]                            # (H, 2W) (1-mask) in lanes layout
    fhf = fhf_ref[...]                          # (2H, 2H) bf16 forward row-DFT block matrix
    fhb = fhb_ref[...]                          # (2H, 2H) bf16 inverse row-DFT block matrix
    fwf = fwf_ref[...]                          # (2W, 2W) bf16 forward col-DFT block matrix
    fwb = fwb_ref[...]                          # (2W, 2W) bf16 inverse col-DFT block matrix

    def conv3x3(inp, m_ref, u):
        # inp: (Cin*H, W) f32; m_ref[u, kx]: (Cout*H, Cin*H) bf16 banded weight matrix.
        # (dy, ci) contraction + border zero-pad are inside the matmul; dx is a lane roll.
        left = bf(pltpu.roll(inp, 1, axis=1) * wm_l)            # reads column w-1 (dx = -1)
        mid = bf(inp)                                           # dx = 0
        right = bf(pltpu.roll(inp, W - 1, axis=1) * wm_r)       # reads column w+1 (dx = +1)
        acc = dot(m_ref[u, 0], left)
        acc = acc + dot(m_ref[u, 1], mid)
        acc = acc + dot(m_ref[u, 2], right)
        return acc                                              # (Cout*H, W) f32

    x = x0_ref[0]                               # (2H, W) iterate: [real rows ; imag rows]
    for u in range(U):                          # static unroll; weights not shared
        # ---- nn_update[u]: conv(CI->F) -> adaLN -> GELU -> conv(F->CI) -> gated residual ----
        h1 = conv3x3(x, m1_ref, u)                                          # (F*H, W)
        h1 = jax.nn.gelu(h1 * mult1_ref[u, 0] + add1_ref[u, 0], approximate=True)
        y = x + conv3x3(h1, m2_ref, u) * gmul_ref[u, 0] + gadd_ref[u, 0]    # (2H, W)

        # ---- data consistency: x = ix0 + A_F((1-mask) * F(y), adjoint=True) ----
        z = dot(fhf, bf(y))                                                 # row DFT (2H, W)
        zl = jnp.concatenate([z[0:H, :], z[H:2 * H, :]], axis=1)            # -> (H, 2W)
        k = dot(bf(zl), fwf)                                                # col DFT (H, 2W)
        r1 = dot(bf(cm * k), fwb)                                           # col IDFT (H, 2W)
        r1s = jnp.concatenate([r1[:, 0:W], r1[:, W:2 * W]], axis=0)         # -> (2H, W)
        x = ix0 + dot(fhb, bf(r1s))                                         # row IDFT + hoist

    out_ref[0] = x


# ------------------------------------------------------------------
# Glue (plain JAX): conditioning, DFT matrices, band matrices, parameter init
# ------------------------------------------------------------------
def timestep_embedding(t, dim):
    half = dim // 2
    freqs = jnp.exp(-jnp.log(10000.0) * jnp.arange(half, dtype=jnp.float32) / half)
    args = t.astype(jnp.float32)[:, None] * freqs[None, :]
    return jnp.concatenate([jnp.cos(args), jnp.sin(args)], axis=-1)


def dft_matrices(n):
    idx = jnp.arange(n, dtype=jnp.float32)
    ang = -2.0 * jnp.pi * jnp.outer(idx, idx) / n
    scale = 1.0 / jnp.sqrt(jnp.float32(n))
    return jnp.cos(ang) * scale, jnp.sin(ang) * scale     # unitary DFT, real & imag


def init_params(key):
    params = []
    for _ in range(NUM_UNROLLS):                           # share_weights = False
        key, k1, k2, k3 = jax.random.split(key, 4)
        params.append(dict(
            w1=0.1 * jax.random.normal(k1, (KERNEL_SIZE, KERNEL_SIZE, IN_CHANS, NUM_FEATURES), jnp.float32),
            b1=jnp.zeros((1, NUM_FEATURES), jnp.float32),
            w2=0.1 * jax.random.normal(k2, (KERNEL_SIZE, KERNEL_SIZE, NUM_FEATURES, IN_CHANS), jnp.float32),
            b2=jnp.zeros((1, IN_CHANS), jnp.float32),
            wmod=0.1 * jax.random.normal(k3, (EMB_DIM, 2 * NUM_FEATURES + IN_CHANS), jnp.float32),
            bmod=jnp.zeros((2 * NUM_FEATURES + IN_CHANS,), jnp.float32),
        ))
    return params


def data_consistency_forward(x0r, x0i, t, c, mask, params):
    """Pallas equivalent of DataConsistency.forward(x0, t, A, A_1, A_F, A_S, fs, c)."""
    B, H, W = x0r.shape
    F, CI, K, U = NUM_FEATURES, IN_CHANS, KERNEL_SIZE, NUM_UNROLLS
    assert CI == 2, "stand-in nn_update assumes a [real, imag] channel pair"

    # unitary DFT matrices and their block-complex bf16 forms (MXU operands)
    fhr, fhi = dft_matrices(H)
    fwr, fwi = dft_matrices(W)
    fh_fwd = jnp.block([[fhr, -fhi], [fhi, fhr]]).astype(jnp.bfloat16)   # Fh @ (.)
    fh_inv = jnp.block([[fhr, fhi], [-fhi, fhr]]).astype(jnp.bfloat16)   # conj(Fh) @ (.)
    fw_fwd = jnp.block([[fwr, fwi], [-fwi, fwr]]).astype(jnp.bfloat16)   # (.) @ Fw
    fw_inv = jnp.block([[fwr, -fwi], [fwi, fwr]]).astype(jnp.bfloat16)   # (.) @ conj(Fw)

    # hoisted (f32): ix0 = IDFT(mask * F(x0)); the measured samples never touch bf16
    x0c = x0r + 1j * x0i
    ix0c = jnp.fft.ifft2(mask[None] * jnp.fft.fft2(x0c, norm='ortho'), norm='ortho')
    ix0_stack = jnp.concatenate([jnp.real(ix0c), jnp.imag(ix0c)], axis=1).astype(jnp.float32)
    x0_stack = jnp.concatenate([x0r, x0i], axis=1)                       # (B, 2H, W)
    cm2 = jnp.concatenate([1.0 - mask, 1.0 - mask], axis=1)              # (H, 2W)

    # banded conv matrices: (dy, ci) contraction folded into one (Cout*H, Cin*H) matrix per dx
    hh = jnp.arange(H)
    diff = hh[None, :] - hh[:, None]                                     # g - h
    band = jnp.stack([(diff == d).astype(jnp.float32) for d in (-1, 0, 1)], axis=0)  # (3,H,H)
    m1_list, m2_list = [], []
    for p in params:
        m1_kx = [jnp.einsum('dhg,dcf->fhcg', band, p['w1'][:, kx]).reshape(F * H, CI * H)
                 for kx in range(K)]
        m2_kx = [jnp.einsum('dhg,dfc->chfg', band, p['w2'][:, kx]).reshape(CI * H, F * H)
                 for kx in range(K)]
        m1_list.append(jnp.stack(m1_kx))
        m2_list.append(jnp.stack(m2_kx))
    m1_all = jnp.stack(m1_list).astype(jnp.bfloat16)                     # (U, 3, F*H, CI*H)
    m2_all = jnp.stack(m2_list).astype(jnp.bfloat16)                     # (U, 3, CI*H, F*H)

    # adaLN conditioning -> tiny per-(unroll, batch) row vectors (bias folded in)
    temb = timestep_embedding(t, EMB_DIM)
    cond = jax.nn.silu(temb + c)                                         # computed once
    mult1_l, add1_l, gmul_l, gadd_l = [], [], [], []
    for p in params:
        mod = cond @ p['wmod'] + p['bmod']                               # (B, 2F + CI)
        scale, shift, gate = mod[:, :F], mod[:, F:2 * F], mod[:, 2 * F:]
        mult1_l.append(jnp.repeat(1.0 + scale, H, axis=1))               # (B, F*H)
        add1_l.append(jnp.repeat(p['b1'] * (1.0 + scale) + shift, H, axis=1))
        gmul_l.append(jnp.repeat(gate, H, axis=1))                       # (B, CI*H)
        gadd_l.append(jnp.repeat(gate * p['b2'], H, axis=1))
    mult1 = jnp.stack(mult1_l).reshape(U, B, F * H, 1)
    add1 = jnp.stack(add1_l).reshape(U, B, F * H, 1)
    gmul = jnp.stack(gmul_l).reshape(U, B, CI * H, 1)
    gadd = jnp.stack(gadd_l).reshape(U, B, CI * H, 1)

    def _const_spec(shape):
        zeros = (0,) * len(shape)
        return pl.BlockSpec(shape, lambda b: zeros)

    kernel = functools.partial(_fused_unrolled_dc_kernel, H=H, W=W, U=U)
    out_stack = pl.pallas_call(
        kernel,
        out_shape=jax.ShapeDtypeStruct((B, 2 * H, W), jnp.float32),
        grid=(B,),
        in_specs=[
            pl.BlockSpec((1, 2 * H, W), lambda b: (b, 0, 0)),            # x0 (initial iterate)
            pl.BlockSpec((1, 2 * H, W), lambda b: (b, 0, 0)),            # ix0 (hoisted DC term)
            _const_spec((H, 2 * W)),                                     # (1 - mask)
            _const_spec((2 * H, 2 * H)), _const_spec((2 * H, 2 * H)),    # fh fwd / inv
            _const_spec((2 * W, 2 * W)), _const_spec((2 * W, 2 * W)),    # fw fwd / inv
            _const_spec((U, K, F * H, CI * H)),                          # conv1 band matrices
            _const_spec((U, K, CI * H, F * H)),                          # conv2 band matrices
            pl.BlockSpec((U, 1, F * H, 1), lambda b: (0, b, 0, 0)),      # adaLN mult
            pl.BlockSpec((U, 1, F * H, 1), lambda b: (0, b, 0, 0)),      # adaLN add (bias+shift)
            pl.BlockSpec((U, 1, CI * H, 1), lambda b: (0, b, 0, 0)),     # gate
            pl.BlockSpec((U, 1, CI * H, 1), lambda b: (0, b, 0, 0)),     # gate * bias2
        ],
        out_specs=pl.BlockSpec((1, 2 * H, W), lambda b: (b, 0, 0)),
        compiler_params=pltpu.CompilerParams(
            dimension_semantics=("parallel",),        # batch split across TCs on v7x
            vmem_limit_bytes=64 * 1024 * 1024),       # v6e/v5e: raise further for big tiles
    )(x0_stack, ix0_stack, cm2, fh_fwd, fh_inv, fw_fwd, fw_inv,
      m1_all, m2_all, mult1, add1, gmul, gadd)
    return out_stack[:, :H, :], out_stack[:, H:, :]


# ------------------------------------------------------------------
# Pure-JAX reference (same math, lax.conv + jnp.fft)
# ------------------------------------------------------------------
def _conv_ref(x, w, b):
    y = jax.lax.conv_general_dilated(x, w, (1, 1), 'SAME',
                                     dimension_numbers=('NHWC', 'HWIO', 'NHWC'))
    return y + b.reshape(1, 1, 1, -1)


def reference_forward(x0r, x0i, t, c, mask, params):
    F = NUM_FEATURES
    x0c = x0r + 1j * x0i
    xc = x0c
    for i in range(NUM_UNROLLS):
        p = params[i]
        temb = timestep_embedding(t, EMB_DIM)
        cond = jax.nn.silu(temb + c)
        mod = cond @ p['wmod'] + p['bmod']
        scale = mod[:, :F][:, None, None, :]
        shift = mod[:, F:2 * F][:, None, None, :]
        gate = mod[:, 2 * F:][:, None, None, :]
        x_nn = jnp.stack([xc.real, xc.imag], axis=-1)
        h = _conv_ref(x_nn, p['w1'], p['b1'])
        h = jax.nn.gelu(h * (1.0 + scale) + shift, approximate=True)
        y = x_nn + _conv_ref(h, p['w2'], p['b2']) * gate
        yc = y[..., 0] + 1j * y[..., 1]
        kx = jnp.fft.fft2(yc, norm='ortho')
        k0 = jnp.fft.fft2(x0c, norm='ortho')
        kd = mask * k0 + (1.0 - mask) * kx
        xc = jnp.fft.ifft2(kd, norm='ortho')
    return xc.real, xc.imag


# ------------------------------------------------------------------
if __name__ == "__main__":
    B, H, W = 2, 16, 16
    key = jax.random.PRNGKey(0)
    key, kx, ki, kt, kc = jax.random.split(key, 5)
    x0r = jax.random.normal(kx, (B, H, W), jnp.float32)       # real part of x0
    x0i = jax.random.normal(ki, (B, H, W), jnp.float32)       # imag part of x0
    t = jax.random.uniform(kt, (B,), jnp.float32, 0.0, 1000.0)
    c = jax.random.normal(kc, (B, EMB_DIM), jnp.float32)

    mask = jnp.zeros((H, W), jnp.float32)                     # deterministic sampling mask
    mask = mask.at[:, ::2].set(1.0)
    mask = mask.at[:, W // 2 - 2:W // 2 + 2].set(1.0)

    params = init_params(jax.random.PRNGKey(42))

    out_r, out_i = data_consistency_forward(x0r, x0i, t, c, mask, params)
    jax.block_until_ready(out_r)
    jax.block_until_ready(out_i)

    ref_r, ref_i = reference_forward(x0r, x0i, t, c, mask, params)
    # Tolerance reflects bf16 MXU operands (conv + DC matmuls) with f32 accumulation;
    # the measured-k-space path is f32, so genuine layout/semantic bugs give O(1) errors.
    np.testing.assert_allclose(np.asarray(out_r), np.asarray(ref_r), rtol=5e-2, atol=5e-2)
    np.testing.assert_allclose(np.asarray(out_i), np.asarray(ref_i), rtol=5e-2, atol=5e-2)
    print("KERNEL_OK")
</pallas_src>

<mosaic_0001>
module attributes {stable_mosaic.version = 11 : i64} {
  func.func @_fused_unrolled_dc_kernel(%arg0: i32, %arg1: memref<1x32x16xf32, #tpu.memory_space<vmem>>, %arg2: memref<1x32x16xf32, #tpu.memory_space<vmem>>, %arg3: memref<16x32xf32, #tpu.memory_space<vmem>>, %arg4: memref<32x32xbf16, #tpu.memory_space<vmem>>, %arg5: memref<32x32xbf16, #tpu.memory_space<vmem>>, %arg6: memref<32x32xbf16, #tpu.memory_space<vmem>>, %arg7: memref<32x32xbf16, #tpu.memory_space<vmem>>, %arg8: memref<2x3x128x32xbf16, #tpu.memory_space<vmem>>, %arg9: memref<2x3x32x128xbf16, #tpu.memory_space<vmem>>, %arg10: memref<2x1x128x1xf32, #tpu.memory_space<vmem>>, %arg11: memref<2x1x128x1xf32, #tpu.memory_space<vmem>>, %arg12: memref<2x1x32x1xf32, #tpu.memory_space<vmem>>, %arg13: memref<2x1x32x1xf32, #tpu.memory_space<vmem>>, %arg14: memref<1x32x16xf32, #tpu.memory_space<vmem>>) attributes {dimension_semantics = [#tpu.dimension_semantics<parallel>], iteration_bounds = array<i64: 2>, scalar_prefetch = 0 : i64, scratch_operands = 0 : i64, tpu.core_type = #tpu.core_type<tc>, window_params = [{transform_indices = @transform_0, window_bounds = array<i64: 1, 32, 16>}, {transform_indices = @transform_1, window_bounds = array<i64: 1, 32, 16>}, {pipeline_mode = #tpu.pipeline_mode<synchronous>, transform_indices = @transform_2, window_bounds = array<i64: 16, 32>}, {pipeline_mode = #tpu.pipeline_mode<synchronous>, transform_indices = @transform_3, window_bounds = array<i64: 32, 32>}, {pipeline_mode = #tpu.pipeline_mode<synchronous>, transform_indices = @transform_4, window_bounds = array<i64: 32, 32>}, {pipeline_mode = #tpu.pipeline_mode<synchronous>, transform_indices = @transform_5, window_bounds = array<i64: 32, 32>}, {pipeline_mode = #tpu.pipeline_mode<synchronous>, transform_indices = @transform_6, window_bounds = array<i64: 32, 32>}, {pipeline_mode = #tpu.pipeline_mode<synchronous>, transform_indices = @transform_7, window_bounds = array<i64: 2, 3, 128, 32>}, {pipeline_mode = #tpu.pipeline_mode<synchronous>, transform_indices = @transform_8, window_bounds = array<i64: 2, 3, 32, 128>}, {transform_indices = @transform_9, window_bounds = array<i64: 2, 1, 128, 1>}, {transform_indices = @transform_10, window_bounds = array<i64: 2, 1, 128, 1>}, {transform_indices = @transform_11, window_bounds = array<i64: 2, 1, 32, 1>}, {transform_indices = @transform_12, window_bounds = array<i64: 2, 1, 32, 1>}, {transform_indices = @transform_13, window_bounds = array<i64: 1, 32, 16>}]} {
    %0 = tpu.iota {dimensions = array<i32: 1>} : vector<1x16xi32>
    %c0_i32 = arith.constant 0 : i32
    %1 = vector.broadcast %c0_i32 : i32 to vector<1x16xi32>
    %2 = arith.cmpi ne, %0, %1 : vector<1x16xi32>
    %3 = arith.extui %2 : vector<1x16xi1> to vector<1x16xi32>
    %4 = arith.sitofp %3 : vector<1x16xi32> to vector<1x16xf32>
    %c15_i32 = arith.constant 15 : i32
    %5 = vector.broadcast %c15_i32 : i32 to vector<1x16xi32>
    %6 = arith.cmpi ne, %0, %5 : vector<1x16xi32>
    %7 = arith.extui %6 : vector<1x16xi1> to vector<1x16xi32>
    %8 = arith.sitofp %7 : vector<1x16xi32> to vector<1x16xf32>
    %c0 = arith.constant 0 : index
    %c0_0 = arith.constant 0 : index
    %c0_1 = arith.constant 0 : index
    %9 = vector.load %arg2[%c0, %c0_0, %c0_1] : memref<1x32x16xf32, #tpu.memory_space<vmem>>, vector<1x32x16xf32>
    %10 = vector.shape_cast %9 : vector<1x32x16xf32> to vector<32x16xf32>
    %c0_2 = arith.constant 0 : index
    %c0_3 = arith.constant 0 : index
    %11 = vector.load %arg3[%c0_2, %c0_3] : memref<16x32xf32, #tpu.memory_space<vmem>>, vector<16x32xf32>
    %c0_4 = arith.constant 0 : index
    %c0_5 = arith.constant 0 : index
    %12 = vector.load %arg4[%c0_4, %c0_5] : memref<32x32xbf16, #tpu.memory_space<vmem>>, vector<32x32xbf16>
    %c0_6 = arith.constant 0 : index
    %c0_7 = arith.constant 0 : index
    %13 = vector.load %arg5[%c0_6, %c0_7] : memref<32x32xbf16, #tpu.memory_space<vmem>>, vector<32x32xbf16>
    %c0_8 = arith.constant 0 : index
    %c0_9 = arith.constant 0 : index
    %14 = vector.load %arg6[%c0_8, %c0_9] : memref<32x32xbf16, #tpu.memory_space<vmem>>, vector<32x32xbf16>
    %c0_10 = arith.constant 0 : index
    %c0_11 = arith.constant 0 : index
    %15 = vector.load %arg7[%c0_10, %c0_11] : memref<32x32xbf16, #tpu.memory_space<vmem>>, vector<32x32xbf16>
    %c0_12 = arith.constant 0 : index
    %c0_13 = arith.constant 0 : index
    %c0_14 = arith.constant 0 : index
    %16 = vector.load %arg1[%c0_12, %c0_13, %c0_14] : memref<1x32x16xf32, #tpu.memory_space<vmem>>, vector<1x32x16xf32>
    %17 = vector.shape_cast %16 : vector<1x32x16xf32> to vector<32x16xf32>
    %c1_i32 = arith.constant 1 : i32
    %18 = tpu.dynamic_rotate %17 by %c1_i32 dim 1 : vector<32x16xf32>, i32 -> vector<32x16xf32>
    %19 = vector.broadcast %4 : vector<1x16xf32> to vector<32x16xf32>
    %20 = arith.mulf %18, %19 : vector<32x16xf32>
    %21 = arith.truncf %20 : vector<32x16xf32> to vector<32x16xbf16>
    %22 = arith.truncf %17 : vector<32x16xf32> to vector<32x16xbf16>
    %c15_i32_15 = arith.constant 15 : i32
    %23 = tpu.dynamic_rotate %17 by %c15_i32_15 dim 1 : vector<32x16xf32>, i32 -> vector<32x16xf32>
    %24 = vector.broadcast %8 : vector<1x16xf32> to vector<32x16xf32>
    %25 = arith.mulf %23, %24 : vector<32x16xf32>
    %26 = arith.truncf %25 : vector<32x16xf32> to vector<32x16xbf16>
    %c0_16 = arith.constant 0 : index
    %c0_17 = arith.constant 0 : index
    %c0_18 = arith.constant 0 : index
    %c0_19 = arith.constant 0 : index
    %27 = vector.load %arg8[%c0_16, %c0_17, %c0_18, %c0_19] : memref<2x3x128x32xbf16, #tpu.memory_space<vmem>>, vector<1x1x128x32xbf16>
    %28 = vector.shape_cast %27 : vector<1x1x128x32xbf16> to vector<128x32xbf16>
    %cst = arith.constant dense<0.000000e+00> : vector<128x16xf32>
    %29 = tpu.matmul %28, %21, %cst {dimension_numbers = #tpu.dot_dimension_numbers<[1], [0], [0], [1], [0, 0, 1, 1], [], []>} : vector<128x32xbf16>, vector<32x16xbf16>, vector<128x16xf32> -> vector<128x16xf32>
    %c0_20 = arith.constant 0 : index
    %c1 = arith.constant 1 : index
    %c0_21 = arith.constant 0 : index
    %c0_22 = arith.constant 0 : index
    %30 = vector.load %arg8[%c0_20, %c1, %c0_21, %c0_22] : memref<2x3x128x32xbf16, #tpu.memory_space<vmem>>, vector<1x1x128x32xbf16>
    %31 = vector.shape_cast %30 : vector<1x1x128x32xbf16> to vector<128x32xbf16>
    %cst_23 = arith.constant dense<0.000000e+00> : vector<128x16xf32>
    %32 = tpu.matmul %31, %22, %cst_23 {dimension_numbers = #tpu.dot_dimension_numbers<[1], [0], [0], [1], [0, 0, 1, 1], [], []>} : vector<128x32xbf16>, vector<32x16xbf16>, vector<128x16xf32> -> vector<128x16xf32>
    %33 = arith.addf %29, %32 : vector<128x16xf32>
    %c0_24 = arith.constant 0 : index
    %c2 = arith.constant 2 : index
    %c0_25 = arith.constant 0 : index
    %c0_26 = arith.constant 0 : index
    %34 = vector.load %arg8[%c0_24, %c2, %c0_25, %c0_26] : memref<2x3x128x32xbf16, #tpu.memory_space<vmem>>, vector<1x1x128x32xbf16>
    %35 = vector.shape_cast %34 : vector<1x1x128x32xbf16> to vector<128x32xbf16>
    %cst_27 = arith.constant dense<0.000000e+00> : vector<128x16xf32>
    %36 = tpu.matmul %35, %26, %cst_27 {dimension_numbers = #tpu.dot_dimension_numbers<[1], [0], [0], [1], [0, 0, 1, 1], [], []>} : vector<128x32xbf16>, vector<32x16xbf16>, vector<128x16xf32> -> vector<128x16xf32>
    %37 = arith.addf %33, %36 : vector<128x16xf32>
    %c0_28 = arith.constant 0 : index
    %c0_29 = arith.constant 0 : index
    %c0_30 = arith.constant 0 : index
    %c0_31 = arith.constant 0 : index
    %38 = vector.load %arg10[%c0_28, %c0_29, %c0_30, %c0_31] : memref<2x1x128x1xf32, #tpu.memory_space<vmem>>, vector<1x1x128x1xf32>
    %39 = vector.shape_cast %38 : vector<1x1x128x1xf32> to vector<128x1xf32>
    %40 = vector.broadcast %39 : vector<128x1xf32> to vector<128x16xf32>
    %41 = arith.mulf %37, %40 : vector<128x16xf32>
    %c0_32 = arith.constant 0 : index
    %c0_33 = arith.constant 0 : index
    %c0_34 = arith.constant 0 : index
    %c0_35 = arith.constant 0 : index
    %42 = vector.load %arg11[%c0_32, %c0_33, %c0_34, %c0_35] : memref<2x1x128x1xf32, #tpu.memory_space<vmem>>, vector<1x1x128x1xf32>
    %43 = vector.shape_cast %42 : vector<1x1x128x1xf32> to vector<128x1xf32>
    %44 = vector.broadcast %43 : vector<128x1xf32> to vector<128x16xf32>
    %45 = arith.addf %41, %44 : vector<128x16xf32>
    %46 = arith.mulf %45, %45 : vector<128x16xf32>
    %47 = arith.mulf %45, %46 : vector<128x16xf32>
    %cst_36 = arith.constant 4.471500e-02 : f32
    %48 = vector.broadcast %cst_36 : f32 to vector<128x16xf32>
    %49 = arith.mulf %48, %47 : vector<128x16xf32>
    %50 = arith.addf %45, %49 : vector<128x16xf32>
    %cst_37 = arith.constant 0.797884583 : f32
    %51 = vector.broadcast %cst_37 : f32 to vector<128x16xf32>
    %52 = arith.mulf %51, %50 : vector<128x16xf32>
    %53 = math.tanh %52 : vector<128x16xf32>
    %cst_38 = arith.constant 1.000000e+00 : f32
    %54 = vector.broadcast %cst_38 : f32 to vector<128x16xf32>
    %55 = arith.addf %54, %53 : vector<128x16xf32>
    %cst_39 = arith.constant 5.000000e-01 : f32
    %56 = vector.broadcast %cst_39 : f32 to vector<128x16xf32>
    %57 = arith.mulf %56, %55 : vector<128x16xf32>
    %58 = arith.mulf %45, %57 : vector<128x16xf32>
    %c1_i32_40 = arith.constant 1 : i32
    %59 = tpu.dynamic_rotate %58 by %c1_i32_40 dim 1 : vector<128x16xf32>, i32 -> vector<128x16xf32>
    %60 = vector.broadcast %4 : vector<1x16xf32> to vector<128x16xf32>
    %61 = arith.mulf %59, %60 : vector<128x16xf32>
    %62 = arith.truncf %61 : vector<128x16xf32> to vector<128x16xbf16>
    %63 = arith.truncf %58 : vector<128x16xf32> to vector<128x16xbf16>
    %c15_i32_41 = arith.constant 15 : i32
    %64 = tpu.dynamic_rotate %58 by %c15_i32_41 dim 1 : vector<128x16xf32>, i32 -> vector<128x16xf32>
    %65 = vector.broadcast %8 : vector<1x16xf32> to vector<128x16xf32>
    %66 = arith.mulf %64, %65 : vector<128x16xf32>
    %67 = arith.truncf %66 : vector<128x16xf32> to vector<128x16xbf16>
    %c0_42 = arith.constant 0 : index
    %c0_43 = arith.constant 0 : index
    %c0_44 = arith.constant 0 : index
    %c0_45 = arith.constant 0 : index
    %68 = vector.load %arg9[%c0_42, %c0_43, %c0_44, %c0_45] : memref<2x3x32x128xbf16, #tpu.memory_space<vmem>>, vector<1x1x32x128xbf16>
    %69 = vector.shape_cast %68 : vector<1x1x32x128xbf16> to vector<32x128xbf16>
    %cst_46 = arith.constant dense<0.000000e+00> : vector<32x16xf32>
    %70 = tpu.matmul %69, %62, %cst_46 {dimension_numbers = #tpu.dot_dimension_numbers<[1], [0], [0], [1], [0, 0, 1, 1], [], []>} : vector<32x128xbf16>, vector<128x16xbf16>, vector<32x16xf32> -> vector<32x16xf32>
    %c0_47 = arith.constant 0 : index
    %c1_48 = arith.constant 1 : index
    %c0_49 = arith.constant 0 : index
    %c0_50 = arith.constant 0 : index
    %71 = vector.load %arg9[%c0_47, %c1_48, %c0_49, %c0_50] : memref<2x3x32x128xbf16, #tpu.memory_space<vmem>>, vector<1x1x32x128xbf16>
    %72 = vector.shape_cast %71 : vector<1x1x32x128xbf16> to vector<32x128xbf16>
    %cst_51 = arith.constant dense<0.000000e+00> : vector<32x16xf32>
    %73 = tpu.matmul %72, %63, %cst_51 {dimension_numbers = #tpu.dot_dimension_numbers<[1], [0], [0], [1], [0, 0, 1, 1], [], []>} : vector<32x128xbf16>, vector<128x16xbf16>, vector<32x16xf32> -> vector<32x16xf32>
    %74 = arith.addf %70, %73 : vector<32x16xf32>
    %c0_52 = arith.constant 0 : index
    %c2_53 = arith.constant 2 : index
    %c0_54 = arith.constant 0 : index
    %c0_55 = arith.constant 0 : index
    %75 = vector.load %arg9[%c0_52, %c2_53, %c0_54, %c0_55] : memref<2x3x32x128xbf16, #tpu.memory_space<vmem>>, vector<1x1x32x128xbf16>
    %76 = vector.shape_cast %75 : vector<1x1x32x128xbf16> to vector<32x128xbf16>
    %cst_56 = arith.constant dense<0.000000e+00> : vector<32x16xf32>
    %77 = tpu.matmul %76, %67, %cst_56 {dimension_numbers = #tpu.dot_dimension_numbers<[1], [0], [0], [1], [0, 0, 1, 1], [], []>} : vector<32x128xbf16>, vector<128x16xbf16>, vector<32x16xf32> -> vector<32x16xf32>
    %78 = arith.addf %74, %77 : vector<32x16xf32>
    %c0_57 = arith.constant 0 : index
    %c0_58 = arith.constant 0 : index
    %c0_59 = arith.constant 0 : index
    %c0_60 = arith.constant 0 : index
    %79 = vector.load %arg12[%c0_57, %c0_58, %c0_59, %c0_60] : memref<2x1x32x1xf32, #tpu.memory_space<vmem>>, vector<1x1x32x1xf32>
    %80 = vector.shape_cast %79 : vector<1x1x32x1xf32> to vector<32x1xf32>
    %81 = vector.broadcast %80 : vector<32x1xf32> to vector<32x16xf32>
    %82 = arith.mulf %78, %81 : vector<32x16xf32>
    %83 = arith.addf %17, %82 : vector<32x16xf32>
    %c0_61 = arith.constant 0 : index
    %c0_62 = arith.constant 0 : index
    %c0_63 = arith.constant 0 : index
    %c0_64 = arith.constant 0 : index
    %84 = vector.load %arg13[%c0_61, %c0_62, %c0_63, %c0_64] : memref<2x1x32x1xf32, #tpu.memory_space<vmem>>, vector<1x1x32x1xf32>
    %85 = vector.shape_cast %84 : vector<1x1x32x1xf32> to vector<32x1xf32>
    %86 = vector.broadcast %85 : vector<32x1xf32> to vector<32x16xf32>
    %87 = arith.addf %83, %86 : vector<32x16xf32>
    %88 = arith.truncf %87 : vector<32x16xf32> to vector<32x16xbf16>
    %cst_65 = arith.constant dense<0.000000e+00> : vector<32x16xf32>
    %89 = tpu.matmul %12, %88, %cst_65 {dimension_numbers = #tpu.dot_dimension_numbers<[1], [0], [0], [1], [0, 0, 1, 1], [], []>} : vector<32x32xbf16>, vector<32x16xbf16>, vector<32x16xf32> -> vector<32x16xf32>
    %90 = vector.extract_strided_slice %89 {offsets = [0, 0], sizes = [16, 16], strides = [1, 1]} : vector<32x16xf32> to vector<16x16xf32>
    %91 = vector.extract_strided_slice %89 {offsets = [16, 0], sizes = [16, 16], strides = [1, 1]} : vector<32x16xf32> to vector<16x16xf32>
    %92 = tpu.concatenate %90, %91 in 1 : vector<16x16xf32>, vector<16x16xf32> -> vector<16x32xf32>
    %93 = arith.truncf %92 : vector<16x32xf32> to vector<16x32xbf16>
    %cst_66 = arith.constant dense<0.000000e+00> : vector<16x32xf32>
    %94 = tpu.matmul %93, %14, %cst_66 {dimension_numbers = #tpu.dot_dimension_numbers<[1], [0], [0], [1], [0, 0, 1, 1], [], []>} : vector<16x32xbf16>, vector<32x32xbf16>, vector<16x32xf32> -> vector<16x32xf32>
    %95 = arith.mulf %11, %94 : vector<16x32xf32>
    %96 = arith.truncf %95 : vector<16x32xf32> to vector<16x32xbf16>
    %cst_67 = arith.constant dense<0.000000e+00> : vector<16x32xf32>
    %97 = tpu.matmul %96, %15, %cst_67 {dimension_numbers = #tpu.dot_dimension_numbers<[1], [0], [0], [1], [0, 0, 1, 1], [], []>} : vector<16x32xbf16>, vector<32x32xbf16>, vector<16x32xf32> -> vector<16x32xf32>
    %98 = vector.extract_strided_slice %97 {offsets = [0, 0], sizes = [16, 16], strides = [1, 1]} : vector<16x32xf32> to vector<16x16xf32>
    %99 = vector.extract_strided_slice %97 {offsets = [0, 16], sizes = [16, 16], strides = [1, 1]} : vector<16x32xf32> to vector<16x16xf32>
    %100 = tpu.concatenate %98, %99 in 0 : vector<16x16xf32>, vector<16x16xf32> -> vector<32x16xf32>
    %101 = arith.truncf %100 : vector<32x16xf32> to vector<32x16xbf16>
    %cst_68 = arith.constant dense<0.000000e+00> : vector<32x16xf32>
    %102 = tpu.matmul %13, %101, %cst_68 {dimension_numbers = #tpu.dot_dimension_numbers<[1], [0], [0], [1], [0, 0, 1, 1], [], []>} : vector<32x32xbf16>, vector<32x16xbf16>, vector<32x16xf32> -> vector<32x16xf32>
    %103 = arith.addf %10, %102 : vector<32x16xf32>
    %c1_i32_69 = arith.constant 1 : i32
    %104 = tpu.dynamic_rotate %103 by %c1_i32_69 dim 1 : vector<32x16xf32>, i32 -> vector<32x16xf32>
    %105 = vector.broadcast %4 : vector<1x16xf32> to vector<32x16xf32>
    %106 = arith.mulf %104, %105 : vector<32x16xf32>
    %107 = arith.truncf %106 : vector<32x16xf32> to vector<32x16xbf16>
    %108 = arith.truncf %103 : vector<32x16xf32> to vector<32x16xbf16>
    %c15_i32_70 = arith.constant 15 : i32
    %109 = tpu.dynamic_rotate %103 by %c15_i32_70 dim 1 : vector<32x16xf32>, i32 -> vector<32x16xf32>
    %110 = vector.broadcast %8 : vector<1x16xf32> to vector<32x16xf32>
    %111 = arith.mulf %109, %110 : vector<32x16xf32>
    %112 = arith.truncf %111 : vector<32x16xf32> to vector<32x16xbf16>
    %c1_71 = arith.constant 1 : index
    %c0_72 = arith.constant 0 : index
    %c0_73 = arith.constant 0 : index
    %c0_74 = arith.constant 0 : index
    %113 = vector.load %arg8[%c1_71, %c0_72, %c0_73, %c0_74] : memref<2x3x128x32xbf16, #tpu.memory_space<vmem>>, vector<1x1x128x32xbf16>
    %114 = vector.shape_cast %113 : vector<1x1x128x32xbf16> to vector<128x32xbf16>
    %cst_75 = arith.constant dense<0.000000e+00> : vector<128x16xf32>
    %115 = tpu.matmul %114, %107, %cst_75 {dimension_numbers = #tpu.dot_dimension_numbers<[1], [0], [0], [1], [0, 0, 1, 1], [], []>} : vector<128x32xbf16>, vector<32x16xbf16>, vector<128x16xf32> -> vector<128x16xf32>
    %c1_76 = arith.constant 1 : index
    %c1_77 = arith.constant 1 : index
    %c0_78 = arith.constant 0 : index
    %c0_79 = arith.constant 0 : index
    %116 = vector.load %arg8[%c1_76, %c1_77, %c0_78, %c0_79] : memref<2x3x128x32xbf16, #tpu.memory_space<vmem>>, vector<1x1x128x32xbf16>
    %117 = vector.shape_cast %116 : vector<1x1x128x32xbf16> to vector<128x32xbf16>
    %cst_80 = arith.constant dense<0.000000e+00> : vector<128x16xf32>
    %118 = tpu.matmul %117, %108, %cst_80 {dimension_numbers = #tpu.dot_dimension_numbers<[1], [0], [0], [1], [0, 0, 1, 1], [], []>} : vector<128x32xbf16>, vector<32x16xbf16>, vector<128x16xf32> -> vector<128x16xf32>
    %119 = arith.addf %115, %118 : vector<128x16xf32>
    %c1_81 = arith.constant 1 : index
    %c2_82 = arith.constant 2 : index
    %c0_83 = arith.constant 0 : index
    %c0_84 = arith.constant 0 : index
    %120 = vector.load %arg8[%c1_81, %c2_82, %c0_83, %c0_84] : memref<2x3x128x32xbf16, #tpu.memory_space<vmem>>, vector<1x1x128x32xbf16>
    %121 = vector.shape_cast %120 : vector<1x1x128x32xbf16> to vector<128x32xbf16>
    %cst_85 = arith.constant dense<0.000000e+00> : vector<128x16xf32>
    %122 = tpu.matmul %121, %112, %cst_85 {dimension_numbers = #tpu.dot_dimension_numbers<[1], [0], [0], [1], [0, 0, 1, 1], [], []>} : vector<128x32xbf16>, vector<32x16xbf16>, vector<128x16xf32> -> vector<128x16xf32>
    %123 = arith.addf %119, %122 : vector<128x16xf32>
    %c1_86 = arith.constant 1 : index
    %c0_87 = arith.constant 0 : index
    %c0_88 = arith.constant 0 : index
    %c0_89 = arith.constant 0 : index
    %124 = vector.load %arg10[%c1_86, %c0_87, %c0_88, %c0_89] : memref<2x1x128x1xf32, #tpu.memory_space<vmem>>, vector<1x1x128x1xf32>
    %125 = vector.shape_cast %124 : vector<1x1x128x1xf32> to vector<128x1xf32>
    %126 = vector.broadcast %125 : vector<128x1xf32> to vector<128x16xf32>
    %127 = arith.mulf %123, %126 : vector<128x16xf32>
    %c1_90 = arith.constant 1 : index
    %c0_91 = arith.constant 0 : index
    %c0_92 = arith.constant 0 : index
    %c0_93 = arith.constant 0 : index
    %128 = vector.load %arg11[%c1_90, %c0_91, %c0_92, %c0_93] : memref<2x1x128x1xf32, #tpu.memory_space<vmem>>, vector<1x1x128x1xf32>
    %129 = vector.shape_cast %128 : vector<1x1x128x1xf32> to vector<128x1xf32>
    %130 = vector.broadcast %129 : vector<128x1xf32> to vector<128x16xf32>
    %131 = arith.addf %127, %130 : vector<128x16xf32>
    %132 = arith.mulf %131, %131 : vector<128x16xf32>
    %133 = arith.mulf %131, %132 : vector<128x16xf32>
    %cst_94 = arith.constant 4.471500e-02 : f32
    %134 = vector.broadcast %cst_94 : f32 to vector<128x16xf32>
    %135 = arith.mulf %134, %133 : vector<128x16xf32>
    %136 = arith.addf %131, %135 : vector<128x16xf32>
    %cst_95 = arith.constant 0.797884583 : f32
    %137 = vector.broadcast %cst_95 : f32 to vector<128x16xf32>
    %138 = arith.mulf %137, %136 : vector<128x16xf32>
    %139 = math.tanh %138 : vector<128x16xf32>
    %cst_96 = arith.constant 1.000000e+00 : f32
    %140 = vector.broadcast %cst_96 : f32 to vector<128x16xf32>
    %141 = arith.addf %140, %139 : vector<128x16xf32>
    %cst_97 = arith.constant 5.000000e-01 : f32
    %142 = vector.broadcast %cst_97 : f32 to vector<128x16xf32>
    %143 = arith.mulf %142, %141 : vector<128x16xf32>
    %144 = arith.mulf %131, %143 : vector<128x16xf32>
    %c1_i32_98 = arith.constant 1 : i32
    %145 = tpu.dynamic_rotate %144 by %c1_i32_98 dim 1 : vector<128x16xf32>, i32 -> vector<128x16xf32>
    %146 = vector.broadcast %4 : vector<1x16xf32> to vector<128x16xf32>
    %147 = arith.mulf %145, %146 : vector<128x16xf32>
    %148 = arith.truncf %147 : vector<128x16xf32> to vector<128x16xbf16>
    %149 = arith.truncf %144 : vector<128x16xf32> to vector<128x16xbf16>
    %c15_i32_99 = arith.constant 15 : i32
    %150 = tpu.dynamic_rotate %144 by %c15_i32_99 dim 1 : vector<128x16xf32>, i32 -> vector<128x16xf32>
    %151 = vector.broadcast %8 : vector<1x16xf32> to vector<128x16xf32>
    %152 = arith.mulf %150, %151 : vector<128x16xf32>
    %153 = arith.truncf %152 : vector<128x16xf32> to vector<128x16xbf16>
    %c1_100 = arith.constant 1 : index
    %c0_101 = arith.constant 0 : index
    %c0_102 = arith.constant 0 : index
    %c0_103 = arith.constant 0 : index
    %154 = vector.load %arg9[%c1_100, %c0_101, %c0_102, %c0_103] : memref<2x3x32x128xbf16, #tpu.memory_space<vmem>>, vector<1x1x32x128xbf16>
    %155 = vector.shape_cast %154 : vector<1x1x32x128xbf16> to vector<32x128xbf16>
    %cst_104 = arith.constant dense<0.000000e+00> : vector<32x16xf32>
    %156 = tpu.matmul %155, %148, %cst_104 {dimension_numbers = #tpu.dot_dimension_numbers<[1], [0], [0], [1], [0, 0, 1, 1], [], []>} : vector<32x128xbf16>, vector<128x16xbf16>, vector<32x16xf32> -> vector<32x16xf32>
    %c1_105 = arith.constant 1 : index
    %c1_106 = arith.constant 1 : index
    %c0_107 = arith.constant 0 : index
    %c0_108 = arith.constant 0 : index
    %157 = vector.load %arg9[%c1_105, %c1_106, %c0_107, %c0_108] : memref<2x3x32x128xbf16, #tpu.memory_space<vmem>>, vector<1x1x32x128xbf16>
    %158 = vector.shape_cast %157 : vector<1x1x32x128xbf16> to vector<32x128xbf16>
    %cst_109 = arith.constant dense<0.000000e+00> : vector<32x16xf32>
    %159 = tpu.matmul %158, %149, %cst_109 {dimension_numbers = #tpu.dot_dimension_numbers<[1], [0], [0], [1], [0, 0, 1, 1], [], []>} : vector<32x128xbf16>, vector<128x16xbf16>, vector<32x16xf32> -> vector<32x16xf32>
    %160 = arith.addf %156, %159 : vector<32x16xf32>
    %c1_110 = arith.constant 1 : index
    %c2_111 = arith.constant 2 : index
    %c0_112 = arith.constant 0 : index
    %c0_113 = arith.constant 0 : index
    %161 = vector.load %arg9[%c1_110, %c2_111, %c0_112, %c0_113] : memref<2x3x32x128xbf16, #tpu.memory_space<vmem>>, vector<1x1x32x128xbf16>
    %162 = vector.shape_cast %161 : vector<1x1x32x128xbf16> to vector<32x128xbf16>
    %cst_114 = arith.constant dense<0.000000e+00> : vector<32x16xf32>
    %163 = tpu.matmul %162, %153, %cst_114 {dimension_numbers = #tpu.dot_dimension_numbers<[1], [0], [0], [1], [0, 0, 1, 1], [], []>} : vector<32x128xbf16>, vector<128x16xbf16>, vector<32x16xf32> -> vector<32x16xf32>
    %164 = arith.addf %160, %163 : vector<32x16xf32>
    %c1_115 = arith.constant 1 : index
    %c0_116 = arith.constant 0 : index
    %c0_117 = arith.constant 0 : index
    %c0_118 = arith.constant 0 : index
    %165 = vector.load %arg12[%c1_115, %c0_116, %c0_117, %c0_118] : memref<2x1x32x1xf32, #tpu.memory_space<vmem>>, vector<1x1x32x1xf32>
    %166 = vector.shape_cast %165 : vector<1x1x32x1xf32> to vector<32x1xf32>
    %167 = vector.broadcast %166 : vector<32x1xf32> to vector<32x16xf32>
    %168 = arith.mulf %164, %167 : vector<32x16xf32>
    %169 = arith.addf %103, %168 : vector<32x16xf32>
    %c1_119 = arith.constant 1 : index
    %c0_120 = arith.constant 0 : index
    %c0_121 = arith.constant 0 : index
    %c0_122 = arith.constant 0 : index
    %170 = vector.load %arg13[%c1_119, %c0_120, %c0_121, %c0_122] : memref<2x1x32x1xf32, #tpu.memory_space<vmem>>, vector<1x1x32x1xf32>
    %171 = vector.shape_cast %170 : vector<1x1x32x1xf32> to vector<32x1xf32>
    %172 = vector.broadcast %171 : vector<32x1xf32> to vector<32x16xf32>
    %173 = arith.addf %169, %172 : vector<32x16xf32>
    %174 = arith.truncf %173 : vector<32x16xf32> to vector<32x16xbf16>
    %cst_123 = arith.constant dense<0.000000e+00> : vector<32x16xf32>
    %175 = tpu.matmul %12, %174, %cst_123 {dimension_numbers = #tpu.dot_dimension_numbers<[1], [0], [0], [1], [0, 0, 1, 1], [], []>} : vector<32x32xbf16>, vector<32x16xbf16>, vector<32x16xf32> -> vector<32x16xf32>
    %176 = vector.extract_strided_slice %175 {offsets = [0, 0], sizes = [16, 16], strides = [1, 1]} : vector<32x16xf32> to vector<16x16xf32>
    %177 = vector.extract_strided_slice %175 {offsets = [16, 0], sizes = [16, 16], strides = [1, 1]} : vector<32x16xf32> to vector<16x16xf32>
    %178 = tpu.concatenate %176, %177 in 1 : vector<16x16xf32>, vector<16x16xf32> -> vector<16x32xf32>
    %179 = arith.truncf %178 : vector<16x32xf32> to vector<16x32xbf16>
    %cst_124 = arith.constant dense<0.000000e+00> : vector<16x32xf32>
    %180 = tpu.matmul %179, %14, %cst_124 {dimension_numbers = #tpu.dot_dimension_numbers<[1], [0], [0], [1], [0, 0, 1, 1], [], []>} : vector<16x32xbf16>, vector<32x32xbf16>, vector<16x32xf32> -> vector<16x32xf32>
    %181 = arith.mulf %11, %180 : vector<16x32xf32>
    %182 = arith.truncf %181 : vector<16x32xf32> to vector<16x32xbf16>
    %cst_125 = arith.constant dense<0.000000e+00> : vector<16x32xf32>
    %183 = tpu.matmul %182, %15, %cst_125 {dimension_numbers = #tpu.dot_dimension_numbers<[1], [0], [0], [1], [0, 0, 1, 1], [], []>} : vector<16x32xbf16>, vector<32x32xbf16>, vector<16x32xf32> -> vector<16x32xf32>
    %184 = vector.extract_strided_slice %183 {offsets = [0, 0], sizes = [16, 16], strides = [1, 1]} : vector<16x32xf32> to vector<16x16xf32>
    %185 = vector.extract_strided_slice %183 {offsets = [0, 16], sizes = [16, 16], strides = [1, 1]} : vector<16x32xf32> to vector<16x16xf32>
    %186 = tpu.concatenate %184, %185 in 0 : vector<16x16xf32>, vector<16x16xf32> -> vector<32x16xf32>
    %187 = arith.truncf %186 : vector<32x16xf32> to vector<32x16xbf16>
    %cst_126 = arith.constant dense<0.000000e+00> : vector<32x16xf32>
    %188 = tpu.matmul %13, %187, %cst_126 {dimension_numbers = #tpu.dot_dimension_numbers<[1], [0], [0], [1], [0, 0, 1, 1], [], []>} : vector<32x32xbf16>, vector<32x16xbf16>, vector<32x16xf32> -> vector<32x16xf32>
    %189 = arith.addf %10, %188 : vector<32x16xf32>
    %c0_127 = arith.constant 0 : index
    %c0_128 = arith.constant 0 : index
    %c0_129 = arith.constant 0 : index
    %190 = vector.load %arg14[%c0_127, %c0_128, %c0_129] : memref<1x32x16xf32, #tpu.memory_space<vmem>>, vector<1x32x16xf32>
    %191 = vector.shape_cast %190 : vector<1x32x16xf32> to vector<32x16xf32>
    %192 = vector.shape_cast %189 : vector<32x16xf32> to vector<1x32x16xf32>
    tpu.vector_store %arg14[%c0_127, %c0_128, %c0_129], %192 {strides = array<i32>} : memref<1x32x16xf32, #tpu.memory_space<vmem>>, vector<1x32x16xf32>,
    return
  }
  func.func @transform_0(%arg0: i32) -> (i32, i32, i32) {
    %c0_i32 = arith.constant 0 : i32
    %c0_i32_0 = arith.constant 0 : i32
    %c0_i32_1 = arith.constant 0 : i32
    return %arg0, %c0_i32, %c0_i32_0 : i32, i32, i32
  }
  func.func @transform_1(%arg0: i32) -> (i32, i32, i32) {
    %c0_i32 = arith.constant 0 : i32
    %c0_i32_0 = arith.constant 0 : i32
    %c0_i32_1 = arith.constant 0 : i32
    return %arg0, %c0_i32, %c0_i32_0 : i32, i32, i32
  }
  func.func @transform_2(%arg0: i32) -> (i32, i32) {
    %c0_i32 = arith.constant 0 : i32
    %c0_i32_0 = arith.constant 0 : i32
    %c0_i32_1 = arith.constant 0 : i32
    return %c0_i32, %c0_i32_0 : i32, i32
  }
  func.func @transform_3(%arg0: i32) -> (i32, i32) {
    %c0_i32 = arith.constant 0 : i32
    %c0_i32_0 = arith.constant 0 : i32
    %c0_i32_1 = arith.constant 0 : i32
    return %c0_i32, %c0_i32_0 : i32, i32
  }
  func.func @transform_4(%arg0: i32) -> (i32, i32) {
    %c0_i32 = arith.constant 0 : i32
    %c0_i32_0 = arith.constant 0 : i32
    %c0_i32_1 = arith.constant 0 : i32
    return %c0_i32, %c0_i32_0 : i32, i32
  }
  func.func @transform_5(%arg0: i32) -> (i32, i32) {
    %c0_i32 = arith.constant 0 : i32
    %c0_i32_0 = arith.constant 0 : i32
    %c0_i32_1 = arith.constant 0 : i32
    return %c0_i32, %c0_i32_0 : i32, i32
  }
  func.func @transform_6(%arg0: i32) -> (i32, i32) {
    %c0_i32 = arith.constant 0 : i32
    %c0_i32_0 = arith.constant 0 : i32
    %c0_i32_1 = arith.constant 0 : i32
    return %c0_i32, %c0_i32_0 : i32, i32
  }
  func.func @transform_7(%arg0: i32) -> (i32, i32, i32, i32) {
    %c0_i32 = arith.constant 0 : i32
    %c0_i32_0 = arith.constant 0 : i32
    %c0_i32_1 = arith.constant 0 : i32
    %c0_i32_2 = arith.constant 0 : i32
    %c0_i32_3 = arith.constant 0 : i32
    return %c0_i32, %c0_i32_0, %c0_i32_1, %c0_i32_2 : i32, i32, i32, i32
  }
  func.func @transform_8(%arg0: i32) -> (i32, i32, i32, i32) {
    %c0_i32 = arith.constant 0 : i32
    %c0_i32_0 = arith.constant 0 : i32
    %c0_i32_1 = arith.constant 0 : i32
    %c0_i32_2 = arith.constant 0 : i32
    %c0_i32_3 = arith.constant 0 : i32
    return %c0_i32, %c0_i32_0, %c0_i32_1, %c0_i32_2 : i32, i32, i32, i32
  }
  func.func @transform_9(%arg0: i32) -> (i32, i32, i32, i32) {
    %c0_i32 = arith.constant 0 : i32
    %c0_i32_0 = arith.constant 0 : i32
    %c0_i32_1 = arith.constant 0 : i32
    %c0_i32_2 = arith.constant 0 : i32
    return %c0_i32, %arg0, %c0_i32_0, %c0_i32_1 : i32, i32, i32, i32
  }
  func.func @transform_10(%arg0: i32) -> (i32, i32, i32, i32) {
    %c0_i32 = arith.constant 0 : i32
    %c0_i32_0 = arith.constant 0 : i32
    %c0_i32_1 = arith.constant 0 : i32
    %c0_i32_2 = arith.constant 0 : i32
    return %c0_i32, %arg0, %c0_i32_0, %c0_i32_1 : i32, i32, i32, i32
  }
  func.func @transform_11(%arg0: i32) -> (i32, i32, i32, i32) {
    %c0_i32 = arith.constant 0 : i32
    %c0_i32_0 = arith.constant 0 : i32
    %c0_i32_1 = arith.constant 0 : i32
    %c0_i32_2 = arith.constant 0 : i32
    return %c0_i32, %arg0, %c0_i32_0, %c0_i32_1 : i32, i32, i32, i32
  }
  func.func @transform_12(%arg0: i32) -> (i32, i32, i32, i32) {
    %c0_i32 = arith.constant 0 : i32
    %c0_i32_0 = arith.constant 0 : i32
    %c0_i32_1 = arith.constant 0 : i32
    %c0_i32_2 = arith.constant 0 : i32
    return %c0_i32, %arg0, %c0_i32_0, %c0_i32_1 : i32, i32, i32, i32
  }
  func.func @transform_13(%arg0: i32) -> (i32, i32, i32) {
    %c0_i32 = arith.constant 0 : i32
    %c0_i32_0 = arith.constant 0 : i32
    %c0_i32_1 = arith.constant 0 : i32
    return %arg0, %c0_i32, %c0_i32_0 : i32, i32, i32
  }
}

</mosaic_0001>

<bundles_post_ra>
// kernel: tpu_custom_call.1
= control target key start
LH: loop header
LB: loop body
LE: loop exit
PB: predicated region body
PF: predicated region fallthrough
CT: control target
= control target key end

     0   :  { %s7664_s0 = inlined_call_operand.hbm [shape: f32[2,32,16], index: 0, kind: input, shape index: {}]   ;;  %s7665_s1 = inlined_call_operand.hbm [shape: f32[2,32,16], index: 1, kind: input, shape index: {}]   ;;  %s7666_s2 = inlined_call_operand.hbm [shape: f32[16,32], index: 2, kind: input, shape index: {}]   ;;  %s7667_s3 = inlined_call_operand.hbm [shape: bf16[32,32], index: 3, kind: input, shape index: {}]   ;;  %s7668_s4 = inlined_call_operand.hbm [shape: bf16[32,32], index: 4, kind: input, shape index: {}]   ;;  %s7669_s5 = inlined_call_operand.hbm [shape: bf16[32,32], index: 5, kind: input, shape index: {}]   ;;  %s7670_s6 = inlined_call_operand.hbm [shape: bf16[32,32], index: 6, kind: input, shape index: {}]   ;;  %s7671_s7 = inlined_call_operand.hbm [shape: bf16[2,3,128,32], index: 7, kind: input, shape index: {}]   ;;  %s7672_s8 = inlined_call_operand.hbm [shape: bf16[2,3,32,128], index: 8, kind: input, shape index: {}]   ;;  %s7673_s9 = inlined_call_operand.hbm [shape: f32[2,2,128,1], index: 9, kind: input, shape index: {}]   ;;  %s7674_s10 = inlined_call_operand.hbm [shape: f32[2,2,128,1], index: 10, kind: input, shape index: {}]   ;;  %s7675_s11 = inlined_call_operand.hbm [shape: f32[2,2,32,1], index: 11, kind: input, shape index: {}]   ;;  %s7676_s12 = inlined_call_operand.hbm [shape: f32[2,2,32,1], index: 12, kind: input, shape index: {}]   ;;  %s7677_s13 = inlined_call_operand.hbm [shape: f32[2,32,16], index: 13, kind: output, shape index: {}]  }
   0x1   :  { %7700 = sst [smem:[#allocation54_spill]] %s7667_s3 }
   0x2   :  { %7701 = sst [smem:[#allocation55_spill]] %s7669_s5 }
   0x3   :  { %7702 = sst [smem:[#allocation56_spill]] %s7676_s12 }
   0x4   :  { %7703 = sst [smem:[#allocation57_spill]] %s7677_s13 }
   0x5   :  { %18 = vsyncpa [#allocation3], 0 }
   0x6   :  { %20 = vsyncpa [#allocation3 + $0x1], 0 }
   0x7   :  { %21 = vsyncpa [#allocation6], 0 }
   0x8   :  { %23 = vsyncpa [#allocation6 + $0x1], 0 }
   0x9   :  { %24 = vsyncpa [#allocation9], 0 }
   0xa   :  { %25 = vsyncpa [#allocation12], 0 }
   0xb   :  { %26 = vsyncpa [#allocation15], 0 }
   0xc   :  { %27 = vsyncpa [#allocation18], 0 }
   0xd   :  { %29 = vsyncpa [#allocation18 + $0x1], 0 }
   0xe   :  { %30 = vsyncpa [#allocation21], 0 }
   0xf   :  { %32 = vsyncpa [#allocation21 + $0x1], 0 }
  0x10   :  { %33 = vsyncpa [#allocation4], 0 }
  0x11   :  { %35 = vsyncpa [#allocation4 + $0x1], 0  ;;  %s6152_s25 = smov 0   ;;  %s6154_s26 = smov 0  }
  0x12   :  { %s6156_s27 = smov 0   ;;  %s6158_s28 = smov 0  }
  0x13 LB: > { %7704 = sst [smem:[#allocation45_spill]] %s6017_s25  ;;  %s6173_s29 = sadd.s32 4294967295, %s6029_s28   ;;  %s6029_s28 = sphi %s6158_s28, %s7746_s28   ;;  %s6025_s27 = sphi %s6156_s27, %s7750_s27   ;;  %s6021_s26 = sphi %s6154_s26, %s7749_s26   ;;  %s6017_s25 = sphi %s6152_s25, %s7747_s25  }
  0x14   : > { %7705 = sst [smem:[#allocation46_spill]] %s6021_s26  ;;  %s4556_s30 = sadd.s32 4294967294, %s6029_s28  }
  0x15   : > { %7706 = sst [smem:[#allocation47_spill]] %s6173_s29  ;;  %s6177_s14 = sadd.s32 1, %s6029_s28  }
  0x16   : > { %7707 = sst [smem:[#allocation48_spill]] %s6177_s14  ;;  %s48_s15 = sadd.s32 1, %s6025_s27 }
  0x17   : > { %s45_s16 = ssub.s32 %s6029_s28, %s6177_s14  ;;  %p55_p0 = scmp.ne.s32.totalorder %s6025_s27, %s6021_s26 }
  0x18   : > { %p46_p1 = scmp.eq.s32.totalorder %s45_s16, 0  ;;  %p56_p2 = scmp.eq.s32.totalorder %s6029_s28, 0 }
  0x19   : > { %p61_p3 = scmp.ne.s32.totalorder %s6021_s26, %s6017_s25  ;;  %p7685_p4 = scmp.eq.s32.totalorder %s6173_s29, 0 }
  0x1a   : > { %s6189_s17 = scalar_select %p46_p1, %s6025_s27, %s48_s15  }
  0x1b   : > { %p6191_p5 = por %p56_p2, %p55_p0  ;;  %p6197_p6 = por %p7685_p4, %p61_p3 }
  0x1c   : > { %7708 = sst [smem:[#allocation49_spill]] %s6189_s17  ;;  %p362_p7 = scmp.eq.s32.totalorder %s6173_s29, 1 }
  0x1d   : > { %s7709_s18 = scalar_select %p6191_p5, 1, 0 }
  0x1e   : > { %s7710_s19 = scalar_select %p6197_p6, 1, 0 }
  0x1f   : > { %p368_p8 = scmp.eq.s32.totalorder %s4556_s30, 1  ;;  %p4557_p9 = scmp.ge.s32.totalorder %s6029_s28, 1 }
  0x20   : > { %7711 = sst [smem:[#allocation50_spill]] %s7710_s19  ;;  %p375_p10 = scmp.lt.s32.totalorder %s6029_s28, 3 }
  0x21   : > { %p6204_p11 = por %p362_p7, %p55_p0  ;;  %p6208_p12 = por %p368_p8, %p61_p3 }
  0x22   : > { %p6212_p13 = pnand %p4557_p9, %p375_p10  ;;  %s6031_s23 = smov [#allocation8]  }
  0x23   : > { %s7712_s20 = scalar_select %p6204_p11, 1, 0 }
  0x24   : > { %s7714_s21 = scalar_select %p6208_p12, 1, 0 }
  0x25   : > { %7713 = sst [smem:[#allocation51_spill]] %s7712_s20  ;;  %p5391_p1 = pneg %p6212_p13 }
  0x26   : > { %7715 = sst [smem:[#allocation52_spill]] %s7714_s21  ;;  %s400_s24 = sshll.u32 %s6031_s23, 4  ;;  %s401_s24 = int_to_ptr.vmem [resolvable:$true] %s400_s24 }
  0x27   : > { %s7716_s22 = scalar_select %p6212_p13, 1, 0 }
  0x28   : > { %p6220_p2 = pnand %p5391_p1, %p7685_p4  ;;  %s6032_s15 = smov [#allocation11]  }
  0x29   : > { %7717 = sst [smem:[#allocation53_spill]] %s7716_s22  ;;  %s426_s16 = sshll.u32 %s6032_s15, 4  ;;  %s6224_s16 = int_to_ptr.vmem [resolvable:$true] %s426_s16 }
  0x2a   : > { %s7719_s3 = sld [smem:[#allocation54_spill]]  ;;  %p6234_p3 = pneg %p6220_p2 }
  0x30   : > { %s5683_s21 = scalar_lea.hbm %s7719_s3, 256 }
  0x31   : > { %p5684_p0 = scmp.ne.s32.totalorder %s7719_s3, %s5683_s21  ;;  %p5690_p9 = scmp.lt.u32.totalorder %s5683_s21, %s7719_s3 }
  0x33   : > { %p5686_p7 = pnand %p6234_p3, %p5684_p0 }
  0x35   : > { %p5687_p8 = pneg %p5686_p7 }
  0x37   : > { %p5692_p10 = pnand %p5690_p9, %p5687_p8 }
  0x39   : > { %5695 = shalt.err (!%p5692_p10)
}
  0x3a   : > { %s5696_s14 = scalar_lea.vmem %s401_s24, 256  ;;  %p5704_p11 = scmp.lt.s32.totalorder %s401_s24, %s401_s24 }
  0x3b   : > { %p5697_p1 = scmp.ne.s32.totalorder %s401_s24, %s5696_s14  ;;  %p5705_p6 = scmp.lt.s32.totalorder %s5696_s14, %s5696_s14 }
  0x3d   : > { %p5699_p4 = pnand %p5697_p1, %p6234_p3  ;;  %p5706_p13 = por %p5705_p6, %p5704_p11 }
  0x3f   : > { %p5700_p12 = pneg %p5699_p4 }
  0x41   : > { %p5707_p5 = pnand %p5706_p13, %p5700_p12 }
  0x43   : > { %5710 = shalt.err (!%p5707_p5)
}
  0x44   : > { %s7696_s13 = smov 64   ;;  %s7698_s25 = smov 4  }
  0x45   : > { %5397 = dma.hbm_to_vmem [thread:$0]  (!%p6220_p2), %s7719_s3, 256, %s401_s24, [#allocation9], %s7696_s13, %s7696_s13, %s7698_s25  }
  0x46   : > { %s7721_s5 = sld [smem:[#allocation55_spill]] }
  0x4c   : > { %s5711_s29 = scalar_lea.hbm %s7721_s5, 256 }
  0x4d   : > { %p5712_p4 = scmp.ne.s32.totalorder %s7721_s5, %s5711_s29  ;;  %p5718_p11 = scmp.lt.u32.totalorder %s5711_s29, %s7721_s5 }
  0x4f   : > { %p5714_p5 = pnand %p5712_p4, %p6234_p3 }
  0x51   : > { %p5715_p6 = pneg %p5714_p5 }
  0x53   : > { %p5720_p12 = pnand %p5718_p11, %p5715_p6 }
  0x55   : > { %5723 = shalt.err (!%p5720_p12)
}
  0x56   : > { %s5724_s24 = scalar_lea.vmem %s6224_s16, 256  ;;  %p5732_p8 = scmp.lt.s32.totalorder %s6224_s16, %s6224_s16 }
  0x57   : > { %p5725_p13 = scmp.ne.s32.totalorder %s6224_s16, %s5724_s24  ;;  %p5733_p9 = scmp.lt.s32.totalorder %s5724_s24, %s5724_s24 }
  0x59   : > { %p5727_p0 = pnand %p5725_p13, %p6234_p3  ;;  %p5734_p10 = por %p5733_p9, %p5732_p8 }
  0x5b   : > { %p5728_p7 = pneg %p5727_p0 }
  0x5d   : > { %p5735_p1 = pnand %p5734_p10, %p5728_p7 }
  0x5f   : > { %5738 = shalt.err (!%p5735_p1)
}
  0x60   : > { %5403 = dma.hbm_to_vmem [thread:$0]  (!%p6220_p2), %s7721_s5, 256, %s6224_s16, [#allocation12], %s7696_s13, %s7696_s13, %s7698_s25  }
  0x61   : > { %s6035_s19 = smov [#allocation14]   ;;  %s6036_s17 = smov [#allocation7]  }
  0x62   : > { %s452_s22 = sshll.u32 %s6035_s19, 4  ;;  %s387_s20 = sshll.u32 %s6036_s17, 4  ;;  %s453_s22 = int_to_ptr.vmem [resolvable:$true] %s452_s22  ;;  %s388_s20 = int_to_ptr.vmem [resolvable:$true] %s387_s20 }
  0x63   : > { %s5739_s14 = scalar_lea.hbm %s7671_s7, 6144 }
  0x64   : > { %p5740_p4 = scmp.ne.s32.totalorder %s7671_s7, %s5739_s14  ;;  %p5746_p11 = scmp.lt.u32.totalorder %s5739_s14, %s7671_s7 }
  0x66   : > { %p5742_p5 = pnand %p5740_p4, %p6234_p3 }
  0x68   : > { %p5743_p6 = pneg %p5742_p5 }
  0x6a   : > { %p5748_p12 = pnand %p5746_p11, %p5743_p6 }
  0x6c   : > { %5751 = shalt.err (!%p5748_p12)
}
  0x6d   : > { %s5752_s16 = scalar_lea.vmem %s453_s22, 6144  ;;  %p5760_p8 = scmp.lt.s32.totalorder %s453_s22, %s453_s22 }
  0x6e   : > { %p5753_p13 = scmp.ne.s32.totalorder %s453_s22, %s5752_s16  ;;  %p5761_p9 = scmp.lt.s32.totalorder %s5752_s16, %s5752_s16 }
  0x70   : > { %p5755_p0 = pnand %p5753_p13, %p6234_p3  ;;  %p5762_p10 = por %p5761_p9, %p5760_p8 }
  0x72   : > { %p5756_p7 = pneg %p5755_p0 }
  0x74   : > { %p5763_p1 = pnand %p5762_p10, %p5756_p7 }
  0x76   : > { %5766 = shalt.err (!%p5763_p1)
}
  0x77   : > { %5409 = dma.hbm_to_vmem [thread:$0]  (!%p6220_p2), %s7671_s7, 6144, %s453_s22, [#allocation15], %s7696_s13, %s7696_s13, %s7698_s25  }
  0x78   : > { %s5767_s17 = scalar_lea.hbm %s7666_s2, 256 }
  0x79   : > { %p5768_p4 = scmp.ne.s32.totalorder %s7666_s2, %s5767_s17  ;;  %p5774_p11 = scmp.lt.u32.totalorder %s5767_s17, %s7666_s2 }
  0x7b   : > { %p5770_p5 = pnand %p5768_p4, %p6234_p3 }
  0x7d   : > { %p5771_p6 = pneg %p5770_p5 }
  0x7f   : > { %p5776_p12 = pnand %p5774_p11, %p5771_p6 }
  0x81   : > { %5779 = shalt.err (!%p5776_p12)
}
  0x82   : > { %s5780_s26 = scalar_lea.vmem %s388_s20, 256  ;;  %p5788_p8 = scmp.lt.s32.totalorder %s388_s20, %s388_s20 }
  0x83   : > { %p5781_p13 = scmp.ne.s32.totalorder %s388_s20, %s5780_s26  ;;  %p5789_p9 = scmp.lt.s32.totalorder %s5780_s26, %s5780_s26 }
  0x85   : > { %p5783_p0 = pnand %p5781_p13, %p6234_p3  ;;  %p5790_p10 = por %p5789_p9, %p5788_p8 }
  0x87   : > { %p5784_p7 = pneg %p5783_p0 }
  0x89   : > { %p5791_p1 = pnand %p5790_p10, %p5784_p7 }
  0x8b   : > { %5794 = shalt.err (!%p5791_p1)
}
  0x8c   : > { %s6037_s22 = smov 128   ;;  %s6038_s16 = smov 8  }
  0x8d   : > { %5394 = dma.hbm_to_vmem [thread:$0]  (!%p6220_p2), %s7666_s2, 256, %s388_s20, [#allocation6], %s6037_s22, %s6037_s22, %s6038_s16  }
  0x8e   : > { %s6039_s29 = smov [#allocation10]   ;;  %s6040_s17 = smov [#allocation13]  }
  0x8f   : > { %s413_s19 = sshll.u32 %s6039_s29, 4  ;;  %s439_s21 = sshll.u32 %s6040_s17, 4  ;;  %s414_s19 = int_to_ptr.vmem [resolvable:$true] %s413_s19  ;;  %s440_s21 = int_to_ptr.vmem [resolvable:$true] %s439_s21 }
  0x90   : > { %s5795_s24 = scalar_lea.hbm %s7668_s4, 256 }
  0x91   : > { %p5796_p4 = scmp.ne.s32.totalorder %s7668_s4, %s5795_s24  ;;  %p5802_p11 = scmp.lt.u32.totalorder %s5795_s24, %s7668_s4 }
  0x93   : > { %p5798_p5 = pnand %p5796_p4, %p6234_p3 }
  0x95   : > { %p5799_p6 = pneg %p5798_p5 }
  0x97   : > { %p5804_p12 = pnand %p5802_p11, %p5799_p6 }
  0x99   : > { %5807 = shalt.err (!%p5804_p12)
}
  0x9a   : > { %s5808_s20 = scalar_lea.vmem %s414_s19, 256  ;;  %p5816_p8 = scmp.lt.s32.totalorder %s414_s19, %s414_s19 }
  0x9b   : > { %p5809_p13 = scmp.ne.s32.totalorder %s414_s19, %s5808_s20  ;;  %p5817_p9 = scmp.lt.s32.totalorder %s5808_s20, %s5808_s20 }
  0x9d   : > { %p5811_p0 = pnand %p5809_p13, %p6234_p3  ;;  %p5818_p10 = por %p5817_p9, %p5816_p8 }
  0x9f   : > { %p5812_p7 = pneg %p5811_p0 }
  0xa1   : > { %p5819_p1 = pnand %p5818_p10, %p5812_p7 }
  0xa3   : > { %5822 = shalt.err (!%p5819_p1)
}
  0xa4   : > { %s7722_s13 = smov 4   ;;  %s7723_s22 = smov 64  }
  0xa5   : > { %5400 = dma.hbm_to_vmem [thread:$0]  (!%p6220_p2), %s7668_s4, 256, %s414_s19, [#allocation9], %s7723_s22, %s7723_s22, %s7722_s13  }
  0xa6   : > { %s5823_s12 = scalar_lea.hbm %s7670_s6, 256 }
  0xa7   : > { %p5824_p4 = scmp.ne.s32.totalorder %s7670_s6, %s5823_s12  ;;  %p5830_p11 = scmp.lt.u32.totalorder %s5823_s12, %s7670_s6 }
  0xa9   : > { %p5826_p5 = pnand %p5824_p4, %p6234_p3 }
  0xab   : > { %p5827_p6 = pneg %p5826_p5 }
  0xad   : > { %p5832_p12 = pnand %p5830_p11, %p5827_p6 }
  0xaf   : > { %5835 = shalt.err (!%p5832_p12)
}
  0xb0   : > { %s5836_s24 = scalar_lea.vmem %s440_s21, 256  ;;  %p5844_p8 = scmp.lt.s32.totalorder %s440_s21, %s440_s21 }
  0xb1   : > { %p5837_p13 = scmp.ne.s32.totalorder %s440_s21, %s5836_s24  ;;  %p5845_p9 = scmp.lt.s32.totalorder %s5836_s24, %s5836_s24 }
  0xb3   : > { %p5839_p0 = pnand %p5837_p13, %p6234_p3  ;;  %p5846_p10 = por %p5845_p9, %p5844_p8 }
  0xb5   : > { %p5840_p7 = pneg %p5839_p0 }
  0xb7   : > { %p5847_p1 = pnand %p5846_p10, %p5840_p7 }
  0xb9   : > { %5850 = shalt.err (!%p5847_p1)
}
  0xba   : > { %5406 = dma.hbm_to_vmem [thread:$0]  (!%p6220_p2), %s7670_s6, 256, %s440_s21, [#allocation12], %s7723_s22, %s7723_s22, %s7722_s13  }
  0xbb   : > { %s6041_s20 = smov [#allocation16]   ;;  %s5851_s3 = scalar_lea.hbm %s7672_s8, 1536 }
  0xbc   : > { %s465_s5 = sshll.u32 %s6041_s20, 4  ;;  %p5852_p4 = scmp.ne.s32.totalorder %s7672_s8, %s5851_s3  ;;  %s466_s5 = int_to_ptr.vmem [resolvable:$true] %s465_s5 }
  0xbd   : > { %p5858_p11 = scmp.lt.u32.totalorder %s5851_s3, %s7672_s8 }
  0xbe   : > { %p5854_p5 = pnand %p5852_p4, %p6234_p3 }
  0xc0   : > { %p5855_p6 = pneg %p5854_p5 }
  0xc2   : > { %p5860_p12 = pnand %p5858_p11, %p5855_p6 }
  0xc4   : > { %5863 = shalt.err (!%p5860_p12)
}
  0xc5   : > { %s5864_s21 = scalar_lea.vmem %s466_s5, 1536  ;;  %p5872_p8 = scmp.lt.s32.totalorder %s466_s5, %s466_s5 }
  0xc6   : > { %p5865_p13 = scmp.ne.s32.totalorder %s466_s5, %s5864_s21  ;;  %p5873_p9 = scmp.lt.s32.totalorder %s5864_s21, %s5864_s21 }
  0xc8   : > { %p5867_p0 = pnand %p5865_p13, %p6234_p3  ;;  %p5874_p10 = por %p5873_p9, %p5872_p8 }
  0xca   : > { %p5868_p7 = pneg %p5867_p0 }
  0xcc   : > { %p5875_p1 = pnand %p5874_p10, %p5868_p7 }
  0xce   : > { %5878 = shalt.err (!%p5875_p1)
}
  0xcf   : > { %5412 = dma.hbm_to_vmem [thread:$0]  (!%p6220_p2), %s7672_s8, 1536, %s466_s5, [#allocation15], %s7723_s22, %s7723_s22, %s7722_s13  }
  0xd0   : > { %p4565_p4 = scmp.ge.s32.totalorder %s6029_s28, 2 }
  0xd1   : > { %s6385_s23 = sand.u32 (!%p4565_p4), 1, %s6025_s27   ;;  %s6388_s30 = sshll.u32 (!%p4565_p4), %s6029_s28, 9 }
  0xd2   : > { %475 = sbr.rel (%p4565_p4) target bundleno = 309 (0x135), region = 44  ;;  %s4566_s19 = sshll.u32 (!%p4565_p4), %s6385_s23, 5 }
  0xd3   : > { %s6395_s13 = scalar_lea.hbm (!%p4565_p4), %s7664_s0, %s6388_s30  ;;  %s483_s22 = scalar_lea.vmem (!%p4565_p4), [#allocation2], %s4566_s19 }
  0xd4   : > { %s490_s5 = sshll.u32 (!%p4565_p4), %s483_s22, 4  ;;  %s480_s25 = scalar_lea.sflag (!%p4565_p4), [#allocation3], %s6385_s23  ;;  %s6399_s5 = int_to_ptr.vmem [resolvable:$true] %s490_s5 }
  0xd5   : > { %s5879_s16 = scalar_lea.hbm (!%p4565_p4), %s6395_s13, 512  ;;  %p7724_p3 = scmp.ne.s32.totalorder (!%p4565_p4), %s7709_s18, 0 }
  0xd6   : > { %p5880_p2 = scmp.ne.s32.totalorder (!%p4565_p4), %s6395_s13, %s5879_s16  ;;  %s5883_s29 = scalar_lea.hbm (!%p4565_p4), %s7664_s0, 1024 }
  0xd7   : > { %p5884_p11 = scmp.lt.u32.totalorder (!%p4565_p4), %s6395_s13, %s7664_s0  ;;  %p5885_p12 = scmp.lt.u32.totalorder (!%p4565_p4), %s5883_s29, %s5879_s16 }
  0xd8   : > { %p5881_p5 = pnand (!%p4565_p4), %p5880_p2, %p7724_p3  ;;  %p5887_p0 = scmp.lt.u32.totalorder (!%p4565_p4), %s5879_s16, %s6395_s13 }
  0xd9   : > { %p5886_p13 = por %p5885_p12, %p5884_p11 }
  0xda   : > { %p5882_p6 = pneg %p5881_p5 }
  0xdb   : > { %p5888_p7 = por %p5887_p0, %p5886_p13 }
  0xdd   : > { %p5889_p8 = pnand %p5888_p7, %p5882_p6 }
  0xdf   : > { %5892 = shalt.err (!%p5889_p8)
}
  0xe0   : > { %s5893_s21 = scalar_lea.vmem %s6399_s5, 512  ;;  %s6042_s14 = smov [#allocation2]  }
  0xe1   : > { %p5894_p9 = scmp.ne.s32.totalorder %s6399_s5, %s5893_s21  ;;  %s5897_s24 = sshll.u32 %s6042_s14, 4  ;;  %s5898_s24 = int_to_ptr.vmem [resolvable:$false] %s5897_s24 }
  0xe2   : > { %s5899_s26 = scalar_lea.vmem %s5898_s24, 1024  ;;  %p5900_p2 = scmp.lt.s32.totalorder %s6399_s5, %s5898_s24 }
  0xe3   : > { %p5895_p10 = pnand %p5894_p9, %p7724_p3  ;;  %p5901_p5 = scmp.lt.s32.totalorder %s5899_s26, %s5893_s21 }
  0xe5   : > { %p5896_p1 = pneg %p5895_p10  ;;  %p5902_p11 = por %p5901_p5, %p5900_p2 }
  0xe7   : > { %p5903_p12 = pnand %p5902_p11, %p5896_p1 }
  0xe9   : > { %5906 = shalt.err (!%p5903_p12)
}
  0xea   : > { %s6043_s20 = smov 128   ;;  %s6044_s22 = smov 8  }
  0xeb   : > { %5335 = dma.hbm_to_vmem [thread:$0]  (%p7724_p3), %s6395_s13, 512, %s6399_s5, %s480_s25, %s6043_s20, %s6043_s20, %s6044_s22  }
  0xec   : > { %s6429_s16 = sand.u32 1, %s6029_s28   ;;  %s6435_s29 = scalar_lea.hbm %s7665_s1, %s6388_s30 }
  0xed   : > { %s504_s17 = scalar_lea.vmem [#allocation5], %s4566_s19  ;;  %s501_s21 = scalar_lea.sflag [#allocation6], %s6429_s16 }
  0xee   : > { %s511_s15 = sshll.u32 %s504_s17, 4  ;;  %s5907_s14 = scalar_lea.hbm %s6435_s29, 512  ;;  %s6439_s15 = int_to_ptr.vmem [resolvable:$true] %s511_s15 }
  0xef   : > { %p5908_p6 = scmp.ne.s32.totalorder %s6435_s29, %s5907_s14  ;;  %s5911_s25 = scalar_lea.hbm %s7665_s1, 1024 }
  0xf0   : > { %p5912_p7 = scmp.lt.u32.totalorder %s6435_s29, %s7665_s1  ;;  %p5913_p8 = scmp.lt.u32.totalorder %s5911_s25, %s5907_s14 }
  0xf1   : > { %p5909_p13 = pnand %p5908_p6, %p7724_p3  ;;  %p5915_p10 = scmp.lt.u32.totalorder %s5907_s14, %s6435_s29 }
  0xf2   : > { %p5914_p9 = por %p5913_p8, %p5912_p7 }
  0xf3   : > { %p5910_p0 = pneg %p5909_p13 }
  0xf4   : > { %p5916_p1 = por %p5915_p10, %p5914_p9 }
  0xf6   : > { %p5917_p2 = pnand %p5916_p1, %p5910_p0 }
  0xf8   : > { %5920 = shalt.err (!%p5917_p2)
}
  0xf9   : > { %s5921_s19 = scalar_lea.vmem %s6439_s15, 512  ;;  %s6045_s3 = smov [#allocation5]  }
  0xfa   : > { %p5922_p5 = scmp.ne.s32.totalorder %s6439_s15, %s5921_s19  ;;  %s5925_s12 = sshll.u32 %s6045_s3, 4  ;;  %s5926_s12 = int_to_ptr.vmem [resolvable:$false] %s5925_s12 }
  0xfb   : > { %s5927_s17 = scalar_lea.vmem %s5926_s12, 1024  ;;  %p5928_p6 = scmp.lt.s32.totalorder %s6439_s15, %s5926_s12 }
  0xfc   : > { %p5923_p11 = pnand %p5922_p5, %p7724_p3  ;;  %p5929_p13 = scmp.lt.s32.totalorder %s5927_s17, %s5921_s19 }
  0xfe   : > { %p5924_p12 = pneg %p5923_p11  ;;  %p5930_p7 = por %p5929_p13, %p5928_p6 }
 0x100   : > { %p5931_p8 = pnand %p5930_p7, %p5924_p12 }
 0x102   : > { %5934 = shalt.err (!%p5931_p8)
}
 0x103   : > { %5336 = dma.hbm_to_vmem [thread:$0]  (%p7724_p3), %s6435_s29, 512, %s6439_s15, %s501_s21, %s6043_s20, %s6043_s20, %s6044_s22  }
 0x104   : > { %s4572_s14 = sshll.u32 %s6385_s23, 8  ;;  %s4784_s13 = sshll.u32 %s6029_s28, 11 }
 0x105   : > { %s531_s24 = scalar_lea.hbm %s7673_s9, %s4784_s13  ;;  %s525_s19 = scalar_lea.vmem [#allocation17], %s4572_s14 }
 0x106   : > { %s5337_s26 = scalar_select %p7724_p3, [#allocation0], [#allocation32] }
 0x107   : > { %s544_s3 = sshll.u32 %s525_s19, 4  ;;  %s6046_s22 = smov 4096   ;;  %s545_s3 = int_to_ptr.vmem [resolvable:$true] %s544_s3 }
 0x108   : > { %s536_s20 = sld [smem:[%s5337_s26]]   ;;  %s6047_s29 = smov 2048  }
 0x109   : > { %5338 = sst [smem:[#allocation25]] (%p7724_p3), %s6046_s22  ;;  %s6048_s15 = smov 16  }
 0x10a   : > { %5339 = sst [smem:[#allocation25 + $0x1]] (%p7724_p3), %s6047_s29  ;;  %s6049_s21 = smov 128  }
 0x10b   : > { %5340 = sst [smem:[#allocation25 + $0x2]] (%p7724_p3), %s6048_s15  ;;  %s6050_s17 = smov 8  }
 0x10c   : > { %5341 = sst [smem:[#allocation25 + $0x3]] (%p7724_p3), %s6049_s21  ;;  %s522_s25 = scalar_lea.sflag [#allocation18], %s6429_s16 }
 0x10d   : > { %5342 = sst [smem:[#allocation25 + $0x4]] (%p7724_p3), %s6049_s21  ;;  %s6051_s26 = smov [#allocation24]  }
 0x10e   : > { %s4575_s12 = sshll.u32 %s536_s20, 26  ;;  %5343 = sst [smem:[#allocation25 + $0x5]] (%p7724_p3), %s6050_s17 }
 0x10f   : > { %s4576_s5 = sadd.s32 134217728, %s4575_s12 }
 0x110   : > { %5344 = dma.general (%p7724_p3), %s531_s24, 4096, %s545_s3, %s522_s25, %s6051_s26, [#allocation25], %s4576_s5, 0  }
 0x111   : > { %s577_s29 = scalar_lea.hbm %s7674_s10, %s4784_s13  ;;  %s571_s15 = scalar_lea.vmem [#allocation19], %s4572_s14 }
 0x112   : > { %s5345_s20 = scalar_select %p7724_p3, [#allocation0], [#allocation33] }
 0x113   : > { %s590_s21 = sshll.u32 %s571_s15, 4  ;;  %s6052_s17 = smov 4096   ;;  %s591_s21 = int_to_ptr.vmem [resolvable:$true] %s590_s21 }
 0x114   : > { %s582_s12 = sld [smem:[%s5345_s20]]   ;;  %s6053_s24 = smov 2048  }
 0x115   : > { %5346 = sst [smem:[#allocation27]] (%p7724_p3), %s6052_s17  ;;  %s6054_s3 = smov 16  }
 0x116   : > { %5347 = sst [smem:[#allocation27 + $0x1]] (%p7724_p3), %s6053_s24  ;;  %s6055_s5 = smov 128  }
 0x117   : > { %5348 = sst [smem:[#allocation27 + $0x2]] (%p7724_p3), %s6054_s3  ;;  %s6056_s14 = smov 8  }
 0x118   : > { %5349 = sst [smem:[#allocation27 + $0x3]] (%p7724_p3), %s6055_s5  ;;  %s6057_s19 = smov [#allocation26]  }
 0x119   : > { %5350 = sst [smem:[#allocation27 + $0x4]] (%p7724_p3), %s6055_s5 }
 0x11a   : > { %s4580_s13 = sshll.u32 %s582_s12, 26  ;;  %5351 = sst [smem:[#allocation27 + $0x5]] (%p7724_p3), %s6056_s14 }
 0x11b   : > { %s4581_s26 = sadd.s32 134217728, %s4580_s13 }
 0x11c   : > { %5352 = dma.general (%p7724_p3), %s577_s29, 4096, %s591_s21, %s522_s25, %s6057_s19, [#allocation27], %s4581_s26, 0  }
 0x11d   : > { %s4582_s22 = sshll.u32 %s6385_s23, 6  ;;  %s623_s12 = scalar_lea.hbm %s7675_s11, %s6388_s30 }
 0x11e   : > { %s5353_s17 = scalar_select %p7724_p3, [#allocation0], [#allocation34] }
 0x11f   : > { %s617_s24 = scalar_lea.vmem [#allocation20], %s4582_s22  ;;  %s6058_s29 = smov 1024  }
 0x120   : > { %s636_s3 = sshll.u32 %s617_s24, 4  ;;  %s628_s25 = sld [smem:[%s5353_s17]]   ;;  %s637_s3 = int_to_ptr.vmem [resolvable:$true] %s636_s3 }
 0x121   : > { %5354 = sst [smem:[#allocation29]] (%p7724_p3), %s6058_s29  ;;  %s6059_s21 = smov 512  }
 0x122   : > { %5355 = sst [smem:[#allocation29 + $0x1]] (%p7724_p3), %s6059_s21  ;;  %s6060_s23 = smov 4  }
 0x123   : > { %5356 = sst [smem:[#allocation29 + $0x2]] (%p7724_p3), %s6060_s23  ;;  %s6061_s5 = smov 128  }
 0x124   : > { %5357 = sst [smem:[#allocation29 + $0x3]] (%p7724_p3), %s6061_s5  ;;  %s6062_s14 = smov 8  }
 0x125   : > { %5358 = sst [smem:[#allocation29 + $0x4]] (%p7724_p3), %s6061_s5  ;;  %s614_s19 = scalar_lea.sflag [#allocation21], %s6429_s16 }
 0x126   : > { %s4585_s13 = sshll.u32 %s628_s25, 26  ;;  %5359 = sst [smem:[#allocation29 + $0x5]] (%p7724_p3), %s6062_s14 }
 0x127   : > { %s4586_s26 = sadd.s32 134217728, %s4585_s13  ;;  %s6063_s20 = smov [#allocation28]  }
 0x128   : > { %5360 = dma.general (%p7724_p3), %s623_s12, 1024, %s637_s3, %s614_s19, %s6063_s20, [#allocation29], %s4586_s26, 0  }
 0x129   : > { %s7725_s24 = sld [smem:[#allocation56_spill]]  ;;  %s663_s21 = scalar_lea.vmem [#allocation22], %s4582_s22 }
 0x12a   : > { %s5361_s25 = scalar_select %p7724_p3, [#allocation0], [#allocation35] }
 0x12b   : > { %s682_s23 = sshll.u32 %s663_s21, 4  ;;  %s6064_s12 = smov 1024   ;;  %s683_s23 = int_to_ptr.vmem [resolvable:$true] %s682_s23 }
 0x12c   : > { %s674_s16 = sld [smem:[%s5361_s25]]   ;;  %s6065_s3 = smov 512  }
 0x12d   : > { %5362 = sst [smem:[#allocation31]] (%p7724_p3), %s6064_s12  ;;  %s6066_s5 = smov 4  }
 0x12e   : > { %5363 = sst [smem:[#allocation31 + $0x1]] (%p7724_p3), %s6065_s3  ;;  %s6067_s13 = smov 128  }
 0x12f   : > { %s669_s29 = scalar_lea.hbm %s7725_s24, %s6388_s30  ;;  %5364 = sst [smem:[#allocation31 + $0x2]] (%p7724_p3), %s6066_s5 }
 0x130   : > { %5365 = sst [smem:[#allocation31 + $0x3]] (%p7724_p3), %s6067_s13  ;;  %s6068_s22 = smov 8  }
 0x131   : > { %5366 = sst [smem:[#allocation31 + $0x4]] (%p7724_p3), %s6067_s13  ;;  %s6069_s26 = smov [#allocation30]  }
 0x132   : > { %s4590_s30 = sshll.u32 %s674_s16, 26  ;;  %5367 = sst [smem:[#allocation31 + $0x5]] (%p7724_p3), %s6068_s22 }
 0x133   : > { %s4591_s14 = sadd.s32 134217728, %s4590_s30 }
 0x134   : > { %5368 = dma.general (%p7724_p3), %s669_s29, 1024, %s683_s23, %s614_s19, %s6069_s26, [#allocation31], %s4591_s14, 0  }
 0x135 PF: > { %s7726_s20 = sld [smem:[#allocation53_spill]] }
 0x13b   : > { %p7727_p0 = scmp.ne.s32.totalorder %s7726_s20, 0 }
 0x13c   : > { %s7728_s15 = sld [smem:[#allocation46_spill]] (!%p7727_p0)  ;;  %s7729_s17 = sld [smem:[#allocation50_spill]] (!%p7727_p0) }
 0x13d   : > { %707 = sbr.rel (%p7727_p0) target bundleno = 5169 (0x1431), region = 72 }
 0x142   : > { %s6554_s24 = sand.u32 (!%p7727_p0), 1, %s7728_s15   ;;  %p7730_p9 = scmp.ne.s32.totalorder (!%p7727_p0), %s7729_s17, 0 }
 0x143   : > { %s6557_s25 = sshll.u32 (!%p7727_p0), %s6554_s24, 5  ;;  %s710_s21 = scalar_lea.sflag (!%p7727_p0), [#allocation3], %s6554_s24 }
 0x144   : > { %s6561_s16 = scalar_lea.vmem [#allocation2], %s6557_s25 }
 0x145   : > { %5980 = dma.done.wait (%p7730_p9), %s710_s21, 512  }
 0x146   : > { %5982 = vsyncadd (%p7730_p9), %s710_s21, 4294966784  ;;  %s7731_s18 = sld [smem:[#allocation47_spill]]  ;;  %s6569_s23 = scalar_lea.vmem [#allocation5], %s6557_s25 }
 0x14c   : > { %s718_s19 = sand.u32 1, %s7731_s18  }
 0x14d   : > { %s719_s29 = scalar_lea.sflag [#allocation6], %s718_s19 }
 0x14e   : > { %5984 = dma.done.wait (%p7730_p9), %s719_s29, 512  }
 0x14f   : > { %5986 = vsyncadd (%p7730_p9), %s719_s29, 4294966784  ;;  %p7732_p3 = scmp.eq.s32.totalorder %s7731_s18, 0 }
 0x151   : > { %5988 = dma.done.wait (%p7732_p3), [#allocation6], 256   ;;  %p7733_p10 = pmov %p7732_p3 }
 0x152   : > { %p7734_p1 = pmov %p7732_p3 }
 0x153   : > { %5990 = vsyncadd (%p7733_p10), [#allocation6], 4294967040 }
 0x154   : > { %5992 = dma.done.wait (%p7734_p1), [#allocation9], 512   ;;  %p7735_p2 = pmov %p7734_p1 }
 0x155   : > { %p7736_p5 = pmov %p7734_p1 }
 0x156   : > { %5994 = vsyncadd (%p7735_p2), [#allocation9], 4294966784 }
 0x157   : > { %5996 = dma.done.wait (%p7736_p5), [#allocation12], 512   ;;  %p7737_p11 = pmov %p7734_p1 }
 0x158   : > { %p7738_p12 = pmov %p7734_p1 }
 0x159   : > { %5998 = vsyncadd (%p7737_p11), [#allocation12], 4294966784 }
 0x15a   : > { %6000 = dma.done.wait (%p7738_p12), [#allocation15], 7680   ;;  %p7739_p6 = pmov %p7734_p1 }
 0x15b   : > { %s4602_s12 = sshll.u32 %s6554_s24, 8  ;;  %s756_s3 = scalar_lea.sflag [#allocation18], %s718_s19 }
 0x15c   : > { %6002 = vsyncadd (%p7739_p6), [#allocation15], 4294959616  ;;  %s6592_s5 = scalar_lea.vmem [#allocation17], %s4602_s12 }
 0x15d   : > { %6004 = dma.done.wait (%p7730_p9), %s756_s3, 8192  }
 0x15e   : > { %6006 = vsyncadd (%p7730_p9), %s756_s3, 4294959104  ;;  %s4604_s13 = sshll.u32 %s6554_s24, 6  ;;  %s6599_s30 = scalar_lea.vmem [#allocation19], %s4602_s12 }
 0x15f   : > { %s774_s22 = scalar_lea.sflag [#allocation21], %s718_s19  ;;  %s6603_s14 = scalar_lea.vmem [#allocation20], %s4604_s13 }
 0x160   : > { %6008 = dma.done.wait (%p7730_p9), %s774_s22, 2048  }
 0x161   : > { %6010 = vsyncadd (%p7730_p9), %s774_s22, 4294965248  ;;  %v855_v0 = vlaneseq  ;;  %v6610_v2 = vld [vmem:[%s6561_s16 + $0x10] sm:$0xff]  ;;  %v885_v3 = vld [vmem:[%s6561_s16] sm:$0xff]  ;;  %s6070_s26 = smov 16   ;;  %v6071_v6 = vmov 0.0   ;;  %s6072_s20 = smov 15  }
 0x162   : > { %v888_v4 = vld [vmem:[%s6561_s16 + $0x18] sm:$0xff]  ;;  %896 = vrot.lane.b32.xlu1 %v6610_v2, %s6070_s26  ;;  %890 = vrot.lane.b32.xlu0 %v885_v3, %s6070_s26  ;;  %v886_v5 = vld [vmem:[%s6561_s16 + $0x8] sm:$0xff]  ;;  %vm889_vm1 = vcmask 1047680   ;;  %v5534_v17 = vld [vmem:[#allocation14 + $0x40] sm:$0xff]   ;;  %vm1009_vm2 = vcmask 261120   ;;  %s6073_s15 = smov 1  }
 0x163   : > { %v856_v1 = vand.u32 127, %v855_v0  ;;  %v924_v15 = vpack.c.bf16 %v886_v5, %v885_v3  ;;  %v925_v16 = vpack.c.bf16 %v888_v4, %v6610_v2  ;;  %4941 = vmatprep.mubr.msk.bf16.mxu0 %vm1009_vm2, %v5534_v17  ;;  %v5535_v20 = vld [vmem:[#allocation14 + $0x48] sm:$0xff]   ;;  %v5536_v21 = vld [vmem:[#allocation14 + $0x50] sm:$0xff]   ;;  %v5537_v22 = vld [vmem:[#allocation14 + $0x58] sm:$0xff]   ;;  %s6074_s17 = smov 113   ;;  %s6075_s21 = smov 127  }
 0x164   : > { %v5538_v23 = vld [vmem:[#allocation14 + $0x60] sm:$0xff]   ;;  %v5539_v24 = vld [vmem:[#allocation14 + $0x68] sm:$0xff]   ;;  %v5540_v26 = vld [vmem:[#allocation14 + $0x70] sm:$0xff]   ;;  %v6076_v52 = vmov 0   ;;  %s7074_s19 = scalar_lea.vmem [#allocation22], %s4604_s13  ;;  %vm6077_vm4 = vmmov 0  }
 0x165   : > { %vm857_vm0 = vcmp.ne.s32.totalorder %v856_v1, 0  ;;  %vm860_vm3 = vcmp.ne.s32.totalorder %v856_v1, 15  ;;  %4937 = vmatprep.subr.bf16.mxu0 %v924_v15  ;;  %v5541_v27 = vld [vmem:[#allocation14 + $0x78] sm:$0xff]   ;;  %v5542_v29 = vld [vmem:[#allocation14] sm:$0xff]   ;;  %v1503_v51 = vld [vmem:[%s6592_s5 + $0x8] sm:$0xff]  ;;  %5513 = vset.pattern.permute.xlu1 %v6076_v52  ;;  %vm2422_vm5 = vcmask 130048  }
 0x166   : > { %v4607_v7 = vsel %vm857_vm0, 1.0, %v6071_v6  ;;  %899 = vrot.lane.b32.xlu1 %v888_v4, %s6070_s26  ;;  %893 = vrot.lane.b32.xlu0 %v886_v5, %s6070_s26  ;;  %v4608_v19 = vsel %vm860_vm3, 1.0, %v6071_v6  ;;  %v1502_v50 = vld [vmem:[%s6592_s5] sm:$0xff]  ;;  %v1615_v53 = vld [vmem:[%s6599_s30 + $0x8] sm:$0xff]  ;;  %s853_s29 = scalar_lea.vmem [#allocation23], %s6557_s25  ;;  %s4788_s3 = sshll.u32 %s7731_s18, 9 }
 0x167   : > { %4938 = vmatpush3.bf16.msra.mxu0 %v924_v15  ;;  %5512 = vset.pattern.permute.xlu0 %v6076_v52  ;;  %v1614_v54 = vld [vmem:[%s6599_s30] sm:$0xff]  ;;  %v1505_v55 = vld [vmem:[%s6592_s5 + $0x18] sm:$0xff]  ;;  %v1504_v56 = vld [vmem:[%s6592_s5 + $0x10] sm:$0xff]  ;;  %s4308_s12 = sshll.u32 %s853_s29, 4  ;;  %s7741_s18 = sld [smem:[#allocation57_spill]]  ;;  %s7608_s12 = int_to_ptr.vmem [resolvable:$true] %s4308_s12 }
 0x168   : > { %4939 = vmatprep.subr.bf16.mxu0 %v925_v16  ;;  %v1617_v57 = vld [vmem:[%s6599_s30 + $0x18] sm:$0xff]  ;;  %v1616_v58 = vld [vmem:[%s6599_s30 + $0x10] sm:$0xff]  ;;  %v1507_v59 = vld [vmem:[%s6592_s5 + $0x28] sm:$0xff]  ;;  %s4295_s22 = scalar_lea.sflag [#allocation4], %s6554_s24 }
 0x169   : > { %v1506_v60 = vld [vmem:[%s6592_s5 + $0x20] sm:$0xff]  ;;  %v1619_v61 = vld [vmem:[%s6599_s30 + $0x28] sm:$0xff]  ;;  %v1509_v63 = vld [vmem:[%s6592_s5 + $0x38] sm:$0xff] }
 0x16a   : > { %915 = vrot.lane.b32.xlu0 %v4607_v7, %s6072_s20  ;;  %v1618_v62 = vld [vmem:[%s6599_s30 + $0x20] sm:$0xff]  ;;  %v1508_v0 = vld [vmem:[%s6592_s5 + $0x30] sm:$0xff]  ;;  %v1621_v1 = vld [vmem:[%s6599_s30 + $0x38] sm:$0xff] }
 0x16b   : > { %4940 = vmatpush3.bf16.msra.mxu0 %v925_v16  ;;  %v1622_v7 = vld [vmem:[%s6599_s30 + $0x40] sm:$0xff]  ;;  %v1517_v16 = vld [vmem:[%s6592_s5 + $0x78] sm:$0xff]  ;;  %v1516_v17 = vld [vmem:[%s6592_s5 + $0x70] sm:$0xff] }
 0x16c   : > { %v1626_v15 = vld [vmem:[%s6599_s30 + $0x60] sm:$0xff] }
 0x16e   : > { %4942 = vmatmul.mubr.msk.bf16.vlgmr.msra.gmra.mrb[0].mxu0 %vm1009_vm2, %v5535_v20 }
 0x16f   : > { %4945 = vmatprep.mubr.msk.bf16.mxu0 %vm1009_vm2, %v5536_v21 }
 0x176   : > { %4946 = vmatmul.mubr.msk.bf16.gmra.mrb[4].mxu0 %vm1009_vm2, %v5537_v22  ;;  %v5543_v22 = vld [vmem:[#allocation14 + $0x8] sm:$0xff]  }
 0x177   : > { %4949 = vmatprep.mubr.msk.bf16.mxu0 %vm1009_vm2, %v5538_v23  ;;  %v5544_v23 = vld [vmem:[#allocation14 + $0x10] sm:$0xff]  }
 0x17e   : > { %4950 = vmatmul.mubr.msk.bf16.gmra.mrb[8].mxu0 %vm1009_vm2, %v5539_v24 }
 0x17f   : > { %4953 = vmatprep.mubr.msk.bf16.mxu0 %vm1009_vm2, %v5540_v26 }
 0x186   : > { %4954 = vmatmul.mubr.msk.bf16.gmra.mrb[12].mxu0 %vm1009_vm2, %v5541_v27  ;;  %v5545_v27 = vld [vmem:[#allocation14 + $0x18] sm:$0xff]  }
 0x187   : > { %4961 = vmatprep.mubr.msk.bf16.mxu0 %vm1009_vm2, %v5542_v29  ;;  %v5547_v29 = vld [vmem:[#allocation14 + $0x28] sm:$0xff]  }
 0x1d4   : > { %v897_v8 = vpop.permute.xlu1 %896  ;;  %v891_v9 = vpop.permute.xlu0 %890 }
 0x1d5   : > { %v892_v10 = vsel %vm889_vm1, %v891_v9, %v885_v3  ;;  %v898_v18 = vsel %vm889_vm1, %v897_v8, %v6610_v2  ;;  %v1513_v8 = vld [vmem:[%s6592_s5 + $0x58] sm:$0xff]  ;;  %v1512_v9 = vld [vmem:[%s6592_s5 + $0x50] sm:$0xff] }
 0x1d6   : > { %902 = vrot.lane.b32.xlu0 %v892_v10, %s6070_s26  ;;  %v1625_v10 = vld [vmem:[%s6599_s30 + $0x58] sm:$0xff] }
 0x1d8   : > { %v900_v11 = vpop.permute.xlu1 %899  ;;  %v894_v12 = vpop.permute.xlu0 %893 }
 0x1d9   : > { %v901_v13 = vsel %vm889_vm1, %v900_v11, %v888_v4  ;;  %v895_v14 = vsel %vm889_vm1, %v894_v12, %v886_v5  ;;  %v1624_v11 = vld [vmem:[%s6599_s30 + $0x50] sm:$0xff]  ;;  %v1515_v12 = vld [vmem:[%s6592_s5 + $0x68] sm:$0xff] }
 0x1da   : > { %908 = vrot.lane.b32.xlu0 %v901_v13, %s6070_s26  ;;  %904 = vrot.lane.b32.xlu1 %v895_v14, %s6070_s26  ;;  %v1514_v13 = vld [vmem:[%s6592_s5 + $0x60] sm:$0xff]  ;;  %v1627_v14 = vld [vmem:[%s6599_s30 + $0x68] sm:$0xff] }
 0x1dc   : > { %v6638_v25 = vpop.permute.xlu0 %915 }
 0x1de   : > { %906 = vrot.lane.b32.xlu1 %v898_v18, %s6070_s26  ;;  %v1629_v18 = vld [vmem:[%s6599_s30 + $0x78] sm:$0xff] }
 0x1e2   : > { %927 = vrot.lane.b32.xlu1 %v4608_v19, %s6073_s15  ;;  %v1628_v19 = vld [vmem:[%s6599_s30 + $0x70] sm:$0xff] }
 0x248   : > { %v903_v28 = vpop.permute.xlu0 %902 }
 0x249   : > { %v910_v30 = vsel %vm889_vm1, %v903_v28, %v885_v3  ;;  %v1511_v3 = vld [vmem:[%s6592_s5 + $0x48] sm:$0xff]  ;;  %v5546_v28 = vld [vmem:[#allocation14 + $0x20] sm:$0xff]  }
 0x24a   : > { %v918_v34 = vmul.f32 %v6638_v25, %v910_v30 }
 0x24c   : > { %v905_v31 = vpop.permute.xlu1 %904  ;;  %v909_v32 = vpop.permute.xlu0 %908 }
 0x24d   : > { %v911_v33 = vsel %vm889_vm1, %v905_v31, %v886_v5  ;;  %v913_v36 = vsel %vm889_vm1, %v909_v32, %v888_v4  ;;  %v1510_v4 = vld [vmem:[%s6592_s5 + $0x40] sm:$0xff]  ;;  %v1623_v5 = vld [vmem:[%s6599_s30 + $0x48] sm:$0xff]  ;;  %v5549_v31 = vld [vmem:[#allocation14 + $0x38] sm:$0xff]  }
 0x24e   : > { %v919_v35 = vmul.f32 %v6638_v25, %v911_v33  ;;  %v921_v40 = vmul.f32 %v6638_v25, %v913_v36  ;;  %v5550_v32 = vld [vmem:[#allocation14 + $0x80] sm:$0xff]  }
 0x250   : > { %v907_v37 = vpop.permute.xlu1 %906  ;;  %v922_v38 = vpack.c.bf16 %v919_v35, %v918_v34  ;;  %v5552_v34 = vld [vmem:[#allocation14 + $0x90] sm:$0xff]   ;;  %v5553_v35 = vld [vmem:[#allocation14 + $0x98] sm:$0xff]  }
 0x251   : > { %v912_v39 = vsel %vm889_vm1, %v907_v37, %v6610_v2  ;;  %v1620_v2 = vld [vmem:[%s6599_s30 + $0x30] sm:$0xff]  ;;  %v5555_v37 = vld [vmem:[#allocation14 + $0xa8] sm:$0xff]  }
 0x252   : > { %v920_v41 = vmul.f32 %v6638_v25, %v912_v39  ;;  %1173 = vrot.lane.b32.xlu0 %v922_v38, %s6074_s17  ;;  %v5556_v38 = vld [vmem:[#allocation14 + $0xb0] sm:$0xff]  }
 0x254   : > { %v6653_v42 = vpop.permute.xlu1 %927  ;;  %v923_v43 = vpack.c.bf16 %v921_v40, %v920_v41 }
 0x255   : > { %v930_v44 = vmul.f32 %v6653_v42, %v910_v30  ;;  %v931_v45 = vmul.f32 %v6653_v42, %v911_v33  ;;  %v932_v46 = vmul.f32 %v6653_v42, %v912_v39  ;;  %v933_v47 = vmul.f32 %v6653_v42, %v913_v36  ;;  %v5548_v30 = vld [vmem:[#allocation14 + $0x30] sm:$0xff]   ;;  %v5551_v33 = vld [vmem:[#allocation14 + $0x88] sm:$0xff]   ;;  %v5554_v36 = vld [vmem:[#allocation14 + $0xa0] sm:$0xff]  }
 0x256   : > { %1175 = vrot.lane.b32.xlu1 %v923_v43, %s6074_s17  ;;  %v5557_v39 = vld [vmem:[#allocation14 + $0xb8] sm:$0xff]  }
 0x257   : > { %v934_v48 = vpack.c.bf16 %v931_v45, %v930_v44  ;;  %v935_v49 = vpack.c.bf16 %v933_v47, %v932_v46 }
 0x259   : > { %1359 = vrot.lane.b32.xlu0 %v934_v48, %s6075_s21 }
 0x25a   : > { %1361 = vrot.lane.b32.xlu1 %v935_v49, %s6075_s21 }
 0x25d   : > { %1520 = vperm.xlu0 %5512, %v1502_v50  }
 0x25e   : > { %1525 = vperm.xlu1 %5513, %v1503_v51  }
 0x261   : > { %1637 = vperm.xlu0 %5512, %v1615_v53  }
 0x262   : > { %1632 = vperm.xlu1 %5513, %v1614_v54  }
 0x265   : > { %1535 = vperm.xlu0 %5512, %v1505_v55  }
 0x266   : > { %1530 = vperm.xlu1 %5513, %v1504_v56  }
 0x269   : > { %1647 = vperm.xlu0 %5512, %v1617_v57  }
 0x26a   : > { %1642 = vperm.xlu1 %5513, %v1616_v58  }
 0x26d   : > { %1545 = vperm.xlu0 %5512, %v1507_v59  }
 0x26e   : > { %1540 = vperm.xlu1 %5513, %v1506_v60  }
 0x271   : > { %1657 = vperm.xlu0 %5512, %v1619_v61  }
 0x272   : > { %1652 = vperm.xlu1 %5513, %v1618_v62  }
 0x275   : > { %1555 = vperm.xlu0 %5512, %v1509_v63  }
 0x276   : > { %1550 = vperm.xlu1 %5513, %v1508_v0  }
 0x279   : > { %1667 = vperm.xlu0 %5512, %v1621_v1  }
 0x27a   : > { %1662 = vperm.xlu1 %5513, %v1620_v2  }
 0x27d   : > { %1565 = vperm.xlu0 %5512, %v1511_v3  }
 0x27e   : > { %1560 = vperm.xlu1 %5513, %v1510_v4  }
 0x281   : > { %1677 = vperm.xlu0 %5512, %v1623_v5  }
 0x282   : > { %1672 = vperm.xlu1 %5513, %v1622_v7  }
 0x285   : > { %1575 = vperm.xlu0 %5512, %v1513_v8  }
 0x286   : > { %1570 = vperm.xlu1 %5513, %v1512_v9  }
 0x289   : > { %1687 = vperm.xlu0 %5512, %v1625_v10  }
 0x28a   : > { %1682 = vperm.xlu1 %5513, %v1624_v11  }
 0x28d   : > { %1585 = vperm.xlu0 %5512, %v1515_v12  }
 0x28e   : > { %1580 = vperm.xlu1 %5513, %v1514_v13  }
 0x291   : > { %1697 = vperm.xlu0 %5512, %v1627_v14  }
 0x292   : > { %1692 = vperm.xlu1 %5513, %v1626_v15  }
 0x295   : > { %1595 = vperm.xlu0 %5512, %v1517_v16  }
 0x296   : > { %1590 = vperm.xlu1 %5513, %v1516_v17  }
 0x299   : > { %1707 = vperm.xlu0 %5512, %v1629_v18  }
 0x29a   : > { %1702 = vperm.xlu1 %5513, %v1628_v19  }
 0x2c4   : > { %v1174_v20 = vpop.permute.xlu0 %1173 }
 0x2c5   : > { %4957 = vmatprep.subr.bf16.mxu0 %v1174_v20 }
 0x2c6   : > { %4958 = vmatpush3.bf16.msra.mxu0 %v1174_v20 }
 0x2c8   : > { %v1176_v21 = vpop.permute.xlu1 %1175 }
 0x2c9   : > { %4959 = vmatprep.subr.bf16.mxu0 %v1176_v21 }
 0x2ca   : > { %4960 = vmatpush3.bf16.msra.mxu0 %v1176_v21 }
 0x2cb   : > { %v1360_v24 = vpop.permute.xlu0 %1359 }
 0x2cc   : > { %4977 = vmatprep.subr.bf16.mxu0 %v1360_v24  ;;  %v1362_v26 = vpop.permute.xlu1 %1361 }
 0x2cd   : > { %4962 = vmatmul.mubr.msk.bf16.vlgmr.msra.gmra.mrb[0].mxu0 %vm1009_vm2, %v5543_v22 }
 0x2ce   : > { %4978 = vmatpush3.bf16.msra.mxu0 %v1360_v24  ;;  %4965 = vmatprep.mubr.msk.bf16.mxu0 %vm1009_vm2, %v5544_v23 }
 0x2cf   : > { %4979 = vmatprep.subr.bf16.mxu0 %v1362_v26 }
 0x2d2   : > { %4980 = vmatpush3.bf16.msra.mxu0 %v1362_v26 }
 0x2d5   : > { %4966 = vmatmul.mubr.msk.bf16.gmra.mrb[4].mxu0 %vm1009_vm2, %v5545_v27 }
 0x2d6   : > { %4969 = vmatprep.mubr.msk.bf16.mxu0 %vm1009_vm2, %v5546_v28 }
 0x2dc   : > { %v1521_v41 = vpop.permute.xlu0 %1520 }
 0x2dd   : > { %4970 = vmatmul.mubr.msk.bf16.gmra.mrb[8].mxu0 %vm1009_vm2, %v5547_v29  ;;  %v1526_v40 = vpop.permute.xlu1 %1525 }
 0x2de   : > { %4973 = vmatprep.mubr.msk.bf16.mxu0 %vm1009_vm2, %v5548_v30 }
 0x2e0   : > { %v1638_v44 = vpop.permute.xlu0 %1637 }
 0x2e1   : > { %v1633_v43 = vpop.permute.xlu1 %1632 }
 0x2e4   : > { %v1536_v46 = vpop.permute.xlu0 %1535 }
 0x2e5   : > { %4974 = vmatmul.mubr.msk.bf16.gmra.mrb[12].mxu0 %vm1009_vm2, %v5549_v31  ;;  %v1531_v45 = vpop.permute.xlu1 %1530 }
 0x2e6   : > { %4981 = vmatprep.mubr.msk.bf16.mxu0 %vm1009_vm2, %v5550_v32 }
 0x2e8   : > { %v1648_v48 = vpop.permute.xlu0 %1647 }
 0x2e9   : > { %v1643_v47 = vpop.permute.xlu1 %1642 }
 0x2ec   : > { %v1546_v50 = vpop.permute.xlu0 %1545 }
 0x2ed   : > { %4982 = vmatmul.mubr.msk.bf16.vlgmr.msra.gmra.mrb[0].mxu0 %vm1009_vm2, %v5551_v33  ;;  %v1541_v49 = vpop.permute.xlu1 %1540 }
 0x2ee   : > { %4985 = vmatprep.mubr.msk.bf16.mxu0 %vm1009_vm2, %v5552_v34 }
 0x2f0   : > { %v1658_v52 = vpop.permute.xlu0 %1657 }
 0x2f1   : > { %v1653_v51 = vpop.permute.xlu1 %1652 }
 0x2f4   : > { %v1556_v54 = vpop.permute.xlu0 %1555 }
 0x2f5   : > { %4986 = vmatmul.mubr.msk.bf16.gmra.mrb[4].mxu0 %vm1009_vm2, %v5553_v35  ;;  %v1551_v53 = vpop.permute.xlu1 %1550 }
 0x2f6   : > { %4989 = vmatprep.mubr.msk.bf16.mxu0 %vm1009_vm2, %v5554_v36 }
 0x2f8   : > { %v1668_v56 = vpop.permute.xlu0 %1667 }
 0x2f9   : > { %v1663_v55 = vpop.permute.xlu1 %1662 }
 0x2fc   : > { %v6711_v58 = vpop.permute.xlu0 %1565 }
 0x2fd   : > { %4990 = vmatmul.mubr.msk.bf16.gmra.mrb[8].mxu0 %vm1009_vm2, %v5555_v37  ;;  %v6709_v57 = vpop.permute.xlu1 %1560 }
 0x2fe   : > { %4993 = vmatprep.mubr.msk.bf16.mxu0 %vm1009_vm2, %v5556_v38 }
 0x300   : > { %v6715_v60 = vpop.permute.xlu0 %1677 }
 0x301   : > { %v6713_v59 = vpop.permute.xlu1 %1672 }
 0x304   : > { %v6719_v62 = vpop.permute.xlu0 %1575 }
 0x305   : > { %4994 = vmatmul.mubr.msk.bf16.gmra.mrb[12].mxu0 %vm1009_vm2, %v5557_v39  ;;  %v6717_v61 = vpop.permute.xlu1 %1570 }
 0x308   : > { %v6725_v9 = vpop.permute.xlu0 %1687 }
 0x309   : > { %v6721_v2 = vpop.permute.xlu1 %1682 }
 0x30c   : > { %v6746_v27 = vpop.permute.xlu0 %1585 }
 0x30d   : > { %v6740_v18 = vpop.permute.xlu1 %1580 }
 0x3c0   : > { %v4983_v63 = vpop.f32.mrb[0].mxu0 }
 0x3c1   : > { %v1600_v0 = vmul.f32 %v4983_v63, %v1531_v45  ;;  %v1423_v1 = vpop.f32.mrb[1].mxu0 }
 0x3c2   : > { %v1598_v3 = vmul.f32 %v1521_v41, %v1423_v1  ;;  %v4984_v4 = vpop.f32.mrb[2].mxu0 }
 0x3c3   : > { %v6723_v5 = vadd.f32 %v1643_v47, %v1600_v0  ;;  %v1601_v7 = vmul.f32 %v4984_v4, %v1536_v46  ;;  %v1426_v8 = vpop.f32.mrb[3].mxu0  ;;  %v6760_v46 = vpop.permute.xlu1 %1692 }
 0x3c4   : > { %v6727_v10 = vadd.f32 %v1633_v43, %v1598_v3  ;;  %v1599_v11 = vmul.f32 %v1526_v40, %v1426_v8 }
 0x3c5   : > { %v1728_v12 = vmul.f32 %v6723_v5, %v6723_v5  ;;  %v6731_v13 = vadd.f32 %v1648_v48, %v1601_v7 }
 0x3c6   : > { %v1726_v14 = vmul.f32 %v6727_v10, %v6727_v10  ;;  %v6735_v15 = vadd.f32 %v1638_v44, %v1599_v11 }
 0x3c7   : > { %v1744_v16 = vmul.f32 %v1728_v12, %v6723_v5  ;;  %v1729_v17 = vmul.f32 %v6731_v13, %v6731_v13 }
 0x3c8   : > { %v1742_v19 = vmul.f32 %v1726_v14, %v6727_v10  ;;  %v1727_v20 = vmul.f32 %v6735_v15, %v6735_v15  ;;  %v4987_v21 = vpop.f32.mrb[4].mxu0 }
 0x3c9   : > { %v1760_v22 = vmul.f32 0.044715, %v1744_v16  ;;  %v1745_v23 = vmul.f32 %v1729_v17, %v6731_v13  ;;  %v1604_v24 = vmul.f32 %v4987_v21, %v1551_v53  ;;  %v1439_v26 = vpop.f32.mrb[5].mxu0 }
 0x3ca   : > { %v1758_v28 = vmul.f32 0.044715, %v1742_v19  ;;  %v1743_v29 = vmul.f32 %v1727_v20, %v6735_v15  ;;  %v1602_v30 = vmul.f32 %v1541_v49, %v1439_v26  ;;  %v4988_v31 = vpop.f32.mrb[6].mxu0 }
 0x3cb   : > { %v1776_v32 = vadd.f32 %v1760_v22, %v6723_v5  ;;  %v1761_v33 = vmul.f32 0.044715, %v1745_v23  ;;  %v6750_v34 = vadd.f32 %v1663_v55, %v1604_v24  ;;  %v1605_v35 = vmul.f32 %v4988_v31, %v1556_v54  ;;  %v1442_v36 = vpop.f32.mrb[7].mxu0  ;;  %v6770_v55 = vpop.permute.xlu0 %1697 }
 0x3cc   : > { %v1774_v37 = vadd.f32 %v1758_v28, %v6727_v10  ;;  %v1759_v38 = vmul.f32 0.044715, %v1743_v29  ;;  %v6753_v39 = vadd.f32 %v1653_v51, %v1602_v30  ;;  %v1603_v40 = vmul.f32 %v1546_v50, %v1442_v36  ;;  %v1591_v22 = vpop.permute.xlu1 %1590 }
 0x3cd   : > { %v1792_v41 = vmul.f32 0.7978846, %v1776_v32  ;;  %v1777_v43 = vadd.f32 %v1761_v33, %v6731_v13  ;;  %v1732_v44 = vmul.f32 %v6750_v34, %v6750_v34  ;;  %v6758_v45 = vadd.f32 %v1668_v56, %v1605_v35 }
 0x3ce   : > { %v1790_v47 = vmul.f32 0.7978846, %v1774_v37  ;;  %v1775_v48 = vadd.f32 %v1759_v38, %v6735_v15  ;;  %v1730_v49 = vmul.f32 %v6753_v39, %v6753_v39  ;;  %v6765_v53 = vadd.f32 %v1658_v52, %v1603_v40 }
 0x3cf   : > { %5602 = vtanh.f32 %v1792_v41  ;;  %v1793_v50 = vmul.f32 0.7978846, %v1777_v43  ;;  %v1748_v51 = vmul.f32 %v1732_v44, %v6750_v34  ;;  %v1733_v54 = vmul.f32 %v6758_v45, %v6758_v45 }
 0x3d0   : > { %5604 = vtanh.f32 %v1790_v47  ;;  %v1791_v56 = vmul.f32 0.7978846, %v1775_v48  ;;  %v1746_v63 = vmul.f32 %v1730_v49, %v6753_v39  ;;  %v1731_v0 = vmul.f32 %v6765_v53, %v6765_v53  ;;  %v4991_v1 = vpop.f32.mrb[8].mxu0  ;;  %v1703_v48 = vpop.permute.xlu1 %1702 }
 0x3d1   : > { %5606 = vtanh.f32 %v1793_v50  ;;  %v1764_v52 = vmul.f32 0.044715, %v1748_v51  ;;  %v1749_v3 = vmul.f32 %v1733_v54, %v6758_v45  ;;  %v1608_v4 = vmul.f32 %v4991_v1, %v6717_v61  ;;  %v1455_v7 = vpop.f32.mrb[9].mxu0 }
 0x3d2   : > { %5608 = vtanh.f32 %v1791_v56  ;;  %v1762_v8 = vmul.f32 0.044715, %v1746_v63  ;;  %v1747_v11 = vmul.f32 %v1731_v0, %v6765_v53  ;;  %v1606_v12 = vmul.f32 %v6709_v57, %v1455_v7  ;;  %v4992_v14 = vpop.f32.mrb[10].mxu0 }
 0x3d3   : > { %v1780_v16 = vadd.f32 %v1764_v52, %v6750_v34  ;;  %v1765_v17 = vmul.f32 0.044715, %v1749_v3  ;;  %v6781_v19 = vadd.f32 %v6721_v2, %v1608_v4  ;;  %v1609_v20 = vmul.f32 %v4992_v14, %v6719_v62  ;;  %v1458_v21 = vpop.f32.mrb[11].mxu0  ;;  %v1596_v62 = vpop.permute.xlu0 %1595 }
 0x3d4   : > { %v1778_v61 = vadd.f32 %v1762_v8, %v6753_v39  ;;  %v1763_v23 = vmul.f32 0.044715, %v1747_v11  ;;  %v6786_v24 = vadd.f32 %v6713_v59, %v1606_v12  ;;  %v1607_v26 = vmul.f32 %v6711_v58, %v1458_v21 }
 0x3d5   : > { %v1796_v57 = vmul.f32 0.7978846, %v1780_v16  ;;  %v1781_v28 = vadd.f32 %v1765_v17, %v6758_v45  ;;  %v1736_v29 = vmul.f32 %v6781_v19, %v6781_v19  ;;  %v6793_v2 = vadd.f32 %v6725_v9, %v1609_v20 }
 0x3d6   : > { %v1794_v30 = vmul.f32 0.7978846, %v1778_v61  ;;  %v1779_v31 = vadd.f32 %v1763_v23, %v6765_v53  ;;  %v1734_v32 = vmul.f32 %v6786_v24, %v6786_v24  ;;  %v6799_v59 = vadd.f32 %v6715_v60, %v1607_v26 }
 0x3d7   : > { %5610 = vtanh.f32 %v1796_v57  ;;  %v1797_v58 = vmul.f32 0.7978846, %v1781_v28  ;;  %v1752_v33 = vmul.f32 %v1736_v29, %v6781_v19  ;;  %v1737_v35 = vmul.f32 %v6793_v2, %v6793_v2  ;;  %v1708_v7 = vpop.permute.xlu0 %1707 }
 0x3d8   : > { %5612 = vtanh.f32 %v1794_v30  ;;  %v1795_v9 = vmul.f32 0.7978846, %v1779_v31  ;;  %v1750_v36 = vmul.f32 %v1734_v32, %v6786_v24  ;;  %v1735_v37 = vmul.f32 %v6799_v59, %v6799_v59  ;;  %v4995_v38 = vpop.f32.mrb[12].mxu0 }
 0x3d9   : > { %v5603_v40 = vpop.eup %5602  ;;  %5614 = vtanh.f32 %v1797_v58  ;;  %v1768_v41 = vmul.f32 0.044715, %v1752_v33  ;;  %v1753_v60 = vmul.f32 %v1737_v35, %v6793_v2  ;;  %v1612_v43 = vmul.f32 %v4995_v38, %v1591_v22  ;;  %v1471_v44 = vpop.f32.mrb[13].mxu0 }
 0x3da   : > { %v5605_v47 = vpop.eup %5604  ;;  %5616 = vtanh.f32 %v1795_v9  ;;  %v1766_v49 = vmul.f32 0.044715, %v1750_v36  ;;  %v1751_v50 = vmul.f32 %v1735_v37, %v6799_v59  ;;  %v1610_v51 = vmul.f32 %v6740_v18, %v1471_v44  ;;  %v4996_v54 = vpop.f32.mrb[14].mxu0 }
 0x3db   : > { %v5607_v56 = vpop.eup %5606  ;;  %v1784_v63 = vadd.f32 %v1768_v41, %v6781_v19  ;;  %v1769_v0 = vmul.f32 0.044715, %v1753_v60  ;;  %v6811_v1 = vadd.f32 %v1703_v48, %v1612_v43  ;;  %v1613_v52 = vmul.f32 %v4996_v54, %v1596_v62  ;;  %v1474_v3 = vpop.f32.mrb[15].mxu0 }
 0x3dc   : > { %v5609_v4 = vpop.eup %5608  ;;  %v1782_v8 = vadd.f32 %v1766_v49, %v6786_v24  ;;  %v1767_v11 = vmul.f32 0.044715, %v1751_v50  ;;  %v6815_v12 = vadd.f32 %v6760_v46, %v1610_v51  ;;  %v1611_v14 = vmul.f32 %v6746_v27, %v1474_v3 }
 0x3dd   : > { %v1800_v18 = vmul.f32 0.7978846, %v1784_v63  ;;  %v1785_v16 = vadd.f32 %v1769_v0, %v6793_v2  ;;  %v1740_v17 = vmul.f32 %v6811_v1, %v6811_v1  ;;  %v6821_v20 = vadd.f32 %v1708_v7, %v1613_v52 }
 0x3de   : > { %v1798_v21 = vmul.f32 0.7978846, %v1782_v8  ;;  %v1783_v22 = vadd.f32 %v1767_v11, %v6799_v59  ;;  %v1738_v61 = vmul.f32 %v6815_v12, %v6815_v12  ;;  %v6827_v23 = vadd.f32 %v6770_v55, %v1611_v14 }
 0x3df   : > { %5618 = vtanh.f32 %v1800_v18  ;;  %v1801_v46 = vmul.f32 0.7978846, %v1785_v16  ;;  %v1756_v27 = vmul.f32 %v1740_v17, %v6811_v1  ;;  %v1741_v26 = vmul.f32 %v6821_v20, %v6821_v20 }
 0x3e0   : > { %5620 = vtanh.f32 %v1798_v21  ;;  %v1799_v57 = vmul.f32 0.7978846, %v1783_v22  ;;  %v1754_v28 = vmul.f32 %v1738_v61, %v6815_v12  ;;  %v1739_v29 = vmul.f32 %v6827_v23, %v6827_v23 }
 0x3e1   : > { %v5611_v62 = vpop.eup %5610  ;;  %5622 = vtanh.f32 %v1801_v46  ;;  %v1772_v30 = vmul.f32 0.044715, %v1756_v27  ;;  %v1757_v55 = vmul.f32 %v1741_v26, %v6821_v20  ;;  %v1822_v31 = vadd.f32 1.0, %v5605_v47 }
 0x3e2   : > { %v5613_v32 = vpop.eup %5612  ;;  %5624 = vtanh.f32 %v1799_v57  ;;  %v1770_v58 = vmul.f32 0.044715, %v1754_v28  ;;  %v1755_v33 = vmul.f32 %v1739_v29, %v6827_v23  ;;  %v1823_v35 = vadd.f32 1.0, %v5609_v4 }
 0x3e3   : > { %v5615_v9 = vpop.eup %5614  ;;  %v1788_v36 = vadd.f32 %v1772_v30, %v6811_v1  ;;  %v1773_v37 = vmul.f32 0.044715, %v1757_v55  ;;  %v1838_v38 = vmul.f32 0.5, %v1822_v31  ;;  %v1824_v41 = vadd.f32 1.0, %v5603_v40 }
 0x3e4   : > { %v5617_v60 = vpop.eup %5616  ;;  %v1786_v43 = vadd.f32 %v1770_v58, %v6815_v12  ;;  %v1771_v44 = vmul.f32 0.044715, %v1755_v33  ;;  %v1839_v48 = vmul.f32 0.5, %v1823_v35  ;;  %v1825_v49 = vadd.f32 1.0, %v5607_v56 }
 0x3e5   : > { %v1789_v47 = vadd.f32 %v1773_v37, %v6821_v20  ;;  %v6841_v50 = vmul.f32 %v1838_v38, %v6727_v10  ;;  %v1840_v51 = vmul.f32 0.5, %v1824_v41  ;;  %v1804_v40 = vmul.f32 0.7978846, %v1788_v36 }
 0x3e6   : > { %v1802_v54 = vmul.f32 0.7978846, %v1786_v43  ;;  %v1787_v63 = vadd.f32 %v1771_v44, %v6827_v23  ;;  %v6845_v0 = vmul.f32 %v1839_v48, %v6735_v15  ;;  %v1841_v52 = vmul.f32 0.5, %v1825_v49 }
 0x3e7   : > { %v1805_v3 = vmul.f32 0.7978846, %v1789_v47  ;;  %1870 = vrot.lane.b32.xlu1 %v6841_v50, %s6070_s26  ;;  %v6850_v56 = vmul.f32 %v1840_v51, %v6723_v5  ;;  %v1826_v4 = vadd.f32 1.0, %v5613_v32  ;;  %v1827_v14 = vadd.f32 1.0, %v5617_v60 }
 0x3e8   : > { %5626 = vtanh.f32 %v1802_v54  ;;  %v1803_v10 = vmul.f32 0.7978846, %v1787_v63  ;;  %1873 = vrot.lane.b32.xlu0 %v6845_v0, %s6070_s26  ;;  %v1990_v7 = vpack.c.bf16 %v6845_v0, %v6841_v50  ;;  %v6857_v15 = vmul.f32 %v1841_v52, %v6731_v13 }
 0x3e9   : > { %v5619_v8 = vpop.eup %5618  ;;  %5628 = vtanh.f32 %v1805_v3  ;;  %v1842_v11 = vmul.f32 0.5, %v1826_v4  ;;  %v1828_v18 = vadd.f32 1.0, %v5611_v62  ;;  %v1829_v17 = vadd.f32 1.0, %v5615_v9 }
 0x3ea   : > { %v5621_v16 = vpop.eup %5620  ;;  %5630 = vtanh.f32 %v1803_v10  ;;  %4997 = vmatprep.subr.bf16.mxu1 %v1990_v7  ;;  %v1991_v5 = vpack.c.bf16 %v6857_v15, %v6850_v56  ;;  %v1843_v22 = vmul.f32 0.5, %v1827_v14  ;;  %v1832_v31 = vadd.f32 1.0, %v5619_v8 }
 0x3eb   : > { %v5623_v21 = vpop.eup %5622  ;;  %5632 = vtanh.f32 %v1804_v40  ;;  %1876 = vrot.lane.b32.xlu1 %v6850_v56, %s6070_s26  ;;  %4998 = vmatpush3.bf16.msra.mxu1 %v1990_v7  ;;  %v6864_v13 = vmul.f32 %v1842_v11, %v6753_v39  ;;  %v1830_v61 = vadd.f32 1.0, %v5621_v16  ;;  %v1844_v27 = vmul.f32 0.5, %v1828_v18 }
 0x3ec   : > { %v5625_v46 = vpop.eup %5624  ;;  %1879 = vrot.lane.b32.xlu0 %v6857_v15, %s6070_s26  ;;  %4999 = vmatprep.subr.bf16.mxu1 %v1991_v5  ;;  %v1845_v26 = vmul.f32 0.5, %v1829_v17  ;;  %v6869_v57 = vmul.f32 %v1843_v22, %v6765_v53  ;;  %v1833_v30 = vadd.f32 1.0, %v5623_v21 }
 0x3ed   : > { %v1831_v28 = vadd.f32 1.0, %v5625_v46  ;;  %v1846_v62 = vmul.f32 0.5, %v1830_v61  ;;  %v6881_v53 = vmul.f32 %v1844_v27, %v6750_v34 }
 0x3ee   : > { %v6872_v29 = vmul.f32 %v1845_v26, %v6758_v45  ;;  %v1992_v39 = vpack.c.bf16 %v6869_v57, %v6864_v13  ;;  %v1849_v35 = vmul.f32 0.5, %v1833_v30 }
 0x3ef   : > { %1882 = vrot.lane.b32.xlu1 %v6864_v13, %s6070_s26  ;;  %5000 = vmatpush3.bf16.msra.mxu1 %v1991_v5  ;;  %v1847_v55 = vmul.f32 0.5, %v1831_v28  ;;  %v6889_v33 = vmul.f32 %v1846_v62, %v6786_v24 }
 0x3f0   : > { %1885 = vrot.lane.b32.xlu0 %v6869_v57, %s6070_s26  ;;  %5001 = vmatprep.subr.bf16.mxu1 %v1992_v39  ;;  %v1993_v58 = vpack.c.bf16 %v6872_v29, %v6881_v53  ;;  %v6898_v24 = vmul.f32 %v1849_v35, %v6793_v2 }
 0x3f1   : > { %v6884_v45 = vmul.f32 %v1847_v55, %v6799_v59  ;;  %v1848_v59 = vmul.f32 0.5, %v1832_v31 }
 0x3f2   : > { %v5627_v32 = vpop.eup %5626 }
 0x3f3   : > { %v5629_v9 = vpop.eup %5628  ;;  %1888 = vrot.lane.b32.xlu1 %v6881_v53, %s6070_s26  ;;  %5002 = vmatpush3.bf16.msra.mxu1 %v1992_v39  ;;  %v1834_v34 = vadd.f32 1.0, %v5627_v32  ;;  %v1994_v37 = vpack.c.bf16 %v6884_v45, %v6889_v33  ;;  %v6905_v48 = vmul.f32 %v1848_v59, %v6781_v19  ;;  %v5558_v59 = vld [vmem:[#allocation16 + $0x10] sm:$0xff]  }
 0x3f4   : > { %v5631_v36 = vpop.eup %5630  ;;  %1891 = vrot.lane.b32.xlu0 %v6872_v29, %s6070_s26  ;;  %5003 = vmatprep.subr.bf16.mxu1 %v1993_v58  ;;  %v1837_v43 = vadd.f32 1.0, %v5629_v9 }
 0x3f5   : > { %v5633_v38 = vpop.eup %5632  ;;  %v1835_v41 = vadd.f32 1.0, %v5631_v36  ;;  %v1850_v60 = vmul.f32 0.5, %v1834_v34  ;;  %v1995_v2 = vpack.c.bf16 %v6898_v24, %v6905_v48  ;;  %5013 = vmatprep.mubr.bf16.mxu1 %v5558_v59 }
 0x3f6   : > { %v1836_v49 = vadd.f32 1.0, %v5633_v38  ;;  %v1853_v54 = vmul.f32 0.5, %v1837_v43 }
 0x3f7   : > { %1894 = vrot.lane.b32.xlu1 %v6889_v33, %s6070_s26  ;;  %5004 = vmatpush3.bf16.msra.mxu1 %v1993_v58  ;;  %v1851_v44 = vmul.f32 0.5, %v1835_v41  ;;  %v6913_v51 = vmul.f32 %v1850_v60, %v6815_v12 }
 0x3f8   : > { %1897 = vrot.lane.b32.xlu0 %v6884_v45, %s6070_s26  ;;  %5005 = vmatprep.subr.bf16.mxu1 %v1994_v37  ;;  %v1852_v19 = vmul.f32 0.5, %v1836_v49  ;;  %v6922_v63 = vmul.f32 %v1853_v54, %v6821_v20 }
 0x3f9   : > { %v6908_v47 = vmul.f32 %v1851_v44, %v6827_v23 }
 0x3fa   : > { %v6929_v12 = vmul.f32 %v1852_v19, %v6811_v1 }
 0x3fb   : > { %1900 = vrot.lane.b32.xlu1 %v6905_v48, %s6070_s26  ;;  %5006 = vmatpush3.bf16.msra.mxu1 %v1994_v37  ;;  %v1996_v23 = vpack.c.bf16 %v6908_v47, %v6913_v51  ;;  %v5559_v37 = vld [vmem:[#allocation16 + $0x18] sm:$0xff]  }
 0x3fc   : > { %1903 = vrot.lane.b32.xlu0 %v6898_v24, %s6070_s26  ;;  %5007 = vmatprep.subr.bf16.mxu1 %v1995_v2  ;;  %v1997_v52 = vpack.c.bf16 %v6922_v63, %v6929_v12 }
 0x3ff   : > { %1906 = vrot.lane.b32.xlu1 %v6913_v51, %s6070_s26  ;;  %5008 = vmatpush3.bf16.msra.mxu1 %v1995_v2 }
 0x400   : > { %1909 = vrot.lane.b32.xlu0 %v6908_v47, %s6070_s26  ;;  %5009 = vmatprep.subr.bf16.mxu1 %v1996_v23 }
 0x403   : > { %1912 = vrot.lane.b32.xlu1 %v6929_v12, %s6070_s26  ;;  %5010 = vmatpush3.bf16.msra.mxu1 %v1996_v23 }
 0x404   : > { %1915 = vrot.lane.b32.xlu0 %v6922_v63, %s6070_s26  ;;  %5011 = vmatprep.subr.bf16.mxu1 %v1997_v52 }
 0x407   : > { %5012 = vmatpush3.bf16.msra.mxu1 %v1997_v52 }
 0x40a   : > { %5014 = vmatmul.mubr.bf16.vlgmr.msra.gmra.mrb[0].mxu1 %v5559_v37 }
 0x459   : > { %v1871_v20 = vpop.permute.xlu1 %1870 }
 0x45a   : > { %v1874_v40 = vpop.permute.xlu0 %1873  ;;  %v1872_v3 = vsel %vm889_vm1, %v1871_v20, %v6841_v50 }
 0x45b   : > { %1918 = vrot.lane.b32.xlu1 %v1872_v3, %s6070_s26  ;;  %v1875_v1 = vsel %vm889_vm1, %v1874_v40, %v6845_v0 }
 0x45c   : > { %1920 = vrot.lane.b32.xlu0 %v1875_v1, %s6070_s26 }
 0x45d   : > { %v1877_v4 = vpop.permute.xlu1 %1876 }
 0x45e   : > { %v1880_v10 = vpop.permute.xlu0 %1879  ;;  %v1878_v7 = vsel %vm889_vm1, %v1877_v4, %v6850_v56 }
 0x45f   : > { %1922 = vrot.lane.b32.xlu1 %v1878_v7, %s6070_s26  ;;  %v1881_v8 = vsel %vm889_vm1, %v1880_v10, %v6857_v15 }
 0x460   : > { %1924 = vrot.lane.b32.xlu0 %v1881_v8, %s6070_s26 }
 0x461   : > { %v1883_v11 = vpop.permute.xlu1 %1882 }
 0x462   : > { %v1886_v14 = vpop.permute.xlu0 %1885  ;;  %v1884_v18 = vsel %vm889_vm1, %v1883_v11, %v6864_v13 }
 0x463   : > { %1926 = vrot.lane.b32.xlu1 %v1884_v18, %s6070_s26  ;;  %v1887_v16 = vsel %vm889_vm1, %v1886_v14, %v6869_v57 }
 0x464   : > { %1928 = vrot.lane.b32.xlu0 %v1887_v16, %s6070_s26 }
 0x465   : > { %v1889_v5 = vpop.permute.xlu1 %1888 }
 0x466   : > { %v1892_v17 = vpop.permute.xlu0 %1891  ;;  %v1890_v21 = vsel %vm889_vm1, %v1889_v5, %v6881_v53 }
 0x467   : > { %1930 = vrot.lane.b32.xlu1 %v1890_v21, %s6070_s26  ;;  %v1893_v22 = vsel %vm889_vm1, %v1892_v17, %v6872_v29 }
 0x468   : > { %1932 = vrot.lane.b32.xlu0 %v1893_v22, %s6070_s26 }
 0x469   : > { %v1895_v61 = vpop.permute.xlu1 %1894 }
 0x46a   : > { %v1898_v46 = vpop.permute.xlu0 %1897  ;;  %v1896_v27 = vsel %vm889_vm1, %v1895_v61, %v6889_v33 }
 0x46b   : > { %1934 = vrot.lane.b32.xlu1 %v1896_v27, %s6070_s26  ;;  %v1899_v26 = vsel %vm889_vm1, %v1898_v46, %v6884_v45 }
 0x46c   : > { %1936 = vrot.lane.b32.xlu0 %v1899_v26, %s6070_s26 }
 0x46d   : > { %v1901_v28 = vpop.permute.xlu1 %1900 }
 0x46e   : > { %v1904_v62 = vpop.permute.xlu0 %1903  ;;  %v1902_v30 = vsel %vm889_vm1, %v1901_v28, %v6905_v48 }
 0x46f   : > { %1938 = vrot.lane.b32.xlu1 %v1902_v30, %s6070_s26  ;;  %v1905_v39 = vsel %vm889_vm1, %v1904_v62, %v6898_v24 }
 0x470   : > { %1940 = vrot.lane.b32.xlu0 %v1905_v39, %s6070_s26 }
 0x471   : > { %v1907_v55 = vpop.permute.xlu1 %1906 }
 0x472   : > { %v1908_v31 = vsel %vm889_vm1, %v1907_v55, %v6913_v51  ;;  %v1910_v32 = vpop.permute.xlu0 %1909  ;;  %v5560_v55 = vld [vmem:[#allocation16] sm:$0xff]  }
 0x473   : > { %1942 = vrot.lane.b32.xlu1 %v1908_v31, %s6070_s26  ;;  %v1911_v58 = vsel %vm889_vm1, %v1910_v32, %v6908_v47  ;;  %5033 = vmatprep.mubr.bf16.mxu1 %v5560_v55 }
 0x474   : > { %1944 = vrot.lane.b32.xlu0 %v1911_v58, %s6070_s26 }
 0x475   : > { %v1913_v35 = vpop.permute.xlu1 %1912 }
 0x476   : > { %v1914_v9 = vsel %vm889_vm1, %v1913_v35, %v6929_v12  ;;  %v1916_v34 = vpop.permute.xlu0 %1915 }
 0x477   : > { %1946 = vrot.lane.b32.xlu1 %v1914_v9, %s6070_s26  ;;  %v1917_v36 = vsel %vm889_vm1, %v1916_v34, %v6922_v63 }
 0x478   : > { %1948 = vrot.lane.b32.xlu0 %v1917_v36, %s6070_s26 }
 0x4cd   : > { %v1919_v38 = vpop.permute.xlu1 %1918 }
 0x4ce   : > { %v1950_v41 = vsel %vm889_vm1, %v1919_v38, %v6841_v50  ;;  %v1921_v60 = vpop.permute.xlu0 %1920 }
 0x4cf   : > { %v1951_v43 = vsel %vm889_vm1, %v1921_v60, %v6845_v0  ;;  %v1966_v44 = vmul.f32 %v1950_v41, %v6638_v25 }
 0x4d0   : > { %v1967_v49 = vmul.f32 %v1951_v43, %v6638_v25  ;;  %v1999_v58 = vmul.f32 %v1951_v43, %v6653_v42 }
 0x4d1   : > { %v1923_v2 = vpop.permute.xlu1 %1922 }
 0x4d2   : > { %v6993_v54 = vsel %vm889_vm1, %v1923_v2, %v6850_v56  ;;  %v1925_v19 = vpop.permute.xlu0 %1924  ;;  %v1982_v23 = vpack.c.bf16 %v1967_v49, %v1966_v44 }
 0x4d3   : > { %v1953_v52 = vsel %vm889_vm1, %v1925_v19, %v6857_v15  ;;  %v1968_v50 = vmul.f32 %v6993_v54, %v6638_v25 }
 0x4d4   : > { %v1969_v20 = vmul.f32 %v1953_v52, %v6638_v25  ;;  %2112 = vrot.lane.b32.xlu1 %v1982_v23, %s6074_s17  ;;  %v2001_v37 = vmul.f32 %v1953_v52, %v6653_v42 }
 0x4d5   : > { %v1927_v0 = vpop.permute.xlu1 %1926 }
 0x4d6   : > { %v1954_v40 = vsel %vm889_vm1, %v1927_v0, %v6864_v13  ;;  %v1929_v3 = vpop.permute.xlu0 %1928  ;;  %v1983_v1 = vpack.c.bf16 %v1969_v20, %v1968_v50 }
 0x4d7   : > { %v1955_v56 = vsel %vm889_vm1, %v1929_v3, %v6869_v57  ;;  %v1970_v4 = vmul.f32 %v1954_v40, %v6638_v25  ;;  %v2002_v44 = vmul.f32 %v1954_v40, %v6653_v42 }
 0x4d8   : > { %v1971_v15 = vmul.f32 %v1955_v56, %v6638_v25  ;;  %2114 = vrot.lane.b32.xlu0 %v1983_v1, %s6074_s17  ;;  %v2003_v38 = vmul.f32 %v1955_v56, %v6653_v42 }
 0x4d9   : > { %v1931_v10 = vpop.permute.xlu1 %1930 }
 0x4da   : > { %v1956_v7 = vsel %vm889_vm1, %v1931_v10, %v6881_v53  ;;  %v1933_v8 = vpop.permute.xlu0 %1932  ;;  %v1984_v11 = vpack.c.bf16 %v1971_v15, %v1970_v4  ;;  %v2016_v49 = vpack.c.bf16 %v2003_v38, %v2002_v44  ;;  %v2287_v15 = vld [vmem:[%s6603_s14] sm:$0xff]  ;;  %v5667_v44 = vld [vmem:[%s6561_s16] sm:$0xff] }
 0x4db   : > { %v1957_v13 = vsel %vm889_vm1, %v1933_v8, %v6872_v29  ;;  %v1972_v14 = vmul.f32 %v1956_v7, %v6638_v25  ;;  %v2004_v19 = vmul.f32 %v1956_v7, %v6653_v42  ;;  %v2289_v7 = vld [vmem:[%s6603_s14 + $0x10] sm:$0xff]  ;;  %v2288_v8 = vld [vmem:[%s6603_s14 + $0x8] sm:$0xff]  ;;  %v5666_v38 = vld [vmem:[%s6561_s16 + $0x10] sm:$0xff] }
 0x4dc   : > { %v1973_v18 = vmul.f32 %v1957_v13, %v6638_v25  ;;  %2116 = vrot.lane.b32.xlu1 %v1984_v11, %s6074_s17  ;;  %v2319_v11 = vld [vmem:[%s7074_s19] sm:$0xff] }
 0x4dd   : > { %v1935_v57 = vpop.permute.xlu1 %1934 }
 0x4de   : > { %v1958_v16 = vsel %vm889_vm1, %v1935_v57, %v6889_v33  ;;  %v1937_v5 = vpop.permute.xlu0 %1936  ;;  %v1985_v17 = vpack.c.bf16 %v1973_v18, %v1972_v14  ;;  %v2321_v14 = vld [vmem:[%s7074_s19 + $0x10] sm:$0xff]  ;;  %v2320_v18 = vld [vmem:[%s7074_s19 + $0x8] sm:$0xff]  ;;  %v2322_v57 = vld [vmem:[%s7074_s19 + $0x18] sm:$0xff] }
 0x4df   : > { %v1959_v53 = vsel %vm889_vm1, %v1937_v5, %v6884_v45  ;;  %v1974_v21 = vmul.f32 %v1958_v16, %v6638_v25  ;;  %v2006_v23 = vmul.f32 %v1958_v16, %v6653_v42 }
 0x4e0   : > { %v1975_v22 = vmul.f32 %v1959_v53, %v6638_v25  ;;  %2118 = vrot.lane.b32.xlu0 %v1985_v17, %s6074_s17 }
 0x4e1   : > { %v1939_v29 = vpop.permute.xlu1 %1938 }
 0x4e2   : > { %v1960_v61 = vsel %vm889_vm1, %v1939_v29, %v6905_v48  ;;  %v1941_v46 = vpop.permute.xlu0 %1940  ;;  %v1986_v27 = vpack.c.bf16 %v1975_v22, %v1974_v21 }
 0x4e3   : > { %v1961_v33 = vsel %vm889_vm1, %v1941_v46, %v6898_v24  ;;  %v1976_v26 = vmul.f32 %v1960_v61, %v6638_v25  ;;  %v2008_v0 = vmul.f32 %v1960_v61, %v6653_v42  ;;  %v5561_v46 = vld [vmem:[#allocation16 + $0x8] sm:$0xff]  }
 0x4e4   : > { %v1977_v28 = vmul.f32 %v1961_v33, %v6638_v25  ;;  %2120 = vrot.lane.b32.xlu1 %v1986_v27, %s6074_s17 }
 0x4e5   : > { %v1943_v45 = vpop.permute.xlu1 %1942 }
 0x4e6   : > { %v1962_v62 = vsel %vm889_vm1, %v1943_v45, %v6913_v51  ;;  %v1945_v30 = vpop.permute.xlu0 %1944  ;;  %v1987_v39 = vpack.c.bf16 %v1977_v28, %v1976_v26 }
 0x4e7   : > { %v1963_v48 = vsel %vm889_vm1, %v1945_v30, %v6908_v47  ;;  %v1978_v31 = vmul.f32 %v1962_v62, %v6638_v25  ;;  %v1998_v47 = vmul.f32 %v1950_v41, %v6653_v42  ;;  %v2007_v41 = vmul.f32 %v1959_v53, %v6653_v42 }
 0x4e8   : > { %v1979_v24 = vmul.f32 %v1963_v48, %v6638_v25  ;;  %2122 = vrot.lane.b32.xlu0 %v1987_v39, %s6074_s17  ;;  %v2011_v52 = vmul.f32 %v1963_v48, %v6653_v42  ;;  %v2010_v40 = vmul.f32 %v1962_v62, %v6653_v42  ;;  %v5563_v48 = vld [vmem:[#allocation16 + $0x28] sm:$0xff]  }
 0x4e9   : > { %v1947_v32 = vpop.permute.xlu1 %1946  ;;  %v2014_v60 = vpack.c.bf16 %v1999_v58, %v1998_v47  ;;  %v2018_v50 = vpack.c.bf16 %v2007_v41, %v2006_v23 }
 0x4ea   : > { %v1964_v35 = vsel %vm889_vm1, %v1947_v32, %v6929_v12  ;;  %v1949_v51 = vpop.permute.xlu0 %1948  ;;  %v1988_v9 = vpack.c.bf16 %v1979_v24, %v1978_v31  ;;  %v2000_v12 = vmul.f32 %v6993_v54, %v6653_v42  ;;  %v2009_v54 = vmul.f32 %v1961_v33, %v6653_v42  ;;  %v5562_v33 = vld [vmem:[#allocation16 + $0x20] sm:$0xff]  }
 0x4eb   : > { %v1965_v34 = vsel %vm889_vm1, %v1949_v51, %v6922_v63  ;;  %v1980_v36 = vmul.f32 %v1964_v35, %v6638_v25  ;;  %v2005_v63 = vmul.f32 %v1957_v13, %v6653_v42  ;;  %v2020_v1 = vpack.c.bf16 %v2011_v52, %v2010_v40  ;;  %v2290_v13 = vld [vmem:[%s6603_s14 + $0x18] sm:$0xff]  ;;  %v7082_v31 = vld [vmem:[#allocation8] sm:$0xff]  }
 0x4ec   : > { %v1981_v59 = vmul.f32 %v1965_v34, %v6638_v25  ;;  %2124 = vrot.lane.b32.xlu1 %v1988_v9, %s6074_s17  ;;  %v2015_v2 = vpack.c.bf16 %v2001_v37, %v2000_v12  ;;  %v2013_v3 = vmul.f32 %v1965_v34, %v6653_v42  ;;  %v2019_v56 = vpack.c.bf16 %v2009_v54, %v2008_v0  ;;  %v5669_v54 = vld [vmem:[%s6561_s16 + $0x8] sm:$0xff] }
 0x4ed   : > { %v2017_v20 = vpack.c.bf16 %v2005_v63, %v2004_v19  ;;  %v2012_v4 = vmul.f32 %v1964_v35, %v6653_v42  ;;  %5061 = vmatprep.mubr.msk.bf16.mxu0 %vm1009_vm2, %v7082_v31 }
 0x4ee   : > { %v1989_v43 = vpack.c.bf16 %v1981_v59, %v1980_v36 }
 0x4ef   : > { %v2021_v10 = vpack.c.bf16 %v2013_v3, %v2012_v4  ;;  %v5566_v4 = vld [vmem:[#allocation11] sm:$0xff]  }
 0x4f0   : > { %2210 = vrot.lane.b32.xlu1 %v2014_v60, %s6075_s21  ;;  %2126 = vrot.lane.b32.xlu0 %v1989_v43, %s6074_s17 }
 0x4f4   : > { %2214 = vrot.lane.b32.xlu1 %v2016_v49, %s6075_s21  ;;  %2212 = vrot.lane.b32.xlu0 %v2015_v2, %s6075_s21  ;;  %v5668_v49 = vld [vmem:[%s6561_s16 + $0x18] sm:$0xff]  ;;  %s6078_s16 = smov 112  }
 0x4f8   : > { %2218 = vrot.lane.b32.xlu1 %v2018_v50, %s6075_s21  ;;  %2216 = vrot.lane.b32.xlu0 %v2017_v20, %s6075_s21 }
 0x4fc   : > { %2222 = vrot.lane.b32.xlu1 %v2020_v1, %s6075_s21  ;;  %2220 = vrot.lane.b32.xlu0 %v2019_v56, %s6075_s21  ;;  %v5565_v56 = vld [vmem:[#allocation8 + $0x8] sm:$0xff]  }
 0x500   : > { %2293 = vperm.xlu1 %5513, %v2287_v15   ;;  %2224 = vrot.lane.b32.xlu0 %v2021_v10, %s6075_s21  ;;  %v5567_v15 = vld [vmem:[#allocation11 + $0x8] sm:$0xff]  }
 0x504   : > { %2303 = vperm.xlu1 %5513, %v2289_v7   ;;  %2298 = vperm.xlu0 %5512, %v2288_v8  }
 0x508   : > { %2325 = vperm.xlu1 %5513, %v2319_v11   ;;  %2308 = vperm.xlu0 %5512, %v2290_v13  }
 0x50c   : > { %2335 = vperm.xlu1 %5513, %v2321_v14   ;;  %2330 = vperm.xlu0 %5512, %v2320_v18  }
 0x510   : > { %2340 = vperm.xlu0 %5512, %v2322_v57  }
 0x546   : > { %v2113_v16 = vpop.permute.xlu1 %2112 }
 0x547   : > { %5017 = vmatprep.subr.bf16.mxu1 %v2113_v16 }
 0x548   : > { %5018 = vmatpush3.bf16.msra.mxu1 %v2113_v16 }
 0x54a   : > { %v2115_v5 = vpop.permute.xlu0 %2114 }
 0x54b   : > { %5019 = vmatprep.subr.bf16.mxu1 %v2115_v5 }
 0x54c   : > { %5020 = vmatpush3.bf16.msra.mxu1 %v2115_v5 }
 0x54e   : > { %v2117_v17 = vpop.permute.xlu1 %2116 }
 0x54f   : > { %5021 = vmatprep.subr.bf16.mxu1 %v2117_v17 }
 0x550   : > { %5022 = vmatpush3.bf16.msra.mxu1 %v2117_v17 }
 0x552   : > { %v2119_v53 = vpop.permute.xlu0 %2118 }
 0x553   : > { %5023 = vmatprep.subr.bf16.mxu1 %v2119_v53 }
 0x554   : > { %5024 = vmatpush3.bf16.msra.mxu1 %v2119_v53  ;;  %v5568_v53 = vld [vmem:[#allocation13] sm:$0xff]  }
 0x556   : > { %v2121_v21 = vpop.permute.xlu1 %2120 }
 0x557   : > { %5025 = vmatprep.subr.bf16.mxu1 %v2121_v21 }
 0x558   : > { %5026 = vmatpush3.bf16.msra.mxu1 %v2121_v21  ;;  %v5569_v21 = vld [vmem:[#allocation13 + $0x8] sm:$0xff]  }
 0x55a   : > { %v2123_v22 = vpop.permute.xlu0 %2122 }
 0x55b   : > { %5027 = vmatprep.subr.bf16.mxu1 %v2123_v22 }
 0x55c   : > { %5028 = vmatpush3.bf16.msra.mxu1 %v2123_v22  ;;  %v867_v22 = vld [vmem:[#allocation7] sm:$0xff] }
 0x55e   : > { %v2125_v29 = vpop.permute.xlu1 %2124 }
 0x55f   : > { %5029 = vmatprep.subr.bf16.mxu1 %v2125_v29 }
 0x560   : > { %5030 = vmatpush3.bf16.msra.mxu1 %v2125_v29 }
 0x562   : > { %v2127_v61 = vpop.permute.xlu0 %2126  ;;  %v2211_v27 = vpop.permute.xlu1 %2210 }
 0x563   : > { %5031 = vmatprep.subr.bf16.mxu1 %v2127_v61 }
 0x564   : > { %5032 = vmatpush3.bf16.msra.mxu1 %v2127_v61  ;;  %v868_v61 = vld [vmem:[#allocation7 + $0x8] sm:$0xff] }
 0x565   : > { %5037 = vmatprep.subr.bf16.mxu1 %v2211_v27 }
 0x566   : > { %v2213_v26 = vpop.permute.xlu0 %2212  ;;  %v2215_v28 = vpop.permute.xlu1 %2214 }
 0x567   : > { %5034 = vmatmul.mubr.bf16.vlgmr.msra.gmra.mrb[0].mxu1 %v5561_v46 }
 0x568   : > { %5038 = vmatpush3.bf16.msra.mxu1 %v2211_v27  ;;  %5053 = vmatprep.mubr.bf16.mxu1 %v5562_v33 }
 0x569   : > { %5039 = vmatprep.subr.bf16.mxu1 %v2213_v26 }
 0x56a   : > { %v2217_v45 = vpop.permute.xlu0 %2216  ;;  %v2219_v62 = vpop.permute.xlu1 %2218 }
 0x56c   : > { %5040 = vmatpush3.bf16.msra.mxu1 %v2213_v26 }
 0x56d   : > { %5041 = vmatprep.subr.bf16.mxu1 %v2215_v28 }
 0x56e   : > { %v2221_v30 = vpop.permute.xlu0 %2220  ;;  %v2223_v39 = vpop.permute.xlu1 %2222 }
 0x570   : > { %5042 = vmatpush3.bf16.msra.mxu1 %v2215_v28 }
 0x571   : > { %5043 = vmatprep.subr.bf16.mxu1 %v2217_v45 }
 0x572   : > { %v2225_v55 = vpop.permute.xlu0 %2224 }
 0x574   : > { %5044 = vmatpush3.bf16.msra.mxu1 %v2217_v45 }
 0x575   : > { %5045 = vmatprep.subr.bf16.mxu1 %v2219_v62 }
 0x578   : > { %5046 = vmatpush3.bf16.msra.mxu1 %v2219_v62  ;;  %v5570_v62 = vld [vmem:[#allocation10] sm:$0xff]  }
 0x579   : > { %5047 = vmatprep.subr.bf16.mxu1 %v2221_v30 }
 0x57c   : > { %5048 = vmatpush3.bf16.msra.mxu1 %v2221_v30 }
 0x57d   : > { %5049 = vmatprep.subr.bf16.mxu1 %v2223_v39 }
 0x57f   : > { %v2294_v24 = vpop.permute.xlu1 %2293 }
 0x580   : > { %5050 = vmatpush3.bf16.msra.mxu1 %v2223_v39 }
 0x581   : > { %5051 = vmatprep.subr.bf16.mxu1 %v2225_v55 }
 0x583   : > { %v2299_v32 = vpop.permute.xlu0 %2298  ;;  %v2304_v58 = vpop.permute.xlu1 %2303 }
 0x584   : > { %5052 = vmatpush3.bf16.msra.mxu1 %v2225_v55 }
 0x585   : > { %5065 = vmatprep.subr.bf16.mxu1 %v6071_v6 }
 0x587   : > { %5054 = vmatmul.mubr.bf16.vlgmr.msra.gmra.mrb[0].mxu1 %v5563_v48  ;;  %v2309_v35 = vpop.permute.xlu0 %2308  ;;  %v2326_v51 = vpop.permute.xlu1 %2325 }
 0x588   : > { %5066 = vmatpush3.bf16.msra.mxu1 %v5566_v4  ;;  %5069 = vmatprep.mubr.msk.bf16.mxu1 %vm6077_vm4, %v6071_v6  ;;  %v5574_v4 = vld [vmem:[#allocation14 + $0x110] sm:$0xff]  }
 0x589   : > { %5067 = vmatprep.subr.bf16.mxu1 %v6071_v6 }
 0x58b   : > { %v2331_v9 = vpop.permute.xlu0 %2330  ;;  %v2336_v19 = vpop.permute.xlu1 %2335 }
 0x58c   : > { %5068 = vmatpush3.bf16.msra.mxu1 %v5567_v15  ;;  %v5575_v15 = vld [vmem:[#allocation14 + $0x118] sm:$0xff]  }
 0x58f   : > { %v2341_v23 = vpop.permute.xlu0 %2340 }
 0x65a   : > { %v5055_v34 = vpop.f32.mrb[0].mxu1 }
 0x65b   : > { %v2313_v47 = vmul.f32 %v5055_v34, %v2304_v58  ;;  %v2268_v36 = vpop.f32.mrb[1].mxu1  ;;  %v5571_v34 = vld [vmem:[#allocation10 + $0x8] sm:$0xff]  }
 0x65c   : > { %v2311_v59 = vmul.f32 %v2294_v24, %v2268_v36  ;;  %v5056_v37 = vpop.f32.mrb[2].mxu1 }
 0x65d   : > { %v2317_v60 = vadd.f32 %v5666_v38, %v2313_v47  ;;  %v2314_v43 = vmul.f32 %v5056_v37, %v2309_v35  ;;  %v2271_v12 = vpop.f32.mrb[3].mxu1  ;;  %v863_v47 = vld [vmem:[%s6569_s23] sm:$0xff]  ;;  %v866_v37 = vld [vmem:[%s6569_s23 + $0x18] sm:$0xff]  ;;  %v864_v38 = vld [vmem:[%s6569_s23 + $0x8] sm:$0xff] }
 0x65e   : > { %v2315_v63 = vadd.f32 %v5667_v44, %v2311_v59  ;;  %v2312_v41 = vmul.f32 %v2299_v32, %v2271_v12  ;;  %v865_v12 = vld [vmem:[%s6569_s23 + $0x10] sm:$0xff] }
 0x65f   : > { %v2318_v2 = vadd.f32 %v5668_v49, %v2314_v43  ;;  %v2345_v50 = vadd.f32 %v2336_v19, %v2317_v60 }
 0x660   : > { %v2316_v52 = vadd.f32 %v5669_v54, %v2312_v41  ;;  %v2343_v0 = vadd.f32 %v2326_v51, %v2315_v63 }
 0x661   : > { %v2346_v20 = vadd.f32 %v2341_v23, %v2318_v2 }
 0x662   : > { %v2344_v40 = vadd.f32 %v2331_v9, %v2316_v52 }
 0x663   : > { %v2348_v3 = vpack.c.bf16 %v2346_v20, %v2345_v50 }
 0x664   : > { %v2347_v1 = vpack.c.bf16 %v2344_v40, %v2343_v0 }
 0x666   : > { %5057 = vmatprep.subr.bf16.mxu0 %v2347_v1 }
 0x667   : > { %5058 = vmatpush3.bf16.msra.mxu0 %v2347_v1  ;;  %v5572_v1 = vld [vmem:[#allocation14 + $0x100] sm:$0xff]  }
 0x668   : > { %5059 = vmatprep.subr.bf16.mxu0 %v2348_v3 }
 0x66b   : > { %5060 = vmatpush3.bf16.msra.mxu0 %v2348_v3 }
 0x66c   : > { %5073 = vmatprep.subr.bf16.mxu0 %v6071_v6 }
 0x66e   : > { %5062 = vmatmul.mubr.msk.bf16.vlgmr.msra.gmra.mrb[16].mxu0 %vm1009_vm2, %v5565_v56  ;;  %v5573_v56 = vld [vmem:[#allocation14 + $0x108] sm:$0xff]  }
 0x66f   : > { %5077 = vmatprep.mubr.msk.bf16.mxu0 %vm6077_vm4, %v6071_v6  ;;  %5074 = vmatpush3.bf16.msra.mxu0 %v5568_v53 }
 0x670   : > { %5075 = vmatprep.subr.bf16.mxu0 %v6071_v6 }
 0x673   : > { %5076 = vmatpush3.bf16.msra.mxu0 %v5569_v21 }
 0x741   : > { %v5063_v10 = vpop.f32.mrb[16].mxu0 }
 0x742   : > { %v2399_v7 = vpop.f32.mrb[17].mxu0 }
 0x743   : > { %v5064_v8 = vpop.f32.mrb[18].mxu0 }
 0x744   : > { %v5514_v11 = vpack.i.bf16 %v5064_v8, %v5063_v10  ;;  %v2402_v13 = vpop.f32.mrb[19].mxu0  ;;  %v5576_v10 = vld [vmem:[#allocation14 + $0x120] sm:$0xff]   ;;  %v5578_v8 = vld [vmem:[#allocation14 + $0x130] sm:$0xff]  }
 0x746   : > { %5515 = vrot.lane.b32.xlu1 %v5514_v11, %s6070_s26  ;;  %v5579_v11 = vld [vmem:[#allocation14 + $0x138] sm:$0xff]  }
 0x7b8   : > { %v5516_v14 = vpop.permute.xlu1 %5515 }
 0x7b9   : > { %v5518_v18 = vunpack.i.h.bf16 %v5516_v14  ;;  %v5517_v57 = vunpack.i.l.bf16 %v5516_v14 }
 0x7bb   : > { %v2423_v16 = vsel %vm2422_vm5, %v2399_v7, %v5517_v57  ;;  %v2424_v5 = vsel %vm2422_vm5, %v2402_v13, %v5518_v18  ;;  %v5577_v7 = vld [vmem:[#allocation14 + $0x128] sm:$0xff]   ;;  %v5580_v57 = vld [vmem:[#allocation14 + $0xc0] sm:$0xff]  }
 0x7bc   : > { %v2425_v17 = vpack.c.bf16 %v2424_v5, %v2423_v16 }
 0x7be   : > { %5070 = vmatmul.mubr.msk.bf16.vlgmr.msra.gmra.mrb[4].mxu1 %vm1009_vm2, %v2425_v17 }
 0x7bf   : > { %5085 = vmatprep.mubr.msk.bf16.mxu1 %vm1009_vm2, %v5570_v62 }
 0x891   : > { %v2475_v29 = vpop.f32.mrb[4].mxu1 }
 0x892   : > { %v5071_v46 = vpop.f32.mrb[5].mxu1  ;;  %v2482_v33 = vmul.f32 %v2475_v29, %v867_v22 }
 0x893   : > { %v2478_v27 = vpop.f32.mrb[6].mxu1 }
 0x894   : > { %v2483_v26 = vmul.f32 %v2478_v27, %v868_v61  ;;  %v5072_v28 = vpop.f32.mrb[7].mxu1 }
 0x896   : > { %v2484_v45 = vpack.c.bf16 %v2483_v26, %v2482_v33 }
 0x898   : > { %5078 = vmatmul.mubr.msk.bf16.vlgmr.msra.gmra.mrb[20].mxu0 %vm1009_vm2, %v2484_v45 }
 0x899   : > { %5093 = vmatprep.mubr.msk.bf16.mxu0 %vm1009_vm2, %v5572_v1  ;;  %v4739_v1 = vld [vmem:[%s6592_s5 + $0xf0] sm:$0xff] }
 0x96b   : > { %v2534_v30 = vpop.f32.mrb[20].mxu0 }
 0x96c   : > { %v5079_v39 = vpop.f32.mrb[21].mxu0 }
 0x96d   : > { %v2537_v55 = vpop.f32.mrb[22].mxu0  ;;  %v4725_v39 = vld [vmem:[%s6592_s5 + $0x80] sm:$0xff] }
 0x96e   : > { %v5519_v48 = vpack.i.bf16 %v2537_v55, %v2534_v30  ;;  %v2549_v24 = vpack.c.bf16 %v2537_v55, %v2534_v30  ;;  %v5080_v32 = vpop.f32.mrb[23].mxu0 }
 0x96f   : > { %v4727_v32 = vld [vmem:[%s6592_s5 + $0x90] sm:$0xff] }
 0x970   : > { %5520 = vrot.lane.b32.xlu0 %v5519_v48, %s6078_s16  ;;  %5081 = vmatprep.subr.bf16.mxu1 %v2549_v24  ;;  %v4741_v48 = vld [vmem:[%s6599_s30 + $0x80] sm:$0xff] }
 0x971   : > { %5082 = vmatpush3.bf16.msra.mxu1 %v2549_v24  ;;  %v4726_v24 = vld [vmem:[%s6592_s5 + $0x88] sm:$0xff] }
 0x9e2   : > { %v5521_v58 = vpop.permute.xlu0 %5520 }
 0x9e3   : > { %v5523_v35 = vunpack.i.h.bf16 %v5521_v58  ;;  %v5522_v51 = vunpack.i.l.bf16 %v5521_v58  ;;  %v4742_v58 = vld [vmem:[%s6599_s30 + $0x88] sm:$0xff] }
 0x9e5   : > { %v2550_v9 = vpack.c.bf16 %v5523_v35, %v5522_v51  ;;  %v4743_v35 = vld [vmem:[%s6599_s30 + $0x90] sm:$0xff]  ;;  %v4728_v51 = vld [vmem:[%s6592_s5 + $0x98] sm:$0xff] }
 0x9e7   : > { %5083 = vmatprep.subr.bf16.mxu1 %v2550_v9 }
 0x9e8   : > { %5084 = vmatpush3.bf16.msra.mxu1 %v2550_v9  ;;  %v4729_v9 = vld [vmem:[%s6592_s5 + $0xa0] sm:$0xff] }
 0x9eb   : > { %5086 = vmatmul.mubr.msk.bf16.vlgmr.msra.gmra.mrb[8].mxu1 %vm1009_vm2, %v5571_v34  ;;  %v4744_v34 = vld [vmem:[%s6599_s30 + $0x98] sm:$0xff] }
 0xabe   : > { %v5087_v36 = vpop.f32.mrb[8].mxu1 }
 0xabf   : > { %v2601_v59 = vpop.f32.mrb[9].mxu1  ;;  %v7118_v49 = vadd.f32 %v5087_v36, %v865_v12  ;;  %v4730_v36 = vld [vmem:[%s6592_s5 + $0xa8] sm:$0xff]  ;;  %v4733_v12 = vld [vmem:[%s6592_s5 + $0xc0] sm:$0xff] }
 0xac0   : > { %v7109_v60 = vadd.f32 %v2601_v59, %v863_v47  ;;  %v5088_v43 = vpop.f32.mrb[10].mxu1  ;;  %v4745_v47 = vld [vmem:[%s6599_s30 + $0xa0] sm:$0xff]  ;;  %v4731_v59 = vld [vmem:[%s6592_s5 + $0xb0] sm:$0xff] }
 0xac1   : > { %v2604_v44 = vpop.f32.mrb[11].mxu1  ;;  %v7112_v63 = vadd.f32 %v5088_v43, %v866_v37  ;;  %v4746_v37 = vld [vmem:[%s6599_s30 + $0xa8] sm:$0xff]  ;;  %v4732_v43 = vld [vmem:[%s6592_s5 + $0xb8] sm:$0xff] }
 0xac2   : > { %v7114_v41 = vadd.f32 %v2604_v44, %v864_v38  ;;  %2620 = vrot.lane.b32.xlu1 %v7109_v60, %s6070_s26  ;;  %v4747_v38 = vld [vmem:[%s6599_s30 + $0xb0] sm:$0xff]  ;;  %v4748_v44 = vld [vmem:[%s6599_s30 + $0xb8] sm:$0xff] }
 0xac3   : > { %v2651_v19 = vpack.c.bf16 %v7112_v63, %v7118_v49 }
 0xac4   : > { %2623 = vrot.lane.b32.xlu0 %v7114_v41, %s6070_s26  ;;  %v2650_v2 = vpack.c.bf16 %v7114_v41, %v7109_v60 }
 0xac6   : > { %2626 = vrot.lane.b32.xlu1 %v7118_v49, %s6070_s26  ;;  %5089 = vmatprep.subr.bf16.mxu0 %v2650_v2 }
 0xac7   : > { %5090 = vmatpush3.bf16.msra.mxu0 %v2650_v2  ;;  %v4749_v2 = vld [vmem:[%s6599_s30 + $0xc0] sm:$0xff] }
 0xac8   : > { %2629 = vrot.lane.b32.xlu0 %v7112_v63, %s6070_s26  ;;  %5091 = vmatprep.subr.bf16.mxu0 %v2651_v19 }
 0xacb   : > { %5092 = vmatpush3.bf16.msra.mxu0 %v2651_v19  ;;  %v4734_v19 = vld [vmem:[%s6592_s5 + $0xc8] sm:$0xff] }
 0xace   : > { %5094 = vmatmul.mubr.msk.bf16.vlgmr.msra.gmra.mrb[24].mxu0 %vm1009_vm2, %v5573_v56  ;;  %v4754_v56 = vld [vmem:[%s6599_s30 + $0xe8] sm:$0xff] }
 0xacf   : > { %5097 = vmatprep.mubr.msk.bf16.mxu0 %vm1009_vm2, %v5574_v4  ;;  %v4755_v4 = vld [vmem:[%s6599_s30 + $0xf0] sm:$0xff] }
 0xad6   : > { %5098 = vmatmul.mubr.msk.bf16.gmra.mrb[28].mxu0 %vm1009_vm2, %v5575_v15  ;;  %v4740_v15 = vld [vmem:[%s6592_s5 + $0xf8] sm:$0xff] }
 0xad7   : > { %5101 = vmatprep.mubr.msk.bf16.mxu0 %vm1009_vm2, %v5576_v10  ;;  %v4756_v10 = vld [vmem:[%s6599_s30 + $0xf8] sm:$0xff] }
 0xade   : > { %5102 = vmatmul.mubr.msk.bf16.gmra.mrb[32].mxu0 %vm1009_vm2, %v5577_v7 }
 0xadf   : > { %5105 = vmatprep.mubr.msk.bf16.mxu0 %vm1009_vm2, %v5578_v8 }
 0xae6   : > { %5106 = vmatmul.mubr.msk.bf16.gmra.mrb[36].mxu0 %vm1009_vm2, %v5579_v11  ;;  %v5581_v11 = vld [vmem:[#allocation14 + $0xc8] sm:$0xff]  }
 0xae7   : > { %5113 = vmatprep.mubr.msk.bf16.mxu0 %vm1009_vm2, %v5580_v57  ;;  %v5583_v57 = vld [vmem:[#allocation14 + $0xd8] sm:$0xff]  }
 0xb34   : > { %v2621_v23 = vpop.permute.xlu1 %2620 }
 0xb35   : > { %v2622_v54 = vsel %vm889_vm1, %v2621_v23, %v7109_v60  ;;  %v4735_v23 = vld [vmem:[%s6592_s5 + $0xd0] sm:$0xff] }
 0xb36   : > { %v2624_v52 = vpop.permute.xlu0 %2623  ;;  %2632 = vrot.lane.b32.xlu1 %v2622_v54, %s6070_s26  ;;  %v4750_v54 = vld [vmem:[%s6599_s30 + $0xc8] sm:$0xff] }
 0xb37   : > { %v2625_v50 = vsel %vm889_vm1, %v2624_v52, %v7114_v41  ;;  %v4751_v52 = vld [vmem:[%s6599_s30 + $0xd0] sm:$0xff] }
 0xb38   : > { %2634 = vrot.lane.b32.xlu0 %v2625_v50, %s6070_s26  ;;  %v2627_v20 = vpop.permute.xlu1 %2626  ;;  %v4736_v50 = vld [vmem:[%s6592_s5 + $0xd8] sm:$0xff] }
 0xb39   : > { %v2628_v0 = vsel %vm889_vm1, %v2627_v20, %v7118_v49  ;;  %v4737_v20 = vld [vmem:[%s6592_s5 + $0xe0] sm:$0xff] }
 0xb3a   : > { %v2630_v40 = vpop.permute.xlu0 %2629  ;;  %2636 = vrot.lane.b32.xlu1 %v2628_v0, %s6070_s26  ;;  %v4752_v0 = vld [vmem:[%s6599_s30 + $0xd8] sm:$0xff] }
 0xb3b   : > { %v2631_v3 = vsel %vm889_vm1, %v2630_v40, %v7112_v63  ;;  %v4753_v40 = vld [vmem:[%s6599_s30 + $0xe0] sm:$0xff]  ;;  %s7616_s30 = scalar_lea.hbm %s7741_s18, %s4788_s3 }
 0xb3c   : > { %2638 = vrot.lane.b32.xlu0 %v2631_v3, %s6070_s26  ;;  %v4738_v3 = vld [vmem:[%s6592_s5 + $0xe8] sm:$0xff]  ;;  %s7740_s5 = sld [smem:[#allocation51_spill]] }
 0xb42   : > { %p7742_p7 = scmp.ne.s32.totalorder %s7740_s5, 0 }
 0xba8   : > { %v2633_v13 = vpop.permute.xlu1 %2632 }
 0xba9   : > { %v2640_v14 = vsel %vm889_vm1, %v2633_v13, %v7109_v60 }
 0xbaa   : > { %v2635_v18 = vpop.permute.xlu0 %2634  ;;  %v2644_v5 = vmul.f32 %v2640_v14, %v6638_v25  ;;  %v2652_v27 = vmul.f32 %v2640_v14, %v6653_v42  ;;  %v5582_v14 = vld [vmem:[#allocation14 + $0xd0] sm:$0xff]  }
 0xbab   : > { %v2641_v16 = vsel %vm889_vm1, %v2635_v18, %v7114_v41 }
 0xbac   : > { %v2645_v17 = vmul.f32 %v2641_v16, %v6638_v25  ;;  %v2637_v53 = vpop.permute.xlu1 %2636  ;;  %v2653_v29 = vmul.f32 %v2641_v16, %v6653_v42  ;;  %v5584_v16 = vld [vmem:[#allocation14 + $0xe0] sm:$0xff]  }
 0xbad   : > { %v2642_v21 = vsel %vm889_vm1, %v2637_v53, %v7118_v49  ;;  %v5587_v53 = vld [vmem:[#allocation14 + $0xf8] sm:$0xff]  }
 0xbae   : > { %v2648_v22 = vpack.c.bf16 %v2645_v17, %v2644_v5  ;;  %v2639_v61 = vpop.permute.xlu0 %2638  ;;  %v2646_v33 = vmul.f32 %v2642_v21, %v6638_v25  ;;  %v2656_v28 = vpack.c.bf16 %v2653_v29, %v2652_v27  ;;  %v2654_v30 = vmul.f32 %v2642_v21, %v6653_v42  ;;  %v5585_v5 = vld [vmem:[#allocation14 + $0xe8] sm:$0xff]   ;;  %v5586_v17 = vld [vmem:[#allocation14 + $0xf0] sm:$0xff]   ;;  %v5588_v21 = vld [vmem:[#allocation14 + $0x140] sm:$0xff]  }
 0xbaf   : > { %v2643_v46 = vsel %vm889_vm1, %v2639_v61, %v7112_v63  ;;  %v5590_v29 = vld [vmem:[#allocation14 + $0x150] sm:$0xff]   ;;  %v5591_v61 = vld [vmem:[#allocation14 + $0x158] sm:$0xff]   ;;  %v5593_v27 = vld [vmem:[#allocation14 + $0x168] sm:$0xff]  }
 0xbb0   : > { %v2647_v26 = vmul.f32 %v2643_v46, %v6638_v25  ;;  %2895 = vrot.lane.b32.xlu1 %v2648_v22, %s6074_s17  ;;  %v2655_v62 = vmul.f32 %v2643_v46, %v6653_v42  ;;  %v5589_v22 = vld [vmem:[#allocation14 + $0x148] sm:$0xff]   ;;  %v5592_v46 = vld [vmem:[#allocation14 + $0x160] sm:$0xff]  }
 0xbb2   : > { %v2649_v45 = vpack.c.bf16 %v2647_v26, %v2646_v33  ;;  %v2657_v55 = vpack.c.bf16 %v2655_v62, %v2654_v30  ;;  %v5594_v33 = vld [vmem:[#allocation14 + $0x170] sm:$0xff]   ;;  %v5595_v26 = vld [vmem:[#allocation14 + $0x178] sm:$0xff]  }
 0xbb4   : > { %3081 = vrot.lane.b32.xlu1 %v2656_v28, %s6075_s21  ;;  %2897 = vrot.lane.b32.xlu0 %v2649_v45, %s6074_s17 }
 0xbb8   : > { %3243 = vperm.xlu1 %5513, %v4725_v39   ;;  %3083 = vrot.lane.b32.xlu0 %v2657_v55, %s6075_s21 }
 0xbbc   : > { %3356 = vperm.xlu1 %5513, %v4741_v48   ;;  %3248 = vperm.xlu0 %5512, %v4726_v24  }
 0xbc0   : > { %3253 = vperm.xlu1 %5513, %v4727_v32   ;;  %3361 = vperm.xlu0 %5512, %v4742_v58  }
 0xbc4   : > { %3366 = vperm.xlu1 %5513, %v4743_v35   ;;  %3258 = vperm.xlu0 %5512, %v4728_v51  }
 0xbc8   : > { %3263 = vperm.xlu1 %5513, %v4729_v9   ;;  %3371 = vperm.xlu0 %5512, %v4744_v34  }
 0xbcc   : > { %3376 = vperm.xlu1 %5513, %v4745_v47   ;;  %3268 = vperm.xlu0 %5512, %v4730_v36  }
 0xbd0   : > { %3273 = vperm.xlu1 %5513, %v4731_v59   ;;  %3381 = vperm.xlu0 %5512, %v4746_v37  }
 0xbd4   : > { %3386 = vperm.xlu1 %5513, %v4747_v38   ;;  %3278 = vperm.xlu0 %5512, %v4732_v43  }
 0xbd8   : > { %3283 = vperm.xlu1 %5513, %v4733_v12   ;;  %3391 = vperm.xlu0 %5512, %v4748_v44  }
 0xbdc   : > { %3396 = vperm.xlu1 %5513, %v4749_v2   ;;  %3288 = vperm.xlu0 %5512, %v4734_v19  }
 0xbe0   : > { %3293 = vperm.xlu1 %5513, %v4735_v23   ;;  %3401 = vperm.xlu0 %5512, %v4750_v54  }
 0xbe4   : > { %3406 = vperm.xlu1 %5513, %v4751_v52   ;;  %3298 = vperm.xlu0 %5512, %v4736_v50  }
 0xbe8   : > { %3303 = vperm.xlu1 %5513, %v4737_v20   ;;  %3411 = vperm.xlu0 %5512, %v4752_v0  }
 0xbec   : > { %3416 = vperm.xlu1 %5513, %v4753_v40   ;;  %3308 = vperm.xlu0 %5512, %v4738_v3  }
 0xbf0   : > { %3313 = vperm.xlu1 %5513, %v4739_v1   ;;  %3421 = vperm.xlu0 %5512, %v4754_v56  }
 0xbf4   : > { %3426 = vperm.xlu1 %5513, %v4755_v4   ;;  %3318 = vperm.xlu0 %5512, %v4740_v15  }
 0xbf8   : > { %3431 = vperm.xlu0 %5512, %v4756_v10  }
 0xc22   : > { %v2896_v7 = vpop.permute.xlu1 %2895 }
 0xc23   : > { %5109 = vmatprep.subr.bf16.mxu0 %v2896_v7 }
 0xc24   : > { %5110 = vmatpush3.bf16.msra.mxu0 %v2896_v7 }
 0xc26   : > { %v2898_v8 = vpop.permute.xlu0 %2897  ;;  %v3082_v13 = vpop.permute.xlu1 %3081 }
 0xc27   : > { %5111 = vmatprep.subr.bf16.mxu0 %v2898_v8 }
 0xc28   : > { %5112 = vmatpush3.bf16.msra.mxu0 %v2898_v8 }
 0xc29   : > { %5129 = vmatprep.subr.bf16.mxu0 %v3082_v13 }
 0xc2a   : > { %v3084_v18 = vpop.permute.xlu0 %3083 }
 0xc2b   : > { %5114 = vmatmul.mubr.msk.bf16.vlgmr.msra.gmra.mrb[24].mxu0 %vm1009_vm2, %v5581_v11 }
 0xc2c   : > { %5130 = vmatpush3.bf16.msra.mxu0 %v3082_v13  ;;  %5117 = vmatprep.mubr.msk.bf16.mxu0 %vm1009_vm2, %v5582_v14 }
 0xc2d   : > { %5131 = vmatprep.subr.bf16.mxu0 %v3084_v18 }
 0xc30   : > { %5132 = vmatpush3.bf16.msra.mxu0 %v3084_v18 }
 0xc33   : > { %5118 = vmatmul.mubr.msk.bf16.gmra.mrb[28].mxu0 %vm1009_vm2, %v5583_v57 }
 0xc34   : > { %5121 = vmatprep.mubr.msk.bf16.mxu0 %vm1009_vm2, %v5584_v16 }
 0xc37   : > { %v3244_v28 = vpop.permute.xlu1 %3243 }
 0xc3b   : > { %5122 = vmatmul.mubr.msk.bf16.gmra.mrb[32].mxu0 %vm1009_vm2, %v5585_v5  ;;  %v3249_v45 = vpop.permute.xlu0 %3248  ;;  %v3357_v62 = vpop.permute.xlu1 %3356 }
 0xc3c   : > { %5125 = vmatprep.mubr.msk.bf16.mxu0 %vm1009_vm2, %v5586_v17 }
 0xc3f   : > { %v3362_v30 = vpop.permute.xlu0 %3361  ;;  %v3254_v39 = vpop.permute.xlu1 %3253 }
 0xc43   : > { %5126 = vmatmul.mubr.msk.bf16.gmra.mrb[36].mxu0 %vm1009_vm2, %v5587_v53  ;;  %v3259_v55 = vpop.permute.xlu0 %3258  ;;  %v3367_v48 = vpop.permute.xlu1 %3366 }
 0xc44   : > { %5133 = vmatprep.mubr.msk.bf16.mxu0 %vm1009_vm2, %v5588_v21 }
 0xc47   : > { %v3372_v24 = vpop.permute.xlu0 %3371  ;;  %v3264_v32 = vpop.permute.xlu1 %3263 }
 0xc4b   : > { %5134 = vmatmul.mubr.msk.bf16.vlgmr.msra.gmra.mrb[24].mxu0 %vm1009_vm2, %v5589_v22  ;;  %v3269_v58 = vpop.permute.xlu0 %3268  ;;  %v3377_v35 = vpop.permute.xlu1 %3376 }
 0xc4c   : > { %5137 = vmatprep.mubr.msk.bf16.mxu0 %vm1009_vm2, %v5590_v29 }
 0xc4f   : > { %v3382_v51 = vpop.permute.xlu0 %3381  ;;  %v3274_v9 = vpop.permute.xlu1 %3273 }
 0xc53   : > { %5138 = vmatmul.mubr.msk.bf16.gmra.mrb[28].mxu0 %vm1009_vm2, %v5591_v61  ;;  %v3279_v34 = vpop.permute.xlu0 %3278  ;;  %v3387_v47 = vpop.permute.xlu1 %3386 }
 0xc54   : > { %5141 = vmatprep.mubr.msk.bf16.mxu0 %vm1009_vm2, %v5592_v46 }
 0xc57   : > { %v3392_v36 = vpop.permute.xlu0 %3391  ;;  %v7220_v59 = vpop.permute.xlu1 %3283 }
 0xc5b   : > { %5142 = vmatmul.mubr.msk.bf16.gmra.mrb[32].mxu0 %vm1009_vm2, %v5593_v27  ;;  %v7222_v37 = vpop.permute.xlu0 %3288 }
 0xc5c   : > { %5145 = vmatprep.mubr.msk.bf16.mxu0 %vm1009_vm2, %v5594_v33 }
 0xc5f   : > { %v7226_v38 = vpop.permute.xlu0 %3401 }
 0xc63   : > { %5146 = vmatmul.mubr.msk.bf16.gmra.mrb[36].mxu0 %vm1009_vm2, %v5595_v26  ;;  %v7230_v12 = vpop.permute.xlu0 %3298 }
 0xc64   : > { %5213 = vmatprep.mubr.msk.bf16.mxu0 %vm1009_vm2, %v7082_v31  ;;  %v7224_v31 = vpop.permute.xlu1 %3396 }
 0xc67   : > { %v7236_v40 = vpop.permute.xlu0 %3411 }
 0xc68   : > { %v7228_v43 = vpop.permute.xlu1 %3293 }
 0xc6b   : > { %v7257_v53 = vpop.permute.xlu0 %3308 }
 0xc6c   : > { %v7232_v23 = vpop.permute.xlu1 %3406 }
 0xc70   : > { %v7251_v11 = vpop.permute.xlu1 %3303 }
 0xd1e   : > { %v5135_v44 = vpop.f32.mrb[24].mxu0 }
 0xd1f   : > { %v3323_v2 = vmul.f32 %v5135_v44, %v3254_v39  ;;  %v3145_v19 = vpop.f32.mrb[25].mxu0 }
 0xd20   : > { %v3321_v54 = vmul.f32 %v3244_v28, %v3145_v19  ;;  %v5136_v52 = vpop.f32.mrb[26].mxu0 }
 0xd21   : > { %v7234_v50 = vadd.f32 %v3367_v48, %v3323_v2  ;;  %v3324_v20 = vmul.f32 %v5136_v52, %v3259_v55  ;;  %v3148_v0 = vpop.f32.mrb[27].mxu0 }
 0xd22   : > { %v7238_v3 = vadd.f32 %v3357_v62, %v3321_v54  ;;  %v3322_v1 = vmul.f32 %v3249_v45, %v3148_v0  ;;  %v7281_v54 = vpop.permute.xlu0 %3421 }
 0xd23   : > { %v3452_v56 = vmul.f32 %v7234_v50, %v7234_v50  ;;  %v7242_v4 = vadd.f32 %v3372_v24, %v3324_v20 }
 0xd24   : > { %v3450_v15 = vmul.f32 %v7238_v3, %v7238_v3  ;;  %v7246_v10 = vadd.f32 %v3362_v30, %v3322_v1 }
 0xd25   : > { %v3468_v7 = vmul.f32 %v3452_v56, %v7234_v50  ;;  %v3453_v8 = vmul.f32 %v7242_v4, %v7242_v4 }
 0xd26   : > { %v3466_v13 = vmul.f32 %v3450_v15, %v7238_v3  ;;  %v3451_v14 = vmul.f32 %v7246_v10, %v7246_v10  ;;  %v5139_v18 = vpop.f32.mrb[28].mxu0 }
 0xd27   : > { %v3484_v57 = vmul.f32 0.044715, %v3468_v7  ;;  %v3469_v16 = vmul.f32 %v3453_v8, %v7242_v4  ;;  %v3327_v5 = vmul.f32 %v5139_v18, %v3274_v9  ;;  %v3161_v17 = vpop.f32.mrb[29].mxu0  ;;  %v7271_v9 = vpop.permute.xlu1 %3416 }
 0xd28   : > { %v3482_v21 = vmul.f32 0.044715, %v3466_v13  ;;  %v3467_v22 = vmul.f32 %v3451_v14, %v7246_v10  ;;  %v3325_v29 = vmul.f32 %v3264_v32, %v3161_v17  ;;  %v5140_v61 = vpop.f32.mrb[30].mxu0 }
 0xd29   : > { %v3500_v46 = vadd.f32 %v3484_v57, %v7234_v50  ;;  %v3485_v27 = vmul.f32 0.044715, %v3469_v16  ;;  %v7261_v33 = vadd.f32 %v3387_v47, %v3327_v5  ;;  %v3328_v26 = vmul.f32 %v5140_v61, %v3279_v34  ;;  %v3164_v28 = vpop.f32.mrb[31].mxu0 }
 0xd2a   : > { %v3498_v45 = vadd.f32 %v3482_v21, %v7238_v3  ;;  %v3483_v62 = vmul.f32 0.044715, %v3467_v22  ;;  %v7264_v30 = vadd.f32 %v3377_v35, %v3325_v29  ;;  %v3326_v39 = vmul.f32 %v3269_v58, %v3164_v28 }
 0xd2b   : > { %v3516_v55 = vmul.f32 0.7978846, %v3500_v46  ;;  %v3501_v48 = vadd.f32 %v3485_v27, %v7242_v4  ;;  %v3456_v24 = vmul.f32 %v7261_v33, %v7261_v33  ;;  %v7269_v32 = vadd.f32 %v3392_v36, %v3328_v26  ;;  %v3314_v21 = vpop.permute.xlu1 %3313 }
 0xd2c   : > { %v3514_v47 = vmul.f32 0.7978846, %v3498_v45  ;;  %v3499_v34 = vadd.f32 %v3483_v62, %v7246_v10  ;;  %v3454_v44 = vmul.f32 %v7264_v30, %v7264_v30  ;;  %v7276_v2 = vadd.f32 %v3382_v51, %v3326_v39 }
 0xd2d   : > { %5634 = vtanh.f32 %v3516_v55  ;;  %v3517_v58 = vmul.f32 0.7978846, %v3501_v48  ;;  %v3472_v35 = vmul.f32 %v3456_v24, %v7261_v33  ;;  %v3457_v19 = vmul.f32 %v7269_v32, %v7269_v32 }
 0xd2e   : > { %5636 = vtanh.f32 %v3514_v47  ;;  %v3515_v36 = vmul.f32 0.7978846, %v3499_v34  ;;  %v3470_v52 = vmul.f32 %v3454_v44, %v7264_v30  ;;  %v3455_v20 = vmul.f32 %v7276_v2, %v7276_v2  ;;  %v5143_v0 = vpop.f32.mrb[32].mxu0 }
 0xd2f   : > { %5638 = vtanh.f32 %v3517_v58  ;;  %v3488_v51 = vmul.f32 0.044715, %v3472_v35  ;;  %v3473_v1 = vmul.f32 %v3457_v19, %v7269_v32  ;;  %v3331_v56 = vmul.f32 %v5143_v0, %v7228_v43  ;;  %v3177_v15 = vpop.f32.mrb[33].mxu0  ;;  %v3427_v19 = vpop.permute.xlu1 %3426 }
 0xd30   : > { %5640 = vtanh.f32 %v3515_v36  ;;  %v3486_v7 = vmul.f32 0.044715, %v3470_v52  ;;  %v3471_v8 = vmul.f32 %v3455_v20, %v7276_v2  ;;  %v3329_v13 = vmul.f32 %v7220_v59, %v3177_v15  ;;  %v5144_v14 = vpop.f32.mrb[34].mxu0 }
 0xd31   : > { %v3504_v18 = vadd.f32 %v3488_v51, %v7261_v33  ;;  %v3489_v57 = vmul.f32 0.044715, %v3473_v1  ;;  %v7292_v16 = vadd.f32 %v7232_v23, %v3331_v56  ;;  %v3332_v5 = vmul.f32 %v5144_v14, %v7230_v12  ;;  %v3180_v17 = vpop.f32.mrb[35].mxu0  ;;  %v3319_v12 = vpop.permute.xlu0 %3318 }
 0xd32   : > { %v3502_v43 = vadd.f32 %v3486_v7, %v7264_v30  ;;  %v3487_v22 = vmul.f32 0.044715, %v3471_v8  ;;  %v7297_v29 = vadd.f32 %v7224_v31, %v3329_v13  ;;  %v3330_v61 = vmul.f32 %v7222_v37, %v3180_v17 }
 0xd33   : > { %v3520_v59 = vmul.f32 0.7978846, %v3504_v18  ;;  %v3505_v46 = vadd.f32 %v3489_v57, %v7269_v32  ;;  %v3460_v27 = vmul.f32 %v7292_v16, %v7292_v16  ;;  %v7304_v23 = vadd.f32 %v7236_v40, %v3332_v5 }
 0xd34   : > { %v3518_v26 = vmul.f32 0.7978846, %v3502_v43  ;;  %v3503_v28 = vadd.f32 %v3487_v22, %v7276_v2  ;;  %v3458_v45 = vmul.f32 %v7297_v29, %v7297_v29  ;;  %v7310_v31 = vadd.f32 %v7226_v38, %v3330_v61 }
 0xd35   : > { %5642 = vtanh.f32 %v3520_v59  ;;  %v3521_v37 = vmul.f32 0.7978846, %v3505_v46  ;;  %v3476_v62 = vmul.f32 %v3460_v27, %v7292_v16  ;;  %v3461_v39 = vmul.f32 %v7304_v23, %v7304_v23  ;;  %v3432_v14 = vpop.permute.xlu0 %3431 }
 0xd36   : > { %5644 = vtanh.f32 %v3518_v26  ;;  %v3519_v40 = vmul.f32 0.7978846, %v3503_v28  ;;  %v3474_v55 = vmul.f32 %v3458_v45, %v7297_v29  ;;  %v3459_v48 = vmul.f32 %v7310_v31, %v7310_v31  ;;  %v5147_v24 = vpop.f32.mrb[36].mxu0 }
 0xd37   : > { %v5635_v47 = vpop.eup %5634  ;;  %5646 = vtanh.f32 %v3521_v37  ;;  %v3492_v34 = vmul.f32 0.044715, %v3476_v62  ;;  %v3477_v38 = vmul.f32 %v3461_v39, %v7304_v23  ;;  %v3335_v44 = vmul.f32 %v5147_v24, %v3314_v21  ;;  %v3193_v58 = vpop.f32.mrb[37].mxu0 }
 0xd38   : > { %v5637_v35 = vpop.eup %5636  ;;  %5648 = vtanh.f32 %v3519_v40  ;;  %v3490_v36 = vmul.f32 0.044715, %v3474_v55  ;;  %v3475_v52 = vmul.f32 %v3459_v48, %v7310_v31  ;;  %v3333_v20 = vmul.f32 %v7251_v11, %v3193_v58  ;;  %v5148_v0 = vpop.f32.mrb[38].mxu0 }
 0xd39   : > { %v5639_v51 = vpop.eup %5638  ;;  %v3508_v1 = vadd.f32 %v3492_v34, %v7292_v16  ;;  %v3493_v56 = vmul.f32 0.044715, %v3477_v38  ;;  %v7322_v15 = vadd.f32 %v3427_v19, %v3335_v44  ;;  %v3336_v7 = vmul.f32 %v5148_v0, %v3319_v12  ;;  %v3196_v8 = vpop.f32.mrb[39].mxu0 }
 0xd3a   : > { %v5641_v13 = vpop.eup %5640  ;;  %v3506_v18 = vadd.f32 %v3490_v36, %v7297_v29  ;;  %v3491_v57 = vmul.f32 0.044715, %v3475_v52  ;;  %v7326_v5 = vadd.f32 %v7271_v9, %v3333_v20  ;;  %v3334_v17 = vmul.f32 %v7257_v53, %v3196_v8 }
 0xd3b   : > { %v3524_v11 = vmul.f32 0.7978846, %v3508_v1  ;;  %v3509_v21 = vadd.f32 %v3493_v56, %v7304_v23  ;;  %v3464_v43 = vmul.f32 %v7322_v15, %v7322_v15  ;;  %v7332_v22 = vadd.f32 %v3432_v14, %v3336_v7 }
 0xd3c   : > { %v3522_v61 = vmul.f32 0.7978846, %v3506_v18  ;;  %v3507_v59 = vadd.f32 %v3491_v57, %v7310_v31  ;;  %v3462_v46 = vmul.f32 %v7326_v5, %v7326_v5  ;;  %v7338_v27 = vadd.f32 %v7281_v54, %v3334_v17 }
 0xd3d   : > { %5650 = vtanh.f32 %v3524_v11  ;;  %v3525_v9 = vmul.f32 0.7978846, %v3509_v21  ;;  %v3480_v53 = vmul.f32 %v3464_v43, %v7322_v15  ;;  %v3465_v12 = vmul.f32 %v7332_v22, %v7332_v22 }
 0xd3e   : > { %5652 = vtanh.f32 %v3522_v61  ;;  %v3523_v26 = vmul.f32 0.7978846, %v3507_v59  ;;  %v3478_v28 = vmul.f32 %v3462_v46, %v7326_v5  ;;  %v3463_v45 = vmul.f32 %v7338_v27, %v7338_v27 }
 0xd3f   : > { %v5643_v37 = vpop.eup %5642  ;;  %5654 = vtanh.f32 %v3525_v9  ;;  %v3496_v62 = vmul.f32 0.044715, %v3480_v53  ;;  %v3481_v54 = vmul.f32 %v3465_v12, %v7332_v22  ;;  %v3546_v39 = vadd.f32 1.0, %v5637_v35 }
 0xd40   : > { %v5645_v40 = vpop.eup %5644  ;;  %5656 = vtanh.f32 %v3523_v26  ;;  %v3494_v55 = vmul.f32 0.044715, %v3478_v28  ;;  %v3479_v48 = vmul.f32 %v3463_v45, %v7338_v27  ;;  %v3547_v24 = vadd.f32 1.0, %v5641_v13 }
 0xd41   : > { %v5647_v34 = vpop.eup %5646  ;;  %v3512_v38 = vadd.f32 %v3496_v62, %v7322_v15  ;;  %v3497_v44 = vmul.f32 0.044715, %v3481_v54  ;;  %v3562_v58 = vmul.f32 0.5, %v3546_v39  ;;  %v3548_v19 = vadd.f32 1.0, %v5635_v47 }
 0xd42   : > { %v5649_v36 = vpop.eup %5648  ;;  %v3510_v52 = vadd.f32 %v3494_v55, %v7326_v5  ;;  %v3495_v20 = vmul.f32 0.044715, %v3479_v48  ;;  %v3563_v0 = vmul.f32 0.5, %v3547_v24  ;;  %v3549_v1 = vadd.f32 1.0, %v5639_v51 }
 0xd43   : > { %v3513_v35 = vadd.f32 %v3497_v44, %v7332_v22  ;;  %v7352_v56 = vmul.f32 %v3562_v58, %v7238_v3  ;;  %v3564_v7 = vmul.f32 0.5, %v3548_v19  ;;  %v3528_v47 = vmul.f32 0.7978846, %v3512_v38 }
 0xd44   : > { %v3526_v8 = vmul.f32 0.7978846, %v3510_v52  ;;  %v3511_v13 = vadd.f32 %v3495_v20, %v7338_v27  ;;  %v7356_v14 = vmul.f32 %v3563_v0, %v7246_v10  ;;  %v3565_v18 = vmul.f32 0.5, %v3549_v1 }
 0xd45   : > { %v3529_v57 = vmul.f32 0.7978846, %v3513_v35  ;;  %3594 = vrot.lane.b32.xlu1 %v7352_v56, %s6070_s26  ;;  %v7361_v51 = vmul.f32 %v3564_v7, %v7234_v50  ;;  %v3550_v17 = vadd.f32 1.0, %v5645_v40  ;;  %v3551_v61 = vadd.f32 1.0, %v5649_v36 }
 0xd46   : > { %5658 = vtanh.f32 %v3526_v8  ;;  %v3527_v3 = vmul.f32 0.7978846, %v3511_v13  ;;  %3597 = vrot.lane.b32.xlu0 %v7356_v14, %s6070_s26  ;;  %v3714_v11 = vpack.c.bf16 %v7356_v14, %v7352_v56  ;;  %v7368_v10 = vmul.f32 %v3565_v18, %v7242_v4 }
 0xd47   : > { %v5651_v21 = vpop.eup %5650  ;;  %5660 = vtanh.f32 %v3529_v57  ;;  %v3566_v43 = vmul.f32 0.5, %v3550_v17  ;;  %v3552_v59 = vadd.f32 1.0, %v5643_v37  ;;  %v3553_v9 = vadd.f32 1.0, %v5647_v34 }
 0xd48   : > { %v5653_v46 = vpop.eup %5652  ;;  %5662 = vtanh.f32 %v3527_v3  ;;  %5149 = vmatprep.subr.bf16.mxu1 %v3714_v11  ;;  %v3715_v50 = vpack.c.bf16 %v7368_v10, %v7361_v51  ;;  %v3567_v12 = vmul.f32 0.5, %v3551_v61  ;;  %v3556_v24 = vadd.f32 1.0, %v5651_v21 }
 0xd49   : > { %v5655_v53 = vpop.eup %5654  ;;  %5664 = vtanh.f32 %v3528_v47  ;;  %3600 = vrot.lane.b32.xlu1 %v7361_v51, %s6070_s26  ;;  %5150 = vmatpush3.bf16.msra.mxu1 %v3714_v11  ;;  %v7375_v4 = vmul.f32 %v3566_v43, %v7264_v30  ;;  %v3554_v26 = vadd.f32 1.0, %v5653_v46  ;;  %v3568_v45 = vmul.f32 0.5, %v3552_v59 }
 0xd4a   : > { %v5657_v28 = vpop.eup %5656  ;;  %3603 = vrot.lane.b32.xlu0 %v7368_v10, %s6070_s26  ;;  %5151 = vmatprep.subr.bf16.mxu1 %v3715_v50  ;;  %v3569_v37 = vmul.f32 0.5, %v3553_v9  ;;  %v7380_v62 = vmul.f32 %v3567_v12, %v7276_v2  ;;  %v3557_v55 = vadd.f32 1.0, %v5655_v53 }
 0xd4b   : > { %v3555_v54 = vadd.f32 1.0, %v5657_v28  ;;  %v3570_v40 = vmul.f32 0.5, %v3554_v26  ;;  %v7392_v2 = vmul.f32 %v3568_v45, %v7261_v33 }
 0xd4c   : > { %v7383_v39 = vmul.f32 %v3569_v37, %v7269_v32  ;;  %v3716_v30 = vpack.c.bf16 %v7380_v62, %v7375_v4  ;;  %v3573_v58 = vmul.f32 0.5, %v3557_v55 }
 0xd4d   : > { %3606 = vrot.lane.b32.xlu1 %v7375_v4, %s6070_s26  ;;  %5152 = vmatpush3.bf16.msra.mxu1 %v3715_v50  ;;  %v3571_v48 = vmul.f32 0.5, %v3555_v54  ;;  %v7400_v44 = vmul.f32 %v3570_v40, %v7297_v29 }
 0xd4e   : > { %3609 = vrot.lane.b32.xlu0 %v7380_v62, %s6070_s26  ;;  %5153 = vmatprep.subr.bf16.mxu1 %v3716_v30  ;;  %v3717_v38 = vpack.c.bf16 %v7383_v39, %v7392_v2  ;;  %v7409_v29 = vmul.f32 %v3573_v58, %v7304_v23 }
 0xd4f   : > { %v7395_v32 = vmul.f32 %v3571_v48, %v7310_v31  ;;  %v3572_v31 = vmul.f32 0.5, %v3556_v24 }
 0xd50   : > { %v5659_v34 = vpop.eup %5658 }
 0xd51   : > { %v5661_v19 = vpop.eup %5660  ;;  %3612 = vrot.lane.b32.xlu1 %v7392_v2, %s6070_s26  ;;  %5154 = vmatpush3.bf16.msra.mxu1 %v3716_v30  ;;  %v3558_v33 = vadd.f32 1.0, %v5659_v34  ;;  %v3718_v52 = vpack.c.bf16 %v7395_v32, %v7400_v44  ;;  %v7416_v8 = vmul.f32 %v3572_v31, %v7292_v16 }
 0xd52   : > { %v5663_v36 = vpop.eup %5662  ;;  %3615 = vrot.lane.b32.xlu0 %v7383_v39, %s6070_s26  ;;  %5155 = vmatprep.subr.bf16.mxu1 %v3717_v38  ;;  %v3561_v35 = vadd.f32 1.0, %v5661_v19 }
 0xd53   : > { %v5665_v20 = vpop.eup %5664  ;;  %v3559_v0 = vadd.f32 1.0, %v5663_v36  ;;  %v3574_v1 = vmul.f32 0.5, %v3558_v33  ;;  %v3719_v23 = vpack.c.bf16 %v7409_v29, %v7416_v8 }
 0xd54   : > { %v3560_v13 = vadd.f32 1.0, %v5665_v20  ;;  %v3577_v57 = vmul.f32 0.5, %v3561_v35  ;;  %v5597_v35 = vld [vmem:[#allocation16 + $0x48] sm:$0xff]  }
 0xd55   : > { %3618 = vrot.lane.b32.xlu1 %v7400_v44, %s6070_s26  ;;  %5156 = vmatpush3.bf16.msra.mxu1 %v3717_v38  ;;  %v3575_v7 = vmul.f32 0.5, %v3559_v0  ;;  %v7424_v47 = vmul.f32 %v3574_v1, %v7326_v5  ;;  %v5596_v1 = vld [vmem:[#allocation16 + $0x40] sm:$0xff]  }
 0xd56   : > { %3621 = vrot.lane.b32.xlu0 %v7395_v32, %s6070_s26  ;;  %5157 = vmatprep.subr.bf16.mxu1 %v3718_v52  ;;  %v3576_v16 = vmul.f32 0.5, %v3560_v13  ;;  %v7433_v17 = vmul.f32 %v3577_v57, %v7332_v22 }
 0xd57   : > { %v7419_v18 = vmul.f32 %v3575_v7, %v7338_v27  ;;  %5165 = vmatprep.mubr.bf16.mxu1 %v5596_v1 }
 0xd58   : > { %v7440_v5 = vmul.f32 %v3576_v16, %v7322_v15 }
 0xd59   : > { %3624 = vrot.lane.b32.xlu1 %v7416_v8, %s6070_s26  ;;  %5158 = vmatpush3.bf16.msra.mxu1 %v3718_v52  ;;  %v3720_v27 = vpack.c.bf16 %v7419_v18, %v7424_v47 }
 0xd5a   : > { %3627 = vrot.lane.b32.xlu0 %v7409_v29, %s6070_s26  ;;  %5159 = vmatprep.subr.bf16.mxu1 %v3719_v23  ;;  %v3721_v3 = vpack.c.bf16 %v7433_v17, %v7440_v5 }
 0xd5d   : > { %3630 = vrot.lane.b32.xlu1 %v7424_v47, %s6070_s26  ;;  %5160 = vmatpush3.bf16.msra.mxu1 %v3719_v23 }
 0xd5e   : > { %3633 = vrot.lane.b32.xlu0 %v7419_v18, %s6070_s26  ;;  %5161 = vmatprep.subr.bf16.mxu1 %v3720_v27 }
 0xd61   : > { %3636 = vrot.lane.b32.xlu1 %v7440_v5, %s6070_s26  ;;  %5162 = vmatpush3.bf16.msra.mxu1 %v3720_v27 }
 0xd62   : > { %3639 = vrot.lane.b32.xlu0 %v7433_v17, %s6070_s26  ;;  %5163 = vmatprep.subr.bf16.mxu1 %v3721_v3 }
 0xd65   : > { %5164 = vmatpush3.bf16.msra.mxu1 %v3721_v3 }
 0xd68   : > { %5166 = vmatmul.mubr.bf16.vlgmr.msra.gmra.mrb[12].mxu1 %v5597_v35 }
 0xdb7   : > { %v3595_v22 = vpop.permute.xlu1 %3594 }
 0xdb8   : > { %v3596_v11 = vsel %vm889_vm1, %v3595_v22, %v7352_v56  ;;  %v3598_v21 = vpop.permute.xlu0 %3597 }
 0xdb9   : > { %v3599_v15 = vsel %vm889_vm1, %v3598_v21, %v7356_v14  ;;  %3642 = vrot.lane.b32.xlu1 %v3596_v11, %s6070_s26 }
 0xdba   : > { %3644 = vrot.lane.b32.xlu0 %v3599_v15, %s6070_s26 }
 0xdbb   : > { %v3601_v43 = vpop.permute.xlu1 %3600 }
 0xdbc   : > { %v3602_v61 = vsel %vm889_vm1, %v3601_v43, %v7361_v51  ;;  %v3604_v59 = vpop.permute.xlu0 %3603 }
 0xdbd   : > { %v3605_v46 = vsel %vm889_vm1, %v3604_v59, %v7368_v10  ;;  %3646 = vrot.lane.b32.xlu1 %v3602_v61, %s6070_s26 }
 0xdbe   : > { %3648 = vrot.lane.b32.xlu0 %v3605_v46, %s6070_s26 }
 0xdbf   : > { %v3607_v50 = vpop.permute.xlu1 %3606 }
 0xdc0   : > { %v3608_v9 = vsel %vm889_vm1, %v3607_v50, %v7375_v4  ;;  %v3610_v53 = vpop.permute.xlu0 %3609 }
 0xdc1   : > { %v3611_v12 = vsel %vm889_vm1, %v3610_v53, %v7380_v62  ;;  %3650 = vrot.lane.b32.xlu1 %v3608_v9, %s6070_s26 }
 0xdc2   : > { %3652 = vrot.lane.b32.xlu0 %v3611_v12, %s6070_s26 }
 0xdc3   : > { %v3613_v26 = vpop.permute.xlu1 %3612 }
 0xdc4   : > { %v3614_v28 = vsel %vm889_vm1, %v3613_v26, %v7392_v2  ;;  %v3616_v45 = vpop.permute.xlu0 %3615 }
 0xdc5   : > { %v3617_v37 = vsel %vm889_vm1, %v3616_v45, %v7383_v39  ;;  %3654 = vrot.lane.b32.xlu1 %v3614_v28, %s6070_s26 }
 0xdc6   : > { %3656 = vrot.lane.b32.xlu0 %v3617_v37, %s6070_s26 }
 0xdc7   : > { %v3619_v54 = vpop.permute.xlu1 %3618 }
 0xdc8   : > { %v3620_v40 = vsel %vm889_vm1, %v3619_v54, %v7400_v44  ;;  %v3622_v55 = vpop.permute.xlu0 %3621 }
 0xdc9   : > { %v3623_v30 = vsel %vm889_vm1, %v3622_v55, %v7395_v32  ;;  %3658 = vrot.lane.b32.xlu1 %v3620_v40, %s6070_s26 }
 0xdca   : > { %3660 = vrot.lane.b32.xlu0 %v3623_v30, %s6070_s26 }
 0xdcb   : > { %v3625_v48 = vpop.permute.xlu1 %3624 }
 0xdcc   : > { %v3626_v24 = vsel %vm889_vm1, %v3625_v48, %v7416_v8  ;;  %v3628_v34 = vpop.permute.xlu0 %3627 }
 0xdcd   : > { %v3629_v38 = vsel %vm889_vm1, %v3628_v34, %v7409_v29  ;;  %3662 = vrot.lane.b32.xlu1 %v3626_v24, %s6070_s26 }
 0xdce   : > { %3664 = vrot.lane.b32.xlu0 %v3629_v38, %s6070_s26 }
 0xdcf   : > { %v3631_v58 = vpop.permute.xlu1 %3630 }
 0xdd0   : > { %v3632_v19 = vsel %vm889_vm1, %v3631_v58, %v7424_v47  ;;  %v3634_v33 = vpop.permute.xlu0 %3633 }
 0xdd1   : > { %3666 = vrot.lane.b32.xlu1 %v3632_v19, %s6070_s26  ;;  %v3635_v36 = vsel %vm889_vm1, %v3634_v33, %v7419_v18 }
 0xdd2   : > { %3668 = vrot.lane.b32.xlu0 %v3635_v36, %s6070_s26 }
 0xdd3   : > { %v3637_v31 = vpop.permute.xlu1 %3636 }
 0xdd4   : > { %v3638_v52 = vsel %vm889_vm1, %v3637_v31, %v7440_v5  ;;  %v3640_v20 = vpop.permute.xlu0 %3639  ;;  %v5598_v31 = vld [vmem:[#allocation16 + $0x30] sm:$0xff]  }
 0xdd5   : > { %3670 = vrot.lane.b32.xlu1 %v3638_v52, %s6070_s26  ;;  %v3641_v0 = vsel %vm889_vm1, %v3640_v20, %v7433_v17  ;;  %5185 = vmatprep.mubr.bf16.mxu1 %v5598_v31 }
 0xdd6   : > { %3672 = vrot.lane.b32.xlu0 %v3641_v0, %s6070_s26 }
 0xe2b   : > { %v3643_v7 = vpop.permute.xlu1 %3642 }
 0xe2c   : > { %v3674_v13 = vsel %vm889_vm1, %v3643_v7, %v7352_v56  ;;  %v3645_v23 = vpop.permute.xlu0 %3644 }
 0xe2d   : > { %v3675_v57 = vsel %vm889_vm1, %v3645_v23, %v7356_v14  ;;  %v3690_v16 = vmul.f32 %v3674_v13, %v6638_v25 }
 0xe2e   : > { %v3691_v27 = vmul.f32 %v3675_v57, %v6638_v25  ;;  %v3723_v0 = vmul.f32 %v3675_v57, %v6653_v42 }
 0xe2f   : > { %v3647_v3 = vpop.permute.xlu1 %3646 }
 0xe30   : > { %v3706_v22 = vpack.c.bf16 %v3691_v27, %v3690_v16  ;;  %v3676_v11 = vsel %vm889_vm1, %v3647_v3, %v7361_v51  ;;  %v3649_v21 = vpop.permute.xlu0 %3648 }
 0xe31   : > { %v3677_v15 = vsel %vm889_vm1, %v3649_v21, %v7368_v10  ;;  %v3692_v43 = vmul.f32 %v3676_v11, %v6638_v25 }
 0xe32   : > { %v3693_v56 = vmul.f32 %v3677_v15, %v6638_v25  ;;  %3837 = vrot.lane.b32.xlu1 %v3706_v22, %s6074_s17  ;;  %v3725_v3 = vmul.f32 %v3677_v15, %v6653_v42 }
 0xe33   : > { %v3651_v14 = vpop.permute.xlu1 %3650 }
 0xe34   : > { %v3707_v61 = vpack.c.bf16 %v3693_v56, %v3692_v43  ;;  %v3678_v59 = vsel %vm889_vm1, %v3651_v14, %v7375_v4  ;;  %v3653_v46 = vpop.permute.xlu0 %3652 }
 0xe35   : > { %v3679_v50 = vsel %vm889_vm1, %v3653_v46, %v7380_v62  ;;  %v3694_v51 = vmul.f32 %v3678_v59, %v6638_v25  ;;  %v3726_v21 = vmul.f32 %v3678_v59, %v6653_v42 }
 0xe36   : > { %v3695_v9 = vmul.f32 %v3679_v50, %v6638_v25  ;;  %3839 = vrot.lane.b32.xlu0 %v3707_v61, %s6074_s17  ;;  %v3727_v57 = vmul.f32 %v3679_v50, %v6653_v42 }
 0xe37   : > { %v3655_v10 = vpop.permute.xlu1 %3654 }
 0xe38   : > { %v3708_v53 = vpack.c.bf16 %v3695_v9, %v3694_v51  ;;  %v3680_v12 = vsel %vm889_vm1, %v3655_v10, %v7392_v2  ;;  %v3657_v26 = vpop.permute.xlu0 %3656 }
 0xe39   : > { %v3681_v28 = vsel %vm889_vm1, %v3657_v26, %v7383_v39  ;;  %v3696_v4 = vmul.f32 %v3680_v12, %v6638_v25  ;;  %v3728_v56 = vmul.f32 %v3680_v12, %v6653_v42  ;;  %v4763_v12 = vld [vmem:[%s6603_s14 + $0x20] sm:$0xff] }
 0xe3a   : > { %v3697_v45 = vmul.f32 %v3681_v28, %v6638_v25  ;;  %3841 = vrot.lane.b32.xlu1 %v3708_v53, %s6074_s17 }
 0xe3b   : > { %v3659_v62 = vpop.permute.xlu1 %3658 }
 0xe3c   : > { %v3709_v37 = vpack.c.bf16 %v3697_v45, %v3696_v4  ;;  %v3682_v54 = vsel %vm889_vm1, %v3659_v62, %v7400_v44  ;;  %v3661_v40 = vpop.permute.xlu0 %3660  ;;  %v4764_v4 = vld [vmem:[%s6603_s14 + $0x28] sm:$0xff]  ;;  %v4767_v45 = vld [vmem:[%s7074_s19 + $0x20] sm:$0xff]  ;;  %v4766_v62 = vld [vmem:[%s6603_s14 + $0x38] sm:$0xff] }
 0xe3d   : > { %v3683_v55 = vsel %vm889_vm1, %v3661_v40, %v7395_v32  ;;  %v3698_v2 = vmul.f32 %v3682_v54, %v6638_v25  ;;  %v3730_v15 = vmul.f32 %v3682_v54, %v6653_v42  ;;  %v4770_v54 = vld [vmem:[%s7074_s19 + $0x38] sm:$0xff] }
 0xe3e   : > { %v3699_v30 = vmul.f32 %v3683_v55, %v6638_v25  ;;  %3843 = vrot.lane.b32.xlu0 %v3709_v37, %s6074_s17  ;;  %v3731_v43 = vmul.f32 %v3683_v55, %v6653_v42  ;;  %v4768_v37 = vld [vmem:[%s7074_s19 + $0x28] sm:$0xff] }
 0xe3f   : > { %v3663_v39 = vpop.permute.xlu1 %3662 }
 0xe40   : > { %v3710_v48 = vpack.c.bf16 %v3699_v30, %v3698_v2  ;;  %v3684_v24 = vsel %vm889_vm1, %v3663_v39, %v7416_v8  ;;  %v3665_v34 = vpop.permute.xlu0 %3664  ;;  %v3742_v14 = vpack.c.bf16 %v3731_v43, %v3730_v15 }
 0xe41   : > { %v3685_v38 = vsel %vm889_vm1, %v3665_v34, %v7409_v29  ;;  %v3700_v44 = vmul.f32 %v3684_v24, %v6638_v25  ;;  %v3732_v46 = vmul.f32 %v3684_v24, %v6653_v42 }
 0xe42   : > { %v3701_v58 = vmul.f32 %v3685_v38, %v6638_v25  ;;  %3845 = vrot.lane.b32.xlu1 %v3710_v48, %s6074_s17  ;;  %v3733_v61 = vmul.f32 %v3685_v38, %v6653_v42  ;;  %v5599_v38 = vld [vmem:[#allocation16 + $0x38] sm:$0xff]  }
 0xe43   : > { %v3667_v32 = vpop.permute.xlu1 %3666 }
 0xe44   : > { %v3711_v19 = vpack.c.bf16 %v3701_v58, %v3700_v44  ;;  %v3686_v33 = vsel %vm889_vm1, %v3667_v32, %v7424_v47  ;;  %v3669_v36 = vpop.permute.xlu0 %3668  ;;  %v3743_v51 = vpack.c.bf16 %v3733_v61, %v3732_v46  ;;  %v5600_v58 = vld [vmem:[#allocation16 + $0x50] sm:$0xff]  }
 0xe45   : > { %v3687_v8 = vsel %vm889_vm1, %v3669_v36, %v7419_v18  ;;  %v3702_v52 = vmul.f32 %v3686_v33, %v6638_v25  ;;  %v3722_v18 = vmul.f32 %v3674_v13, %v6653_v42  ;;  %v3740_v13 = vpack.c.bf16 %v3727_v57, %v3726_v21 }
 0xe46   : > { %v3703_v29 = vmul.f32 %v3687_v8, %v6638_v25  ;;  %3847 = vrot.lane.b32.xlu0 %v3711_v19, %s6074_s17  ;;  %v3735_v59 = vmul.f32 %v3687_v8, %v6653_v42  ;;  %v3734_v50 = vmul.f32 %v3686_v33, %v6653_v42 }
 0xe47   : > { %v3671_v20 = vpop.permute.xlu1 %3670  ;;  %v3738_v27 = vpack.c.bf16 %v3723_v0, %v3722_v18  ;;  %v5671_v0 = vld [vmem:[#allocation11 + $0x8] sm:$0xff]  }
 0xe48   : > { %v3712_v1 = vpack.c.bf16 %v3703_v29, %v3702_v52  ;;  %v3688_v35 = vsel %vm889_vm1, %v3671_v20, %v7440_v5  ;;  %v3673_v47 = vpop.permute.xlu0 %3672  ;;  %v3724_v5 = vmul.f32 %v3676_v11, %v6653_v42  ;;  %v3744_v9 = vpack.c.bf16 %v3735_v59, %v3734_v50  ;;  %v5601_v29 = vld [vmem:[#allocation16 + $0x58] sm:$0xff]   ;;  %v5670_v20 = vld [vmem:[#allocation11] sm:$0xff]  }
 0xe49   : > { %v3689_v7 = vsel %vm889_vm1, %v3673_v47, %v7433_v17  ;;  %v3704_v23 = vmul.f32 %v3688_v35, %v6638_v25  ;;  %v3736_v53 = vmul.f32 %v3688_v35, %v6653_v42 }
 0xe4a   : > { %v3705_v16 = vmul.f32 %v3689_v7, %v6638_v25  ;;  %3849 = vrot.lane.b32.xlu1 %v3712_v1, %s6074_s17  ;;  %v3739_v17 = vpack.c.bf16 %v3725_v3, %v3724_v5  ;;  %v3729_v25 = vmul.f32 %v3681_v28, %v6653_v42  ;;  %v3737_v10 = vmul.f32 %v3689_v7, %v6653_v42  ;;  %v4765_v28 = vld [vmem:[%s6603_s14 + $0x30] sm:$0xff]  ;;  %s5935_s14 = scalar_lea.vmem %s7608_s12, 512 }
 0xe4b   : > { %v4769_v42 = vld [vmem:[%s7074_s19 + $0x30] sm:$0xff]  ;;  %p5936_p13 = scmp.ne.s32.totalorder %s7608_s12, %s5935_s14 }
 0xe4c   : > { %v3713_v22 = vpack.c.bf16 %v3705_v16, %v3704_v23  ;;  %v3741_v11 = vpack.c.bf16 %v3729_v25, %v3728_v56  ;;  %v3745_v26 = vpack.c.bf16 %v3737_v10, %v3736_v53 }
 0xe4d   : > { %p5937_p8 = pnand %p5936_p13, %p7742_p7 }
 0xe4e   : > { %3935 = vrot.lane.b32.xlu1 %v3738_v27, %s6075_s21  ;;  %3851 = vrot.lane.b32.xlu0 %v3713_v22, %s6074_s17 }
 0xe4f   : > { %p5938_p0 = pneg %p5937_p8 }
 0xe52   : > { %3939 = vrot.lane.b32.xlu1 %v3740_v13, %s6075_s21  ;;  %3937 = vrot.lane.b32.xlu0 %v3739_v17, %s6075_s21 }
 0xe56   : > { %3943 = vrot.lane.b32.xlu1 %v3742_v14, %s6075_s21  ;;  %3941 = vrot.lane.b32.xlu0 %v3741_v11, %s6075_s21 }
 0xe5a   : > { %3947 = vrot.lane.b32.xlu1 %v3744_v9, %s6075_s21  ;;  %3945 = vrot.lane.b32.xlu0 %v3743_v51, %s6075_s21 }
 0xe5e   : > { %4019 = vperm.xlu1 %5513, %v4763_v12   ;;  %3949 = vrot.lane.b32.xlu0 %v3745_v26, %s6075_s21 }
 0xe62   : > { %4029 = vperm.xlu1 %5513, %v4765_v28   ;;  %4024 = vperm.xlu0 %5512, %v4764_v4  }
 0xe66   : > { %4052 = vperm.xlu1 %5513, %v4767_v45   ;;  %4034 = vperm.xlu0 %5512, %v4766_v62  }
 0xe6a   : > { %4062 = vperm.xlu1 %5513, %v4769_v42   ;;  %4057 = vperm.xlu0 %5512, %v4768_v37  }
 0xe6e   : > { %4067 = vperm.xlu0 %5512, %v4770_v54  }
 0xea4   : > { %v3838_v40 = vpop.permute.xlu1 %3837 }
 0xea5   : > { %5169 = vmatprep.subr.bf16.mxu1 %v3838_v40 }
 0xea6   : > { %5170 = vmatpush3.bf16.msra.mxu1 %v3838_v40 }
 0xea8   : > { %v3840_v55 = vpop.permute.xlu0 %3839 }
 0xea9   : > { %5171 = vmatprep.subr.bf16.mxu1 %v3840_v55 }
 0xeaa   : > { %5172 = vmatpush3.bf16.msra.mxu1 %v3840_v55  ;;  %v5676_v55 = vld [vmem:[#allocation7] sm:$0xff] }
 0xeac   : > { %v3842_v2 = vpop.permute.xlu1 %3841 }
 0xead   : > { %5173 = vmatprep.subr.bf16.mxu1 %v3842_v2 }
 0xeae   : > { %5174 = vmatpush3.bf16.msra.mxu1 %v3842_v2 }
 0xeb0   : > { %v3844_v30 = vpop.permute.xlu0 %3843 }
 0xeb1   : > { %5175 = vmatprep.subr.bf16.mxu1 %v3844_v30 }
 0xeb2   : > { %5176 = vmatpush3.bf16.msra.mxu1 %v3844_v30  ;;  %v5677_v30 = vld [vmem:[#allocation7 + $0x8] sm:$0xff] }
 0xeb4   : > { %v3846_v39 = vpop.permute.xlu1 %3845 }
 0xeb5   : > { %5177 = vmatprep.subr.bf16.mxu1 %v3846_v39 }
 0xeb6   : > { %5178 = vmatpush3.bf16.msra.mxu1 %v3846_v39 }
 0xeb8   : > { %v3848_v48 = vpop.permute.xlu0 %3847 }
 0xeb9   : > { %5179 = vmatprep.subr.bf16.mxu1 %v3848_v48 }
 0xeba   : > { %5180 = vmatpush3.bf16.msra.mxu1 %v3848_v48 }
 0xebc   : > { %v3850_v24 = vpop.permute.xlu1 %3849 }
 0xebd   : > { %5181 = vmatprep.subr.bf16.mxu1 %v3850_v24 }
 0xebe   : > { %5182 = vmatpush3.bf16.msra.mxu1 %v3850_v24 }
 0xec0   : > { %v3852_v34 = vpop.permute.xlu0 %3851  ;;  %v3936_v44 = vpop.permute.xlu1 %3935 }
 0xec1   : > { %5183 = vmatprep.subr.bf16.mxu1 %v3852_v34 }
 0xec2   : > { %5184 = vmatpush3.bf16.msra.mxu1 %v3852_v34 }
 0xec3   : > { %5189 = vmatprep.subr.bf16.mxu1 %v3936_v44 }
 0xec4   : > { %v3938_v32 = vpop.permute.xlu0 %3937  ;;  %v3940_v19 = vpop.permute.xlu1 %3939 }
 0xec5   : > { %5186 = vmatmul.mubr.bf16.vlgmr.msra.gmra.mrb[12].mxu1 %v5599_v38 }
 0xec6   : > { %5190 = vmatpush3.bf16.msra.mxu1 %v3936_v44  ;;  %5205 = vmatprep.mubr.bf16.mxu1 %v5600_v58 }
 0xec7   : > { %5191 = vmatprep.subr.bf16.mxu1 %v3938_v32 }
 0xec8   : > { %v3942_v33 = vpop.permute.xlu0 %3941  ;;  %v3944_v36 = vpop.permute.xlu1 %3943 }
 0xeca   : > { %5192 = vmatpush3.bf16.msra.mxu1 %v3938_v32 }
 0xecb   : > { %5193 = vmatprep.subr.bf16.mxu1 %v3940_v19 }
 0xecc   : > { %v3946_v31 = vpop.permute.xlu0 %3945  ;;  %v3948_v8 = vpop.permute.xlu1 %3947 }
 0xece   : > { %5194 = vmatpush3.bf16.msra.mxu1 %v3940_v19 }
 0xecf   : > { %5195 = vmatprep.subr.bf16.mxu1 %v3942_v33 }
 0xed0   : > { %v3950_v52 = vpop.permute.xlu0 %3949 }
 0xed2   : > { %5196 = vmatpush3.bf16.msra.mxu1 %v3942_v33 }
 0xed3   : > { %5197 = vmatprep.subr.bf16.mxu1 %v3944_v36 }
 0xed6   : > { %5198 = vmatpush3.bf16.msra.mxu1 %v3944_v36 }
 0xed7   : > { %5199 = vmatprep.subr.bf16.mxu1 %v3946_v31 }
 0xeda   : > { %5200 = vmatpush3.bf16.msra.mxu1 %v3946_v31 }
 0xedb   : > { %5201 = vmatprep.subr.bf16.mxu1 %v3948_v8 }
 0xedd   : > { %v4020_v1 = vpop.permute.xlu1 %4019 }
 0xede   : > { %5202 = vmatpush3.bf16.msra.mxu1 %v3948_v8 }
 0xedf   : > { %5203 = vmatprep.subr.bf16.mxu1 %v3950_v52 }
 0xee1   : > { %v4025_v35 = vpop.permute.xlu0 %4024  ;;  %v4030_v47 = vpop.permute.xlu1 %4029 }
 0xee2   : > { %5204 = vmatpush3.bf16.msra.mxu1 %v3950_v52  ;;  %v5678_v52 = vld [vmem:[#allocation10 + $0x8] sm:$0xff]  }
 0xee3   : > { %5217 = vmatprep.subr.bf16.mxu1 %v6071_v6 }
 0xee5   : > { %5206 = vmatmul.mubr.bf16.vlgmr.msra.gmra.mrb[12].mxu1 %v5601_v29  ;;  %v4035_v7 = vpop.permute.xlu0 %4034  ;;  %v4053_v18 = vpop.permute.xlu1 %4052 }
 0xee6   : > { %5218 = vmatpush3.bf16.msra.mxu1 %v5670_v20  ;;  %5221 = vmatprep.mubr.msk.bf16.mxu1 %vm6077_vm4, %v6071_v6  ;;  %v5679_v20 = vld [vmem:[%s6569_s23 + $0x10] sm:$0xff] }
 0xee7   : > { %5219 = vmatprep.subr.bf16.mxu1 %v6071_v6 }
 0xee9   : > { %v4058_v23 = vpop.permute.xlu0 %4057  ;;  %v4063_v56 = vpop.permute.xlu1 %4062 }
 0xeea   : > { %5220 = vmatpush3.bf16.msra.mxu1 %v5671_v0 }
 0xeed   : > { %v4068_v15 = vpop.permute.xlu0 %4067 }
 0xfb8   : > { %v5207_v16 = vpop.f32.mrb[12].mxu1 }
 0xfb9   : > { %v4039_v27 = vmul.f32 %v5207_v16, %v4030_v47  ;;  %v3993_v3 = vpop.f32.mrb[13].mxu1 }
 0xfba   : > { %v4037_v57 = vmul.f32 %v4020_v1, %v3993_v3  ;;  %v5208_v22 = vpop.f32.mrb[14].mxu1 }
 0xfbb   : > { %v4043_v5 = vadd.f32 %v4039_v27, %v7118_v49  ;;  %v4040_v21 = vmul.f32 %v5208_v22, %v4035_v7  ;;  %v3996_v17 = vpop.f32.mrb[15].mxu1  ;;  %v5682_v27 = vld [vmem:[%s6569_s23 + $0x8] sm:$0xff] }
 0xfbc   : > { %v4041_v13 = vadd.f32 %v4037_v57, %v7109_v60  ;;  %v4038_v25 = vmul.f32 %v4025_v35, %v3996_v17  ;;  %v5672_v60 = vld [vmem:[#allocation8 + $0x8] sm:$0xff]   ;;  %v5680_v35 = vld [vmem:[%s6569_s23] sm:$0xff] }
 0xfbd   : > { %v4044_v43 = vadd.f32 %v4040_v21, %v7112_v63  ;;  %v4072_v14 = vadd.f32 %v4063_v56, %v4043_v5  ;;  %v5673_v63 = vld [vmem:[#allocation13] sm:$0xff]  }
 0xfbe   : > { %v4042_v11 = vadd.f32 %v4038_v25, %v7114_v41  ;;  %v4070_v59 = vadd.f32 %v4053_v18, %v4041_v13  ;;  %v5674_v41 = vld [vmem:[#allocation13 + $0x8] sm:$0xff]   ;;  %v5681_v18 = vld [vmem:[%s6569_s23 + $0x18] sm:$0xff] }
 0xfbf   : > { %v4073_v61 = vadd.f32 %v4068_v15, %v4044_v43 }
 0xfc0   : > { %v4071_v46 = vadd.f32 %v4058_v23, %v4042_v11 }
 0xfc1   : > { %v4075_v50 = vpack.c.bf16 %v4073_v61, %v4072_v14 }
 0xfc2   : > { %v4074_v51 = vpack.c.bf16 %v4071_v46, %v4070_v59 }
 0xfc4   : > { %5209 = vmatprep.subr.bf16.mxu0 %v4074_v51 }
 0xfc5   : > { %5210 = vmatpush3.bf16.msra.mxu0 %v4074_v51 }
 0xfc6   : > { %5211 = vmatprep.subr.bf16.mxu0 %v4075_v50 }
 0xfc9   : > { %5212 = vmatpush3.bf16.msra.mxu0 %v4075_v50 }
 0xfca   : > { %5225 = vmatprep.subr.bf16.mxu0 %v6071_v6 }
 0xfcc   : > { %5214 = vmatmul.mubr.msk.bf16.vlgmr.msra.gmra.mrb[40].mxu0 %vm1009_vm2, %v5672_v60 }
 0xfcd   : > { %5226 = vmatpush3.bf16.msra.mxu0 %v5673_v63  ;;  %5229 = vmatprep.mubr.msk.bf16.mxu0 %vm6077_vm4, %v6071_v6 }
 0xfce   : > { %5227 = vmatprep.subr.bf16.mxu0 %v6071_v6  ;;  %v5675_v6 = vld [vmem:[#allocation10] sm:$0xff]  }
 0xfd1   : > { %5228 = vmatpush3.bf16.msra.mxu0 %v5674_v41 }
0x109f   : > { %v5215_v49 = vpop.f32.mrb[40].mxu0 }
0x10a0   : > { %v4110_v9 = vpop.f32.mrb[41].mxu0 }
0x10a1   : > { %v5216_v10 = vpop.f32.mrb[42].mxu0 }
0x10a2   : > { %v5524_v53 = vpack.i.bf16 %v5216_v10, %v5215_v49  ;;  %v4113_v12 = vpop.f32.mrb[43].mxu0 }
0x10a4   : > { %5525 = vrot.lane.b32.xlu1 %v5524_v53, %s6070_s26  ;;  %s6079_s26 = smov [#allocation23]  }
0x10a5   : > { %s5939_s20 = sshll.u32 %s6079_s26, 4  ;;  %s5940_s20 = int_to_ptr.vmem [resolvable:$false] %s5939_s20 }
0x10a6   : > { %s5941_s15 = scalar_lea.vmem %s5940_s20, 1024  ;;  %p5942_p9 = scmp.lt.s32.totalorder %s7608_s12, %s5940_s20 }
0x10a7   : > { %p5943_p3 = scmp.lt.s32.totalorder %s5941_s15, %s5935_s14 }
0x10a9   : > { %p5944_p10 = por %p5943_p3, %p5942_p9 }
0x10ab   : > { %p5945_p1 = pnand %p5944_p10, %p5938_p0 }
0x1116   : > { %v5526_v26 = vpop.permute.xlu1 %5525 }
0x1117   : > { %v5528_v28 = vunpack.i.h.bf16 %v5526_v26  ;;  %v5527_v4 = vunpack.i.l.bf16 %v5526_v26 }
0x1119   : > { %v4133_v45 = vsel %vm2422_vm5, %v4110_v9, %v5527_v4  ;;  %v4134_v62 = vsel %vm2422_vm5, %v4113_v12, %v5528_v28 }
0x111a   : > { %v4135_v42 = vpack.c.bf16 %v4134_v62, %v4133_v45 }
0x111c   : > { %5222 = vmatmul.mubr.msk.bf16.vlgmr.msra.gmra.mrb[16].mxu1 %vm1009_vm2, %v4135_v42 }
0x111d   : > { %5237 = vmatprep.mubr.msk.bf16.mxu1 %vm1009_vm2, %v5675_v6 }
0x11ef   : > { %v4173_v37 = vpop.f32.mrb[16].mxu1 }
0x11f0   : > { %v5223_v54 = vpop.f32.mrb[17].mxu1  ;;  %v4180_v2 = vmul.f32 %v5676_v55, %v4173_v37 }
0x11f1   : > { %v4176_v40 = vpop.f32.mrb[18].mxu1 }
0x11f2   : > { %v4181_v39 = vmul.f32 %v5677_v30, %v4176_v40  ;;  %v5224_v48 = vpop.f32.mrb[19].mxu1 }
0x11f4   : > { %v4182_v24 = vpack.c.bf16 %v4181_v39, %v4180_v2 }
0x11f6   : > { %5230 = vmatmul.mubr.msk.bf16.vlgmr.msra.gmra.mrb[44].mxu0 %vm1009_vm2, %v4182_v24 }
0x12c9   : > { %v4220_v34 = vpop.f32.mrb[44].mxu0 }
0x12ca   : > { %v5231_v38 = vpop.f32.mrb[45].mxu0 }
0x12cb   : > { %v4223_v44 = vpop.f32.mrb[46].mxu0 }
0x12cc   : > { %v5529_v58 = vpack.i.bf16 %v4223_v44, %v4220_v34  ;;  %v4235_v32 = vpack.c.bf16 %v4223_v44, %v4220_v34  ;;  %v5232_v19 = vpop.f32.mrb[47].mxu0 }
0x12ce   : > { %5530 = vrot.lane.b32.xlu0 %v5529_v58, %s6078_s16  ;;  %5233 = vmatprep.subr.bf16.mxu1 %v4235_v32 }
0x12cf   : > { %5234 = vmatpush3.bf16.msra.mxu1 %v4235_v32 }
0x1340   : > { %v5531_v33 = vpop.permute.xlu0 %5530 }
0x1341   : > { %v5533_v36 = vunpack.i.h.bf16 %v5531_v33  ;;  %v5532_v31 = vunpack.i.l.bf16 %v5531_v33 }
0x1343   : > { %v4236_v8 = vpack.c.bf16 %v5533_v36, %v5532_v31 }
0x1345   : > { %5235 = vmatprep.subr.bf16.mxu1 %v4236_v8 }
0x1346   : > { %5236 = vmatpush3.bf16.msra.mxu1 %v4236_v8 }
0x1349   : > { %5238 = vmatmul.mubr.msk.bf16.vlgmr.msra.gmra.mrb[20].mxu1 %vm1009_vm2, %v5678_v52 }
0x141c   : > { %v5239_v29 = vpop.f32.mrb[20].mxu1 }
0x141d   : > { %v4288_v0 = vadd.f32 %v5679_v20, %v5239_v29  ;;  %v4271_v1 = vpop.f32.mrb[21].mxu1 }
0x141e   : > { %v4286_v47 = vadd.f32 %v5680_v35, %v4271_v1  ;;  %v5240_v7 = vpop.f32.mrb[22].mxu1 }
0x141f   : > { %4292 = vst.msk [vmem:[%s853_s29 + $0x10] sm:$0xff] %vm2422_vm5, %v4288_v0  ;;  %v4289_v23 = vadd.f32 %v5681_v18, %v5240_v7  ;;  %v4274_v16 = vpop.f32.mrb[23].mxu1 }
0x1420   : > { %4290 = vst.msk [vmem:[%s853_s29] sm:$0xff] %vm2422_vm5, %v4286_v47  ;;  %v4287_v3 = vadd.f32 %v5682_v27, %v4274_v16 }
0x1421   : > { %4293 = vst.msk [vmem:[%s853_s29 + $0x18] sm:$0xff] %vm2422_vm5, %v4289_v23 }
0x1422   : > { %4291 = vst.msk [vmem:[%s853_s29 + $0x8] sm:$0xff] %vm2422_vm5, %v4287_v3 }
0x1423   : > { %5948 = shalt.err (!%p5945_p1)
}
0x1424   : > { %s5949_s23 = scalar_lea.hbm %s7616_s30, 512  ;;  %s5953_s19 = scalar_lea.hbm %s7741_s18, 1024 }
0x1425   : > { %p5950_p2 = scmp.ne.s32.totalorder %s7616_s30, %s5949_s23  ;;  %p5954_p12 = scmp.lt.u32.totalorder %s7616_s30, %s7741_s18 }
0x1426   : > { %p5955_p6 = scmp.lt.u32.totalorder %s5953_s19, %s5949_s23  ;;  %p5957_p8 = scmp.lt.u32.totalorder %s5949_s23, %s7616_s30 }
0x1427   : > { %p5951_p5 = pnand %p5950_p2, %p7742_p7 }
0x1428   : > { %p5956_p13 = por %p5955_p6, %p5954_p12 }
0x1429   : > { %p5952_p11 = pneg %p5951_p5 }
0x142a   : > { %p5958_p0 = por %p5957_p8, %p5956_p13 }
0x142c   : > { %p5959_p9 = pnand %p5958_p0, %p5952_p11 }
0x142e   : > { %5962 = shalt.err (!%p5959_p9)
}
0x142f   : > { %s6080_s3 = smov 128   ;;  %s6081_s25 = smov 8  }
0x1430   : > { %5389 = dma.vmem_to_hbm [thread:$0]  (%p7742_p7), %s7608_s12, 512, %s7616_s30, %s4295_s22, %s6080_s3, %s6080_s3, %s6081_s25  }
0x1431 PF: > { %s7743_s13 = sld [smem:[#allocation45_spill]]  ;;  %s7744_s14 = sld [smem:[#allocation52_spill]] }
0x1437   : > { %s4323_s26 = sand.u32 1, %s7743_s13   ;;  %p7745_p3 = scmp.ne.s32.totalorder %s7744_s14, 0 }
0x1438   : > { %s4324_s20 = scalar_lea.sflag [#allocation4], %s4323_s26 }
0x1439   : > { %p5414_p10 = pnand %p4565_p4, %p7745_p3 }
0x143b   : > { %6012 = dma.done.wait (!%p5414_p10), %s4324_s20, 512  }
0x143c   : > { %6014 = vsyncadd (!%p5414_p10), %s4324_s20, 4294966784  ;;  %s7746_s28 = sld [smem:[#allocation48_spill]]  ;;  %s7747_s25 = sld [smem:[#allocation46_spill]] }
0x143d   : > { %s7748_s15 = sld [smem:[#allocation49_spill]]  ;;  %s7749_s26 = smov %s6025_s27 }
0x1442   : > { %p38_p1 = scmp.ge.s32.totalorder %s7746_s28, 4  }
0x1443   : > { %s7750_s27 = smov %s7748_s15 }
0x1444   :  { %40 = sbr.rel (!%p38_p1) target bundleno = 19 (0x13), region = 240 }
0x144b   :  { %4329 = vsyncpa [#allocation3], 1 }
0x144c   :  { %4331 = vsyncpa [#allocation3 + $0x1], 1 }
0x144d   :  { %4332 = vsyncpa [#allocation6], 1 }
0x144e   :  { %4334 = vsyncpa [#allocation6 + $0x1], 1 }
0x144f   :  { %4335 = vsyncpa [#allocation9], 1 }
0x1450   :  { %4336 = vsyncpa [#allocation12], 1 }
0x1451   :  { %4337 = vsyncpa [#allocation15], 1 }
0x1452   :  { %4338 = vsyncpa [#allocation18], 1 }
0x1453   :  { %4340 = vsyncpa [#allocation18 + $0x1], 1 }
0x1454   :  { %4341 = vsyncpa [#allocation21], 1 }
0x1455   :  { %4343 = vsyncpa [#allocation21 + $0x1], 1 }
0x1456   :  { %4344 = vsyncpa [#allocation4], 1 }
0x1457   :  { %4346 = vsyncpa [#allocation4 + $0x1], 1 }

</bundles_post_ra>
